<compile_context>
chip_gen: v5e
topology: v5e:2x2
jax: 0.10.0
libtpu: 0.0.40
codegen_flags: <defaults>
</compile_context>

<pallas_src>
import math

import numpy as np
import jax
import jax.numpy as jnp
from jax.experimental import pallas as pl
from jax.experimental.pallas import tpu as pltpu

HIDDEN1 = 32          # hidden_size1
HIDDEN2 = 32          # hidden_size2
FRAG = 96             # fragment spatial size
IMG = 288             # image spatial size
EF_FEATS = 1280       # efficientnet feature width (surrogate)
EF_OUT = 64           # ef.classifier output width
N_CLASSES = 9
BN_EPS = 1e-5
N_CHUNKS = 3          # K-chunks of the image row-reduction matmul (grid size)

# Fragment index of each of the 24 concatenated 64-wide feature blocks
# (hori_set / vert_set of the PyTorch module; both pair members use index [0],
# exactly as written upstream).  Fragment 8 is never used.
_CONCAT_IDX = [0, 0, 1, 1, 3, 3, 4, 4, 6, 6, 7, 7,
               0, 0, 1, 1, 2, 2, 3, 3, 4, 4, 5, 5]


# ---------------------------------------------------------------------------
# Fused kernel.
#   grid step g:   acc(18,288) += A_chunk(18,576) @ x_chunk(576,288)   (MXU)
#   last step:     column-band pooling matmul, surrogate EF head, folded
#                  fc1/concat contraction and the whole MLP tail.
# All ops are 2D jnp.dot / elementwise / static aligned slices only.
# ---------------------------------------------------------------------------
def fused_kernel(x_ref, a_ref, crep_ref, mask18_ref, asum_ref,
                 wbd_ref, bb3_ref, wc_ref, bc_ref,
                 w1cat_ref, maskz_ref, bsel_ref, gsum_ref, b1_ref,
                 w23_ref, b23_ref, w4_ref, b4_ref, w5_ref, b5_ref,
                 o_ref, acc_ref):
    g = pl.program_id(0)

    @pl.when(g == 0)
    def _init():
        acc_ref[...] = jnp.zeros_like(acc_ref)

    # Row-band reduction of the image (K-chunked over the grid):
    # acc[(b,c,rb), col] += sum_{r in band rb} x[b, c, r, col]
    acc_ref[...] += jnp.dot(a_ref[...], x_ref[...],
                            preferred_element_type=jnp.float32)

    @pl.when(g == pl.num_programs(0) - 1)
    def _head():
        # Column-band reduction; lanes = (cb, c-slot); 1/9216 folded into crep.
        q = jnp.dot(acc_ref[...], crep_ref[...],
                    preferred_element_type=jnp.float32)            # (B*9, 9)
        # Keep only the lane whose channel slot matches the row's channel,
        # then sum the 3 channel rows per (b, rb):
        # t[(b,rb), cb*3+c] = mean of channel c over fragment (rb, cb).
        t = jnp.dot(asum_ref[...], q * mask18_ref[...],
                    preferred_element_type=jnp.float32)            # (B*3, 9)

        # --- surrogate EfficientNet head (TODO(synk): real efficientnet_b0
        #     backbone is not reproduced) ---
        p = jnp.dot(t, wbd_ref[...],
                    preferred_element_type=jnp.float32) + bb3_ref[...]  # (B*3, 3840)
        h = p * jax.nn.sigmoid(p)                                   # SiLU
        hb = h.astype(jnp.bfloat16)
        wc = wc_ref[...]                                            # bf16 (1280, 64)
        f0 = jnp.dot(hb[:, 0:EF_FEATS], wc,
                     preferred_element_type=jnp.float32) + bc_ref[...]
        f1 = jnp.dot(hb[:, EF_FEATS:2 * EF_FEATS], wc,
                     preferred_element_type=jnp.float32) + bc_ref[...]
        f2 = jnp.dot(hb[:, 2 * EF_FEATS:3 * EF_FEATS], wc,
                     preferred_element_type=jnp.float32) + bc_ref[...]   # (B*3, 64) each

        # --- fen.fc1 (+bn, + 24-way duplicated concat folded into w1cat) ---
        zall = (jnp.dot(f0, w1cat_ref[0:EF_OUT, :],
                        preferred_element_type=jnp.float32)
                + jnp.dot(f1, w1cat_ref[EF_OUT:2 * EF_OUT, :],
                          preferred_element_type=jnp.float32)
                + jnp.dot(f2, w1cat_ref[2 * EF_OUT:3 * EF_OUT, :],
                          preferred_element_type=jnp.float32))      # (B*3, 96)
        zsel = zall * maskz_ref[...]                                # keep rb'==rb
        z = jnp.dot(bsel_ref[...], zsel,
                    preferred_element_type=jnp.float32)             # (B, 96)
        z = jnp.dot(z, gsum_ref[...],
                    preferred_element_type=jnp.float32) + b1_ref[...]  # (B, 32)
        z = jnp.maximum(z, 0.0)                                     # fen relu

        # fen.fc2 and outsider.fc1(+bn1) folded into one 32x32 Linear.
        z = jnp.dot(z, w23_ref[...],
                    preferred_element_type=jnp.float32) + b23_ref[...]
        z = jnp.maximum(z, 0.0)                                     # outsider relu1
        z = jnp.dot(z, w4_ref[...],
                    preferred_element_type=jnp.float32) + b4_ref[...]
        z = jnp.maximum(z, 0.0)                                     # outsider relu2
        o_ref[...] = jnp.dot(z, w5_ref[...],
                             preferred_element_type=jnp.float32) + b5_ref[...]


# ---------------------------------------------------------------------------
# Parameter / constant construction (deterministic, PyTorch-Linear-style init),
# with concat-duplication, BatchNorm and fc2@fc1 folding done once at init.
# ---------------------------------------------------------------------------
def init_linear(key, fan_in, fan_out):
    kw, kb = jax.random.split(key)
    bound = 1.0 / math.sqrt(fan_in)
    w = jax.random.uniform(kw, (fan_in, fan_out), jnp.float32, -bound, bound)
    b = jax.random.uniform(kb, (1, fan_out), jnp.float32, -bound, bound)
    return w, b


def _bn_eval_scale_shift(n):
    gamma = jnp.ones((n,), jnp.float32)
    beta = jnp.zeros((n,), jnp.float32)
    mean = jnp.zeros((n,), jnp.float32)
    var = jnp.ones((n,), jnp.float32)
    s = gamma / jnp.sqrt(var + BN_EPS)
    return s, beta - mean * s


def _selector_constants(B):
    """0/1 indicator matrices driving the pooling / concat matmuls."""
    rows = B * 3 * IMG
    chunk = rows // N_CHUNKS
    A = np.zeros((B * 9, rows), np.float32)          # row j = b*9 + c*3 + rb
    M18 = np.zeros((B * 9, 9), np.float32)           # 1{lane-channel == c(j)}
    Asum = np.zeros((B * 3, B * 9), np.float32)      # sum channels per (b, rb)
    for b in range(B):
        for c in range(3):
            for rb in range(3):
                j = b * 9 + c * 3 + rb
                base = b * 3 * IMG + c * IMG + rb * FRAG
                A[j, base:base + FRAG] = 1.0
                M18[j, np.arange(3) * 3 + c] = 1.0
                Asum[b * 3 + rb, j] = 1.0
    a_in = np.ascontiguousarray(
        A.reshape(B * 9, N_CHUNKS, chunk).transpose(1, 0, 2))   # (3, B*9, chunk)

    crep = np.zeros((IMG, 9), np.float32)            # lanes = cb*3 + c-slot
    for cb in range(3):
        crep[cb * FRAG:(cb + 1) * FRAG, cb * 3:(cb + 1) * 3] = 1.0 / (FRAG * FRAG)

    maskz = np.zeros((B * 3, 3 * HIDDEN1), np.float32)
    bsel = np.zeros((B, B * 3), np.float32)
    gsum = np.zeros((3 * HIDDEN1, HIDDEN1), np.float32)
    for b in range(B):
        for rb in range(3):
            maskz[b * 3 + rb, rb * HIDDEN1:(rb + 1) * HIDDEN1] = 1.0
        bsel[b, b * 3:(b + 1) * 3] = 1.0
    for rb in range(3):
        gsum[rb * HIDDEN1:(rb + 1) * HIDDEN1, :] = np.eye(HIDDEN1, dtype=np.float32)

    return {k: jnp.asarray(v) for k, v in
            dict(a_in=a_in, crep=crep, mask18=M18, asum=Asum,
                 maskz=maskz, bsel=bsel, gsum=gsum).items()}


def init_model(key, B):
    ks = jax.random.split(key, 7)
    ef_wb, ef_bb = init_linear(ks[0], 3, EF_FEATS)          # surrogate backbone
    ef_wc, ef_bc = init_linear(ks[1], EF_FEATS, EF_OUT)     # ef.classifier
    fc1_w, fc1_b = init_linear(ks[2], 128 * 12, HIDDEN1)    # fen.fc1  (1536, 32)
    fc2_w, fc2_b = init_linear(ks[3], HIDDEN1, HIDDEN2)     # fen.fc2
    ofc1_w, ofc1_b = init_linear(ks[4], HIDDEN2, HIDDEN2)   # outsider.fc1
    ofc2_w, ofc2_b = init_linear(ks[5], HIDDEN2, HIDDEN2)   # outsider.fc2
    out_w, out_b = init_linear(ks[6], HIDDEN2, N_CLASSES)   # outsider.outlayer

    # Surrogate EF first layer as a column-band block-diagonal weight.
    wbd = jnp.zeros((9, 3 * EF_FEATS), jnp.float32)
    for cb in range(3):
        wbd = wbd.at[cb * 3:(cb + 1) * 3,
                     cb * EF_FEATS:(cb + 1) * EF_FEATS].set(ef_wb)
    bb3 = jnp.tile(ef_bb, (1, 3))                            # (1, 3840)

    # Fold the duplicated 24-block feature concat + fen BatchNorm into fc1.
    blocks = fc1_w.reshape(24, EF_OUT, HIDDEN1)
    w1f = jnp.zeros((9, EF_OUT, HIDDEN1), jnp.float32)
    for k, f in enumerate(_CONCAT_IDX):
        w1f = w1f.at[f].add(blocks[k])                       # fragment 8 stays 0
    s, t = _bn_eval_scale_shift(HIDDEN1)
    w1f = w1f * s[None, None, :]
    b1 = fc1_b * s[None, :] + t[None, :]
    w1cat = jnp.zeros((3 * EF_OUT, 3 * HIDDEN1), jnp.float32)
    for rb in range(3):
        for cb in range(3):
            w1cat = w1cat.at[cb * EF_OUT:(cb + 1) * EF_OUT,
                             rb * HIDDEN1:(rb + 1) * HIDDEN1].set(w1f[rb * 3 + cb])

    # Fold fen.fc2 with outsider.fc1 (+bn1) -> single 32x32 Linear.
    s1, t1 = _bn_eval_scale_shift(HIDDEN2)
    w3f = ofc1_w * s1[None, :]
    b3f = ofc1_b * s1[None, :] + t1[None, :]
    w23 = fc2_w @ w3f
    b23 = fc2_b @ w3f + b3f

    s2, t2 = _bn_eval_scale_shift(HIDDEN2)                   # outsider bn2
    w4 = ofc2_w * s2[None, :]
    b4 = ofc2_b * s2[None, :] + t2[None, :]

    m = dict(wbd=wbd, bb3=bb3, wc=ef_wc.astype(jnp.bfloat16), bc=ef_bc,
             w1cat=w1cat, b1=b1, w23=w23, b23=b23, w4=w4, b4=b4,
             w5=out_w, b5=out_b)
    m.update(_selector_constants(B))
    return m


# ---------------------------------------------------------------------------
# Forward: one pallas_call, grid over 3 contiguous image row-chunks.
# ---------------------------------------------------------------------------
def outsider_forward(x, m):
    B = x.shape[0]
    rows = B * 3 * IMG
    chunk = rows // N_CHUNKS
    x_in = jnp.reshape(x, (N_CHUNKS, chunk, IMG))            # free, layout-preserving

    args = (x_in, m["a_in"], m["crep"], m["mask18"], m["asum"],
            m["wbd"], m["bb3"], m["wc"], m["bc"],
            m["w1cat"], m["maskz"], m["bsel"], m["gsum"], m["b1"],
            m["w23"], m["b23"], m["w4"], m["b4"], m["w5"], m["b5"])

    in_specs = [
        pl.BlockSpec((None, chunk, IMG), lambda g: (g, 0, 0)),      # image chunks
        pl.BlockSpec((None, B * 9, chunk), lambda g: (g, 0, 0)),    # A chunks
    ]
    for a in args[2:]:                                              # resident weights
        in_specs.append(pl.BlockSpec(a.shape, lambda g: (0, 0)))

    flops = (2 * (B * 9) * rows * IMG
             + 2 * (B * 9) * IMG * 9
             + 2 * (B * 3) * (B * 9) * 9
             + 2 * (B * 3) * 9 * (3 * EF_FEATS)
             + 3 * 2 * (B * 3) * EF_FEATS * EF_OUT
             + 3 * 2 * (B * 3) * EF_OUT * (3 * HIDDEN1)
             + 2 * B * (B * 3) * (3 * HIDDEN1)
             + 2 * B * (3 * HIDDEN1) * HIDDEN1
             + 3 * 2 * B * HIDDEN2 * HIDDEN2
             + 2 * B * HIDDEN2 * N_CLASSES)
    bytes_accessed = sum(int(a.size) * a.dtype.itemsize for a in args) \
        + B * N_CLASSES * 4

    return pl.pallas_call(
        fused_kernel,
        out_shape=jax.ShapeDtypeStruct((B, N_CLASSES), jnp.float32),
        grid=(N_CHUNKS,),
        in_specs=in_specs,
        out_specs=pl.BlockSpec((B, N_CLASSES), lambda g: (0, 0)),
        scratch_shapes=[pltpu.VMEM((B * 9, IMG), jnp.float32)],
        compiler_params=pltpu.CompilerParams(
            dimension_semantics=("arbitrary",)),
        cost_estimate=pl.CostEstimate(
            flops=int(flops),
            transcendentals=int((B * 3) * 3 * EF_FEATS),
            bytes_accessed=int(bytes_accessed)),
    )(*args)


if __name__ == "__main__":
    key = jax.random.PRNGKey(0)
    kx, kp = jax.random.split(key)
    B = 2
    # The forward hardcodes 96/192/288 slicing, so the image must be (B, 3, 288, 288).
    x = jax.random.normal(kx, (B, 3, IMG, IMG), jnp.float32)
    model = init_model(kp, B)

    fwd = jax.jit(lambda inp: outsider_forward(inp, model))
    out = fwd(x)
    jax.block_until_ready(out)
    assert out.shape == (B, N_CLASSES) and out.dtype == jnp.float32
    print("KERNEL_OK")
</pallas_src>

<mosaic_0001>
module attributes {stable_mosaic.version = 11 : i64} {
  func.func @fused_kernel(%arg0: i32, %arg1: memref<1x576x288xf32, #tpu.memory_space<vmem>>, %arg2: memref<1x18x576xf32, #tpu.memory_space<vmem>>, %arg3: memref<288x9xf32, #tpu.memory_space<vmem>>, %arg4: memref<18x9xf32, #tpu.memory_space<vmem>>, %arg5: memref<6x18xf32, #tpu.memory_space<vmem>>, %arg6: memref<9x3840xf32, #tpu.memory_space<vmem>>, %arg7: memref<1x3840xf32, #tpu.memory_space<vmem>>, %arg8: memref<1280x64xbf16, #tpu.memory_space<vmem>>, %arg9: memref<1x64xf32, #tpu.memory_space<vmem>>, %arg10: memref<192x96xf32, #tpu.memory_space<vmem>>, %arg11: memref<6x96xf32, #tpu.memory_space<vmem>>, %arg12: memref<2x6xf32, #tpu.memory_space<vmem>>, %arg13: memref<96x32xf32, #tpu.memory_space<vmem>>, %arg14: memref<1x32xf32, #tpu.memory_space<vmem>>, %arg15: memref<32x32xf32, #tpu.memory_space<vmem>>, %arg16: memref<1x32xf32, #tpu.memory_space<vmem>>, %arg17: memref<32x32xf32, #tpu.memory_space<vmem>>, %arg18: memref<1x32xf32, #tpu.memory_space<vmem>>, %arg19: memref<32x9xf32, #tpu.memory_space<vmem>>, %arg20: memref<1x9xf32, #tpu.memory_space<vmem>>, %arg21: memref<2x9xf32, #tpu.memory_space<vmem>>, %arg22: memref<18x288xf32, #tpu.memory_space<vmem>>) attributes {dimension_semantics = [#tpu.dimension_semantics<arbitrary>], iteration_bounds = array<i64: 3>, scalar_prefetch = 0 : i64, scratch_operands = 1 : i64, tpu.core_type = #tpu.core_type<tc>, window_params = [{transform_indices = @transform_0, window_bounds = array<i64: 1, 576, 288>}, {transform_indices = @transform_1, window_bounds = array<i64: 1, 18, 576>}, {pipeline_mode = #tpu.pipeline_mode<synchronous>, transform_indices = @transform_2, window_bounds = array<i64: 288, 9>}, {pipeline_mode = #tpu.pipeline_mode<synchronous>, transform_indices = @transform_3, window_bounds = array<i64: 18, 9>}, {pipeline_mode = #tpu.pipeline_mode<synchronous>, transform_indices = @transform_4, window_bounds = array<i64: 6, 18>}, {pipeline_mode = #tpu.pipeline_mode<synchronous>, transform_indices = @transform_5, window_bounds = array<i64: 9, 3840>}, {pipeline_mode = #tpu.pipeline_mode<synchronous>, transform_indices = @transform_6, window_bounds = array<i64: 1, 3840>}, {pipeline_mode = #tpu.pipeline_mode<synchronous>, transform_indices = @transform_7, window_bounds = array<i64: 1280, 64>}, {pipeline_mode = #tpu.pipeline_mode<synchronous>, transform_indices = @transform_8, window_bounds = array<i64: 1, 64>}, {pipeline_mode = #tpu.pipeline_mode<synchronous>, transform_indices = @transform_9, window_bounds = array<i64: 192, 96>}, {pipeline_mode = #tpu.pipeline_mode<synchronous>, transform_indices = @transform_10, window_bounds = array<i64: 6, 96>}, {pipeline_mode = #tpu.pipeline_mode<synchronous>, transform_indices = @transform_11, window_bounds = array<i64: 2, 6>}, {pipeline_mode = #tpu.pipeline_mode<synchronous>, transform_indices = @transform_12, window_bounds = array<i64: 96, 32>}, {pipeline_mode = #tpu.pipeline_mode<synchronous>, transform_indices = @transform_13, window_bounds = array<i64: 1, 32>}, {pipeline_mode = #tpu.pipeline_mode<synchronous>, transform_indices = @transform_14, window_bounds = array<i64: 32, 32>}, {pipeline_mode = #tpu.pipeline_mode<synchronous>, transform_indices = @transform_15, window_bounds = array<i64: 1, 32>}, {pipeline_mode = #tpu.pipeline_mode<synchronous>, transform_indices = @transform_16, window_bounds = array<i64: 32, 32>}, {pipeline_mode = #tpu.pipeline_mode<synchronous>, transform_indices = @transform_17, window_bounds = array<i64: 1, 32>}, {pipeline_mode = #tpu.pipeline_mode<synchronous>, transform_indices = @transform_18, window_bounds = array<i64: 32, 9>}, {pipeline_mode = #tpu.pipeline_mode<synchronous>, transform_indices = @transform_19, window_bounds = array<i64: 1, 9>}, {pipeline_mode = #tpu.pipeline_mode<synchronous>, transform_indices = @transform_20, window_bounds = array<i64: 2, 9>}]} {
    %c0_i32 = arith.constant 0 : i32
    %0 = arith.cmpi eq, %arg0, %c0_i32 : i32
    %1 = arith.extui %0 : i1 to i32
    %c0_i32_0 = arith.constant 0 : i32
    %2 = arith.cmpi ne, %1, %c0_i32_0 : i32
    scf.if %2 {
      %cst_11 = arith.constant 0.000000e+00 : f32
      %14 = vector.broadcast %cst_11 : f32 to vector<18x288xf32>
      %c0_12 = arith.constant 0 : index
      %c0_13 = arith.constant 0 : index
      %15 = vector.load %arg22[%c0_12, %c0_13] : memref<18x288xf32, #tpu.memory_space<vmem>>, vector<18x288xf32>
      tpu.vector_store %arg22[%c0_12, %c0_13], %14 {strides = array<i32>} : memref<18x288xf32, #tpu.memory_space<vmem>>, vector<18x288xf32>,
    } else {
    }
    %c0 = arith.constant 0 : index
    %c0_1 = arith.constant 0 : index
    %3 = vector.load %arg22[%c0, %c0_1] : memref<18x288xf32, #tpu.memory_space<vmem>>, vector<18x288xf32>
    %c0_2 = arith.constant 0 : index
    %c0_3 = arith.constant 0 : index
    %c0_4 = arith.constant 0 : index
    %4 = vector.load %arg2[%c0_2, %c0_3, %c0_4] : memref<1x18x576xf32, #tpu.memory_space<vmem>>, vector<1x18x576xf32>
    %5 = vector.shape_cast %4 : vector<1x18x576xf32> to vector<18x576xf32>
    %c0_5 = arith.constant 0 : index
    %c0_6 = arith.constant 0 : index
    %c0_7 = arith.constant 0 : index
    %6 = vector.load %arg1[%c0_5, %c0_6, %c0_7] : memref<1x576x288xf32, #tpu.memory_space<vmem>>, vector<1x576x288xf32>
    %7 = vector.shape_cast %6 : vector<1x576x288xf32> to vector<576x288xf32>
    %cst = arith.constant dense<0.000000e+00> : vector<18x288xf32>
    %8 = tpu.matmul %5, %7, %cst {dimension_numbers = #tpu.dot_dimension_numbers<[1], [0], [0], [1], [0, 0, 1, 1], [], []>} : vector<18x576xf32>, vector<576x288xf32>, vector<18x288xf32> -> vector<18x288xf32>
    %9 = arith.addf %3, %8 : vector<18x288xf32>
    %c0_8 = arith.constant 0 : index
    %c0_9 = arith.constant 0 : index
    %10 = vector.load %arg22[%c0_8, %c0_9] : memref<18x288xf32, #tpu.memory_space<vmem>>, vector<18x288xf32>
    tpu.vector_store %arg22[%c0_8, %c0_9], %9 {strides = array<i32>} : memref<18x288xf32, #tpu.memory_space<vmem>>, vector<18x288xf32>,
    %c2_i32 = arith.constant 2 : i32
    %11 = arith.cmpi eq, %arg0, %c2_i32 : i32
    %12 = arith.extui %11 : i1 to i32
    %c0_i32_10 = arith.constant 0 : i32
    %13 = arith.cmpi ne, %12, %c0_i32_10 : i32
    scf.if %13 {
      %c0_11 = arith.constant 0 : index
      %c0_12 = arith.constant 0 : index
      %14 = vector.load %arg22[%c0_11, %c0_12] : memref<18x288xf32, #tpu.memory_space<vmem>>, vector<18x288xf32>
      %c0_13 = arith.constant 0 : index
      %c0_14 = arith.constant 0 : index
      %15 = vector.load %arg3[%c0_13, %c0_14] : memref<288x9xf32, #tpu.memory_space<vmem>>, vector<288x9xf32>
      %cst_15 = arith.constant dense<0.000000e+00> : vector<18x9xf32>
      %16 = tpu.matmul %14, %15, %cst_15 {dimension_numbers = #tpu.dot_dimension_numbers<[1], [0], [0], [1], [0, 0, 1, 1], [], []>} : vector<18x288xf32>, vector<288x9xf32>, vector<18x9xf32> -> vector<18x9xf32>
      %c0_16 = arith.constant 0 : index
      %c0_17 = arith.constant 0 : index
      %17 = vector.load %arg5[%c0_16, %c0_17] : memref<6x18xf32, #tpu.memory_space<vmem>>, vector<6x18xf32>
      %c0_18 = arith.constant 0 : index
      %c0_19 = arith.constant 0 : index
      %18 = vector.load %arg4[%c0_18, %c0_19] : memref<18x9xf32, #tpu.memory_space<vmem>>, vector<18x9xf32>
      %19 = arith.mulf %16, %18 : vector<18x9xf32>
      %cst_20 = arith.constant dense<0.000000e+00> : vector<6x9xf32>
      %20 = tpu.matmul %17, %19, %cst_20 {dimension_numbers = #tpu.dot_dimension_numbers<[1], [0], [0], [1], [0, 0, 1, 1], [], []>} : vector<6x18xf32>, vector<18x9xf32>, vector<6x9xf32> -> vector<6x9xf32>
      %c0_21 = arith.constant 0 : index
      %c0_22 = arith.constant 0 : index
      %21 = vector.load %arg6[%c0_21, %c0_22] : memref<9x3840xf32, #tpu.memory_space<vmem>>, vector<9x3840xf32>
      %cst_23 = arith.constant dense<0.000000e+00> : vector<6x3840xf32>
      %22 = tpu.matmul %20, %21, %cst_23 {dimension_numbers = #tpu.dot_dimension_numbers<[1], [0], [0], [1], [0, 0, 1, 1], [], []>} : vector<6x9xf32>, vector<9x3840xf32>, vector<6x3840xf32> -> vector<6x3840xf32>
      %c0_24 = arith.constant 0 : index
      %c0_25 = arith.constant 0 : index
      %23 = vector.load %arg7[%c0_24, %c0_25] : memref<1x3840xf32, #tpu.memory_space<vmem>>, vector<1x3840xf32>
      %24 = vector.broadcast %23 : vector<1x3840xf32> to vector<6x3840xf32>
      %25 = arith.addf %22, %24 : vector<6x3840xf32>
      %26 = arith.negf %25 : vector<6x3840xf32>
      %27 = math.exp %26 : vector<6x3840xf32>
      %cst_26 = arith.constant 1.000000e+00 : f32
      %28 = vector.broadcast %cst_26 : f32 to vector<6x3840xf32>
      %29 = arith.addf %28, %27 : vector<6x3840xf32>
      %30 = arith.divf %28, %29 : vector<6x3840xf32>
      %31 = arith.mulf %25, %30 : vector<6x3840xf32>
      %32 = arith.truncf %31 : vector<6x3840xf32> to vector<6x3840xbf16>
      %c0_27 = arith.constant 0 : index
      %c0_28 = arith.constant 0 : index
      %33 = vector.load %arg8[%c0_27, %c0_28] : memref<1280x64xbf16, #tpu.memory_space<vmem>>, vector<1280x64xbf16>
      %34 = vector.extract_strided_slice %32 {offsets = [0, 0], sizes = [6, 1280], strides = [1, 1]} : vector<6x3840xbf16> to vector<6x1280xbf16>
      %cst_29 = arith.constant dense<0.000000e+00> : vector<6x64xf32>
      %35 = tpu.matmul %34, %33, %cst_29 {dimension_numbers = #tpu.dot_dimension_numbers<[1], [0], [0], [1], [0, 0, 1, 1], [], []>} : vector<6x1280xbf16>, vector<1280x64xbf16>, vector<6x64xf32> -> vector<6x64xf32>
      %c0_30 = arith.constant 0 : index
      %c0_31 = arith.constant 0 : index
      %36 = vector.load %arg9[%c0_30, %c0_31] : memref<1x64xf32, #tpu.memory_space<vmem>>, vector<1x64xf32>
      %37 = vector.broadcast %36 : vector<1x64xf32> to vector<6x64xf32>
      %38 = arith.addf %35, %37 : vector<6x64xf32>
      %39 = vector.extract_strided_slice %32 {offsets = [0, 1280], sizes = [6, 1280], strides = [1, 1]} : vector<6x3840xbf16> to vector<6x1280xbf16>
      %cst_32 = arith.constant dense<0.000000e+00> : vector<6x64xf32>
      %40 = tpu.matmul %39, %33, %cst_32 {dimension_numbers = #tpu.dot_dimension_numbers<[1], [0], [0], [1], [0, 0, 1, 1], [], []>} : vector<6x1280xbf16>, vector<1280x64xbf16>, vector<6x64xf32> -> vector<6x64xf32>
      %c0_33 = arith.constant 0 : index
      %c0_34 = arith.constant 0 : index
      %41 = vector.load %arg9[%c0_33, %c0_34] : memref<1x64xf32, #tpu.memory_space<vmem>>, vector<1x64xf32>
      %42 = vector.broadcast %41 : vector<1x64xf32> to vector<6x64xf32>
      %43 = arith.addf %40, %42 : vector<6x64xf32>
      %44 = vector.extract_strided_slice %32 {offsets = [0, 2560], sizes = [6, 1280], strides = [1, 1]} : vector<6x3840xbf16> to vector<6x1280xbf16>
      %cst_35 = arith.constant dense<0.000000e+00> : vector<6x64xf32>
      %45 = tpu.matmul %44, %33, %cst_35 {dimension_numbers = #tpu.dot_dimension_numbers<[1], [0], [0], [1], [0, 0, 1, 1], [], []>} : vector<6x1280xbf16>, vector<1280x64xbf16>, vector<6x64xf32> -> vector<6x64xf32>
      %c0_36 = arith.constant 0 : index
      %c0_37 = arith.constant 0 : index
      %46 = vector.load %arg9[%c0_36, %c0_37] : memref<1x64xf32, #tpu.memory_space<vmem>>, vector<1x64xf32>
      %47 = vector.broadcast %46 : vector<1x64xf32> to vector<6x64xf32>
      %48 = arith.addf %45, %47 : vector<6x64xf32>
      %c0_38 = arith.constant 0 : index
      %c0_39 = arith.constant 0 : index
      %49 = vector.load %arg10[%c0_38, %c0_39] : memref<192x96xf32, #tpu.memory_space<vmem>>, vector<64x96xf32>
      %cst_40 = arith.constant dense<0.000000e+00> : vector<6x96xf32>
      %50 = tpu.matmul %38, %49, %cst_40 {dimension_numbers = #tpu.dot_dimension_numbers<[1], [0], [0], [1], [0, 0, 1, 1], [], []>} : vector<6x64xf32>, vector<64x96xf32>, vector<6x96xf32> -> vector<6x96xf32>
      %c64 = arith.constant 64 : index
      %c0_41 = arith.constant 0 : index
      %51 = vector.load %arg10[%c64, %c0_41] : memref<192x96xf32, #tpu.memory_space<vmem>>, vector<64x96xf32>
      %cst_42 = arith.constant dense<0.000000e+00> : vector<6x96xf32>
      %52 = tpu.matmul %43, %51, %cst_42 {dimension_numbers = #tpu.dot_dimension_numbers<[1], [0], [0], [1], [0, 0, 1, 1], [], []>} : vector<6x64xf32>, vector<64x96xf32>, vector<6x96xf32> -> vector<6x96xf32>
      %53 = arith.addf %50, %52 : vector<6x96xf32>
      %c128 = arith.constant 128 : index
      %c0_43 = arith.constant 0 : index
      %54 = vector.load %arg10[%c128, %c0_43] : memref<192x96xf32, #tpu.memory_space<vmem>>, vector<64x96xf32>
      %cst_44 = arith.constant dense<0.000000e+00> : vector<6x96xf32>
      %55 = tpu.matmul %48, %54, %cst_44 {dimension_numbers = #tpu.dot_dimension_numbers<[1], [0], [0], [1], [0, 0, 1, 1], [], []>} : vector<6x64xf32>, vector<64x96xf32>, vector<6x96xf32> -> vector<6x96xf32>
      %56 = arith.addf %53, %55 : vector<6x96xf32>
      %c0_45 = arith.constant 0 : index
      %c0_46 = arith.constant 0 : index
      %57 = vector.load %arg11[%c0_45, %c0_46] : memref<6x96xf32, #tpu.memory_space<vmem>>, vector<6x96xf32>
      %58 = arith.mulf %56, %57 : vector<6x96xf32>
      %c0_47 = arith.constant 0 : index
      %c0_48 = arith.constant 0 : index
      %59 = vector.load %arg12[%c0_47, %c0_48] : memref<2x6xf32, #tpu.memory_space<vmem>>, vector<2x6xf32>
      %cst_49 = arith.constant dense<0.000000e+00> : vector<2x96xf32>
      %60 = tpu.matmul %59, %58, %cst_49 {dimension_numbers = #tpu.dot_dimension_numbers<[1], [0], [0], [1], [0, 0, 1, 1], [], []>} : vector<2x6xf32>, vector<6x96xf32>, vector<2x96xf32> -> vector<2x96xf32>
      %c0_50 = arith.constant 0 : index
      %c0_51 = arith.constant 0 : index
      %61 = vector.load %arg13[%c0_50, %c0_51] : memref<96x32xf32, #tpu.memory_space<vmem>>, vector<96x32xf32>
      %cst_52 = arith.constant dense<0.000000e+00> : vector<2x32xf32>
      %62 = tpu.matmul %60, %61, %cst_52 {dimension_numbers = #tpu.dot_dimension_numbers<[1], [0], [0], [1], [0, 0, 1, 1], [], []>} : vector<2x96xf32>, vector<96x32xf32>, vector<2x32xf32> -> vector<2x32xf32>
      %c0_53 = arith.constant 0 : index
      %c0_54 = arith.constant 0 : index
      %63 = vector.load %arg14[%c0_53, %c0_54] : memref<1x32xf32, #tpu.memory_space<vmem>>, vector<1x32xf32>
      %64 = vector.broadcast %63 : vector<1x32xf32> to vector<2x32xf32>
      %65 = arith.addf %62, %64 : vector<2x32xf32>
      %cst_55 = arith.constant 0.000000e+00 : f32
      %66 = vector.broadcast %cst_55 : f32 to vector<2x32xf32>
      %67 = arith.maximumf %65, %66 : vector<2x32xf32>
      %c0_56 = arith.constant 0 : index
      %c0_57 = arith.constant 0 : index
      %68 = vector.load %arg15[%c0_56, %c0_57] : memref<32x32xf32, #tpu.memory_space<vmem>>, vector<32x32xf32>
      %cst_58 = arith.constant dense<0.000000e+00> : vector<2x32xf32>
      %69 = tpu.matmul %67, %68, %cst_58 {dimension_numbers = #tpu.dot_dimension_numbers<[1], [0], [0], [1], [0, 0, 1, 1], [], []>} : vector<2x32xf32>, vector<32x32xf32>, vector<2x32xf32> -> vector<2x32xf32>
      %c0_59 = arith.constant 0 : index
      %c0_60 = arith.constant 0 : index
      %70 = vector.load %arg16[%c0_59, %c0_60] : memref<1x32xf32, #tpu.memory_space<vmem>>, vector<1x32xf32>
      %71 = vector.broadcast %70 : vector<1x32xf32> to vector<2x32xf32>
      %72 = arith.addf %69, %71 : vector<2x32xf32>
      %cst_61 = arith.constant 0.000000e+00 : f32
      %73 = vector.broadcast %cst_61 : f32 to vector<2x32xf32>
      %74 = arith.maximumf %72, %73 : vector<2x32xf32>
      %c0_62 = arith.constant 0 : index
      %c0_63 = arith.constant 0 : index
      %75 = vector.load %arg17[%c0_62, %c0_63] : memref<32x32xf32, #tpu.memory_space<vmem>>, vector<32x32xf32>
      %cst_64 = arith.constant dense<0.000000e+00> : vector<2x32xf32>
      %76 = tpu.matmul %74, %75, %cst_64 {dimension_numbers = #tpu.dot_dimension_numbers<[1], [0], [0], [1], [0, 0, 1, 1], [], []>} : vector<2x32xf32>, vector<32x32xf32>, vector<2x32xf32> -> vector<2x32xf32>
      %c0_65 = arith.constant 0 : index
      %c0_66 = arith.constant 0 : index
      %77 = vector.load %arg18[%c0_65, %c0_66] : memref<1x32xf32, #tpu.memory_space<vmem>>, vector<1x32xf32>
      %78 = vector.broadcast %77 : vector<1x32xf32> to vector<2x32xf32>
      %79 = arith.addf %76, %78 : vector<2x32xf32>
      %cst_67 = arith.constant 0.000000e+00 : f32
      %80 = vector.broadcast %cst_67 : f32 to vector<2x32xf32>
      %81 = arith.maximumf %79, %80 : vector<2x32xf32>
      %c0_68 = arith.constant 0 : index
      %c0_69 = arith.constant 0 : index
      %82 = vector.load %arg19[%c0_68, %c0_69] : memref<32x9xf32, #tpu.memory_space<vmem>>, vector<32x9xf32>
      %cst_70 = arith.constant dense<0.000000e+00> : vector<2x9xf32>
      %83 = tpu.matmul %81, %82, %cst_70 {dimension_numbers = #tpu.dot_dimension_numbers<[1], [0], [0], [1], [0, 0, 1, 1], [], []>} : vector<2x32xf32>, vector<32x9xf32>, vector<2x9xf32> -> vector<2x9xf32>
      %c0_71 = arith.constant 0 : index
      %c0_72 = arith.constant 0 : index
      %84 = vector.load %arg20[%c0_71, %c0_72] : memref<1x9xf32, #tpu.memory_space<vmem>>, vector<1x9xf32>
      %85 = vector.broadcast %84 : vector<1x9xf32> to vector<2x9xf32>
      %86 = arith.addf %83, %85 : vector<2x9xf32>
      %c0_73 = arith.constant 0 : index
      %c0_74 = arith.constant 0 : index
      %87 = vector.load %arg21[%c0_73, %c0_74] : memref<2x9xf32, #tpu.memory_space<vmem>>, vector<2x9xf32>
      tpu.vector_store %arg21[%c0_73, %c0_74], %86 {strides = array<i32>} : memref<2x9xf32, #tpu.memory_space<vmem>>, vector<2x9xf32>,
    } else {
    }
    return
  }
  func.func @transform_0(%arg0: i32) -> (i32, i32, i32) {
    %c0_i32 = arith.constant 0 : i32
    %c0_i32_0 = arith.constant 0 : i32
    %c0_i32_1 = arith.constant 0 : i32
    return %arg0, %c0_i32, %c0_i32_0 : i32, i32, i32
  }
  func.func @transform_1(%arg0: i32) -> (i32, i32, i32) {
    %c0_i32 = arith.constant 0 : i32
    %c0_i32_0 = arith.constant 0 : i32
    %c0_i32_1 = arith.constant 0 : i32
    return %arg0, %c0_i32, %c0_i32_0 : i32, i32, i32
  }
  func.func @transform_2(%arg0: i32) -> (i32, i32) {
    %c0_i32 = arith.constant 0 : i32
    %c0_i32_0 = arith.constant 0 : i32
    %c0_i32_1 = arith.constant 0 : i32
    return %c0_i32, %c0_i32_0 : i32, i32
  }
  func.func @transform_3(%arg0: i32) -> (i32, i32) {
    %c0_i32 = arith.constant 0 : i32
    %c0_i32_0 = arith.constant 0 : i32
    %c0_i32_1 = arith.constant 0 : i32
    return %c0_i32, %c0_i32_0 : i32, i32
  }
  func.func @transform_4(%arg0: i32) -> (i32, i32) {
    %c0_i32 = arith.constant 0 : i32
    %c0_i32_0 = arith.constant 0 : i32
    %c0_i32_1 = arith.constant 0 : i32
    return %c0_i32, %c0_i32_0 : i32, i32
  }
  func.func @transform_5(%arg0: i32) -> (i32, i32) {
    %c0_i32 = arith.constant 0 : i32
    %c0_i32_0 = arith.constant 0 : i32
    %c0_i32_1 = arith.constant 0 : i32
    return %c0_i32, %c0_i32_0 : i32, i32
  }
  func.func @transform_6(%arg0: i32) -> (i32, i32) {
    %c0_i32 = arith.constant 0 : i32
    %c0_i32_0 = arith.constant 0 : i32
    %c0_i32_1 = arith.constant 0 : i32
    return %c0_i32, %c0_i32_0 : i32, i32
  }
  func.func @transform_7(%arg0: i32) -> (i32, i32) {
    %c0_i32 = arith.constant 0 : i32
    %c0_i32_0 = arith.constant 0 : i32
    %c0_i32_1 = arith.constant 0 : i32
    return %c0_i32, %c0_i32_0 : i32, i32
  }
  func.func @transform_8(%arg0: i32) -> (i32, i32) {
    %c0_i32 = arith.constant 0 : i32
    %c0_i32_0 = arith.constant 0 : i32
    %c0_i32_1 = arith.constant 0 : i32
    return %c0_i32, %c0_i32_0 : i32, i32
  }
  func.func @transform_9(%arg0: i32) -> (i32, i32) {
    %c0_i32 = arith.constant 0 : i32
    %c0_i32_0 = arith.constant 0 : i32
    %c0_i32_1 = arith.constant 0 : i32
    return %c0_i32, %c0_i32_0 : i32, i32
  }
  func.func @transform_10(%arg0: i32) -> (i32, i32) {
    %c0_i32 = arith.constant 0 : i32
    %c0_i32_0 = arith.constant 0 : i32
    %c0_i32_1 = arith.constant 0 : i32
    return %c0_i32, %c0_i32_0 : i32, i32
  }
  func.func @transform_11(%arg0: i32) -> (i32, i32) {
    %c0_i32 = arith.constant 0 : i32
    %c0_i32_0 = arith.constant 0 : i32
    %c0_i32_1 = arith.constant 0 : i32
    return %c0_i32, %c0_i32_0 : i32, i32
  }
  func.func @transform_12(%arg0: i32) -> (i32, i32) {
    %c0_i32 = arith.constant 0 : i32
    %c0_i32_0 = arith.constant 0 : i32
    %c0_i32_1 = arith.constant 0 : i32
    return %c0_i32, %c0_i32_0 : i32, i32
  }
  func.func @transform_13(%arg0: i32) -> (i32, i32) {
    %c0_i32 = arith.constant 0 : i32
    %c0_i32_0 = arith.constant 0 : i32
    %c0_i32_1 = arith.constant 0 : i32
    return %c0_i32, %c0_i32_0 : i32, i32
  }
  func.func @transform_14(%arg0: i32) -> (i32, i32) {
    %c0_i32 = arith.constant 0 : i32
    %c0_i32_0 = arith.constant 0 : i32
    %c0_i32_1 = arith.constant 0 : i32
    return %c0_i32, %c0_i32_0 : i32, i32
  }
  func.func @transform_15(%arg0: i32) -> (i32, i32) {
    %c0_i32 = arith.constant 0 : i32
    %c0_i32_0 = arith.constant 0 : i32
    %c0_i32_1 = arith.constant 0 : i32
    return %c0_i32, %c0_i32_0 : i32, i32
  }
  func.func @transform_16(%arg0: i32) -> (i32, i32) {
    %c0_i32 = arith.constant 0 : i32
    %c0_i32_0 = arith.constant 0 : i32
    %c0_i32_1 = arith.constant 0 : i32
    return %c0_i32, %c0_i32_0 : i32, i32
  }
  func.func @transform_17(%arg0: i32) -> (i32, i32) {
    %c0_i32 = arith.constant 0 : i32
    %c0_i32_0 = arith.constant 0 : i32
    %c0_i32_1 = arith.constant 0 : i32
    return %c0_i32, %c0_i32_0 : i32, i32
  }
  func.func @transform_18(%arg0: i32) -> (i32, i32) {
    %c0_i32 = arith.constant 0 : i32
    %c0_i32_0 = arith.constant 0 : i32
    %c0_i32_1 = arith.constant 0 : i32
    return %c0_i32, %c0_i32_0 : i32, i32
  }
  func.func @transform_19(%arg0: i32) -> (i32, i32) {
    %c0_i32 = arith.constant 0 : i32
    %c0_i32_0 = arith.constant 0 : i32
    %c0_i32_1 = arith.constant 0 : i32
    return %c0_i32, %c0_i32_0 : i32, i32
  }
  func.func @transform_20(%arg0: i32) -> (i32, i32) {
    %c0_i32 = arith.constant 0 : i32
    %c0_i32_0 = arith.constant 0 : i32
    %c0_i32_1 = arith.constant 0 : i32
    return %c0_i32, %c0_i32_0 : i32, i32
  }
}

</mosaic_0001>

<bundles_post_ra>
// kernel: _lambda_.1
= control target key start
LH: loop header
LB: loop body
LE: loop exit
PB: predicated region body
PF: predicated region fallthrough
CT: control target
= control target key end

     0   :  { %s8655_s0 = inlined_call_operand.hbm [shape: f32[3,576,288], index: 0, kind: input, shape index: {}]   ;;  %s8656_s1 = inlined_call_operand.hbm [shape: f32[3,18,576], index: 1, kind: input, shape index: {}]   ;;  %s8657_s2 = inlined_call_operand.hbm [shape: f32[288,9], index: 2, kind: input, shape index: {}]   ;;  %s8658_s3 = inlined_call_operand.hbm [shape: f32[18,9], index: 3, kind: input, shape index: {}]   ;;  %s8659_s4 = inlined_call_operand.hbm [shape: f32[6,18], index: 4, kind: input, shape index: {}]   ;;  %s8660_s5 = inlined_call_operand.hbm [shape: f32[9,3840], index: 5, kind: input, shape index: {}]   ;;  %s8661_s6 = inlined_call_operand.hbm [shape: f32[1,3840], index: 6, kind: input, shape index: {}]   ;;  %s8662_s7 = inlined_call_operand.hbm [shape: bf16[1280,64], index: 7, kind: input, shape index: {}]   ;;  %s8663_s8 = inlined_call_operand.hbm [shape: f32[1,64], index: 8, kind: input, shape index: {}]   ;;  %s8664_s9 = inlined_call_operand.hbm [shape: f32[192,96], index: 9, kind: input, shape index: {}]   ;;  %s8665_s10 = inlined_call_operand.hbm [shape: f32[6,96], index: 10, kind: input, shape index: {}]   ;;  %s8666_s11 = inlined_call_operand.hbm [shape: f32[2,6], index: 11, kind: input, shape index: {}]   ;;  %s8667_s12 = inlined_call_operand.hbm [shape: f32[96,32], index: 12, kind: input, shape index: {}]   ;;  %s8668_s13 = inlined_call_operand.hbm [shape: f32[1,32], index: 13, kind: input, shape index: {}]   ;;  %s8669_s14 = inlined_call_operand.hbm [shape: f32[32,32], index: 14, kind: input, shape index: {}]   ;;  %s8670_s15 = inlined_call_operand.hbm [shape: f32[1,32], index: 15, kind: input, shape index: {}]   ;;  %s8671_s16 = inlined_call_operand.hbm [shape: f32[32,32], index: 16, kind: input, shape index: {}]   ;;  %s8672_s17 = inlined_call_operand.hbm [shape: f32[1,32], index: 17, kind: input, shape index: {}]   ;;  %s8673_s18 = inlined_call_operand.hbm [shape: f32[32,9], index: 18, kind: input, shape index: {}]   ;;  %s8674_s19 = inlined_call_operand.hbm [shape: f32[1,9], index: 19, kind: input, shape index: {}]   ;;  %s8675_s20 = inlined_call_operand.hbm [shape: f32[2,9], index: 20, kind: output, shape index: {}]  }
   0x1   :  { %8707 = sst [smem:[#allocation67_spill]] %s8655_s0 }
   0x2   :  { %8708 = sst [smem:[#allocation68_spill]] %s8656_s1 }
   0x3   :  { %8709 = sst [smem:[#allocation69_spill]] %s8657_s2 }
   0x4   :  { %8710 = sst [smem:[#allocation70_spill]] %s8658_s3 }
   0x5   :  { %8711 = sst [smem:[#allocation71_spill]] %s8659_s4 }
   0x6   :  { %8712 = sst [smem:[#allocation72_spill]] %s8660_s5 }
   0x7   :  { %8713 = sst [smem:[#allocation73_spill]] %s8661_s6 }
   0x8   :  { %8714 = sst [smem:[#allocation74_spill]] %s8662_s7 }
   0x9   :  { %8715 = sst [smem:[#allocation75_spill]] %s8663_s8 }
   0xa   :  { %8716 = sst [smem:[#allocation76_spill]] %s8664_s9 }
   0xb   :  { %8717 = sst [smem:[#allocation77_spill]] %s8665_s10 }
   0xc   :  { %8718 = sst [smem:[#allocation78_spill]] %s8666_s11 }
   0xd   :  { %8719 = sst [smem:[#allocation79_spill]] %s8674_s19 }
   0xe   :  { %8720 = sst [smem:[#allocation80_spill]] %s8675_s20 }
   0xf   :  { %25 = vsyncpa [#allocation4], 0 }
  0x10   :  { %27 = vsyncpa [#allocation4 + $0x1], 0 }
  0x11   :  { %28 = vsyncpa [#allocation7], 0 }
  0x12   :  { %30 = vsyncpa [#allocation7 + $0x1], 0 }
  0x13   :  { %31 = vsyncpa [#allocation10], 0 }
  0x14   :  { %32 = vsyncpa [#allocation13], 0 }
  0x15   :  { %33 = vsyncpa [#allocation16], 0 }
  0x16   :  { %34 = vsyncpa [#allocation19], 0 }
  0x17   :  { %35 = vsyncpa [#allocation22], 0 }
  0x18   :  { %36 = vsyncpa [#allocation25], 0 }
  0x19   :  { %37 = vsyncpa [#allocation28], 0 }
  0x1a   :  { %38 = vsyncpa [#allocation31], 0 }
  0x1b   :  { %39 = vsyncpa [#allocation34], 0 }
  0x1c   :  { %40 = vsyncpa [#allocation5], 0  ;;  %s6760_s1 = smov 0   ;;  %s6762_s22 = smov 0  }
  0x1d   :  { %s6764_s23 = smov 0   ;;  %s6766_s24 = smov 0  }
  0x1e LB: > { %8721 = sst [smem:[#allocation49_spill]] %s6611_s1  ;;  %s6784_s27 = sadd.s32 4294967295, %s6623_s24   ;;  %s6623_s24 = sphi %s6766_s24, %s8859_s24   ;;  %s6619_s23 = sphi %s6764_s23, %s8858_s23   ;;  %s6615_s22 = sphi %s6762_s22, %s8857_s22   ;;  %s6611_s1 = sphi %s6760_s1, %s8856_s1  }
  0x1f   : > { %8722 = sst [smem:[#allocation50_spill]] %s6615_s22  ;;  %p4899_p0 = scmp.ge.s32.totalorder %s6623_s24, 1 }
  0x20   : > { %8723 = sst [smem:[#allocation51_spill]] %s6619_s23  ;;  %p67_p1 = scmp.eq.s32.totalorder %s6784_s27, 0 }
  0x21   : > { %s8724_s3 = sld [smem:[#allocation69_spill]]  ;;  %p502_p2 = scmp.lt.s32.totalorder %s6623_s24, 4 }
  0x22   : > { %8725 = sst [smem:[#allocation52_spill]] %s6784_s27  ;;  %p4900_p3 = scmp.ne.s32.totalorder %s6784_s27, 0 }
  0x23   : > { %p6790_p4 = pnand %p4899_p0, %p502_p2  ;;  %s6625_s4 = smov [#allocation8]  }
  0x24   : > { %s515_s29 = sshll.u32 %s6625_s4, 4  ;;  %s8728_s21 = sld [smem:[#allocation70_spill]]  ;;  %s516_s29 = int_to_ptr.vmem [resolvable:$true] %s515_s29 }
  0x25   : > { %s8726_s28 = scalar_select %p6790_p4, 1, 0 }
  0x26   : > { %p5545_p5 = pneg %p6790_p4  ;;  %s8730_s5 = sld [smem:[#allocation72_spill]] }
  0x27   : > { %s513_s26 = sshll.u32 %s8724_s3, 4  ;;  %8727 = sst [smem:[#allocation53_spill]] %s8726_s28  ;;  %s514_s26 = int_to_ptr.hbm [resolvable:$true] %s513_s26 }
  0x28   : > { %p6801_p6 = pnand %p5545_p5, %p67_p1  ;;  %s6626_s1 = smov [#allocation9]  }
  0x29   : > { %s529_s28 = sshll.u32 %s6626_s1, 4  ;;  %s8683_s19 = smov 128   ;;  %s530_s28 = int_to_ptr.vmem [resolvable:$true] %s529_s28 }
  0x2a   : > { %s527_s2 = sshll.u32 %s8728_s21, 4  ;;  %s6628_s22 = smov 8   ;;  %s528_s2 = int_to_ptr.hbm [resolvable:$true] %s527_s2 }
  0x2b   : > { %5548 = dma.hbm_to_vmem [thread:$0]  (!%p6801_p6), %s514_s26, 4608, %s516_s29, [#allocation7], %s8683_s19, %s8683_s19, %s6628_s22  }
  0x2c   : > { %s553_s4 = sshll.u32 %s8730_s5, 4  ;;  %s6629_s20 = smov [#allocation12]   ;;  %s554_s4 = int_to_ptr.hbm [resolvable:$true] %s553_s4 }
  0x2d   : > { %5551 = dma.hbm_to_vmem [thread:$0]  (!%p6801_p6), %s528_s2, 384, %s530_s28, [#allocation10], %s8683_s19, %s8683_s19, %s6628_s22  }
  0x2e   : > { %s555_s30 = sshll.u32 %s6629_s20, 4  ;;  %s8731_s7 = sld [smem:[#allocation74_spill]]  ;;  %s556_s30 = int_to_ptr.vmem [resolvable:$true] %s555_s30 }
  0x2f   : > { %s6630_s3 = smov 3840   ;;  %s6631_s5 = smov 240  }
  0x30   : > { %5557 = dma.hbm_to_vmem [thread:$0]  (!%p6801_p6), %s554_s4, 7680, %s556_s30, [#allocation13], %s6630_s3, %s6630_s3, %s6631_s5  }
  0x31   : > { %s6632_s26 = smov [#allocation15]   ;;  %s6633_s27 = smov 64  }
  0x32   : > { %s581_s29 = sshll.u32 %s6632_s26, 4  ;;  %s6634_s23 = smov 4   ;;  %s582_s29 = int_to_ptr.vmem [resolvable:$true] %s581_s29 }
  0x33   : > { %s8732_s9 = sld [smem:[#allocation76_spill]]  ;;  %s6635_s0 = smov [#allocation18]  }
  0x34   : > { %s579_s21 = sshll.u32 %s8731_s7, 4  ;;  %s607_s1 = sshll.u32 %s6635_s0, 4  ;;  %s580_s21 = int_to_ptr.hbm [resolvable:$true] %s579_s21  ;;  %s608_s1 = int_to_ptr.vmem [resolvable:$true] %s607_s1 }
  0x35   : > { %5563 = dma.hbm_to_vmem [thread:$0]  (!%p6801_p6), %s580_s21, 10240, %s582_s29, [#allocation16], %s6633_s27, %s6633_s27, %s6634_s23  }
  0x36   : > { %s8733_s11 = sld [smem:[#allocation78_spill]]  ;;  %s8734_s30 = smov 128  }
  0x37   : > { %s6636_s23 = smov [#allocation21]   ;;  %s658_s26 = sshll.u32 %s8668_s13, 4  ;;  %s659_s26 = int_to_ptr.hbm [resolvable:$true] %s658_s26 }
  0x38   : > { %s634_s27 = sshll.u32 %s6636_s23, 4  ;;  %s684_s28 = sshll.u32 %s8670_s15, 4  ;;  %s635_s27 = int_to_ptr.vmem [resolvable:$true] %s634_s27  ;;  %s685_s28 = int_to_ptr.hbm [resolvable:$true] %s684_s28 }
  0x39   : > { %s605_s20 = sshll.u32 %s8732_s9, 4  ;;  %s6637_s2 = smov [#allocation24]   ;;  %s606_s20 = int_to_ptr.hbm [resolvable:$true] %s605_s20 }
  0x3a   : > { %5569 = dma.hbm_to_vmem [thread:$0]  (!%p6801_p6), %s606_s20, 3072, %s608_s1, [#allocation19], %s8734_s30, %s8734_s30, %s6628_s22  }
  0x3b   : > { %s660_s0 = sshll.u32 %s6637_s2, 4  ;;  %s6638_s20 = smov [#allocation27]   ;;  %s661_s0 = int_to_ptr.vmem [resolvable:$true] %s660_s0 }
  0x3c   : > { %s632_s4 = sshll.u32 %s8733_s11, 4  ;;  %s686_s1 = sshll.u32 %s6638_s20, 4  ;;  %s633_s4 = int_to_ptr.hbm [resolvable:$true] %s632_s4  ;;  %s687_s1 = int_to_ptr.vmem [resolvable:$true] %s686_s1 }
  0x3d   : > { %5575 = dma.hbm_to_vmem [thread:$0]  (!%p6801_p6), %s633_s4, 32, %s635_s27, [#allocation22]  }
  0x3e   : > { %5581 = dma.hbm_to_vmem [thread:$0]  (!%p6801_p6), %s659_s26, 16, %s661_s0, [#allocation25]  }
  0x3f   : > { %s710_s21 = sshll.u32 %s8672_s17, 4  ;;  %s8735_s3 = sld [smem:[#allocation71_spill]]  ;;  %s711_s21 = int_to_ptr.hbm [resolvable:$true] %s710_s21 }
  0x40   : > { %5587 = dma.hbm_to_vmem [thread:$0]  (!%p6801_p6), %s685_s28, 16, %s687_s1, [#allocation28]  }
  0x41   : > { %s6639_s19 = smov [#allocation30]   ;;  %s6640_s26 = smov [#allocation11]  }
  0x42   : > { %s712_s2 = sshll.u32 %s6639_s19, 4  ;;  %s544_s0 = sshll.u32 %s6640_s26, 4  ;;  %s713_s2 = int_to_ptr.vmem [resolvable:$true] %s712_s2  ;;  %s545_s0 = int_to_ptr.vmem [resolvable:$true] %s544_s0 }
  0x43   : > { %5593 = dma.hbm_to_vmem [thread:$0]  (!%p6801_p6), %s711_s21, 16, %s713_s2, [#allocation31]  }
  0x44   : > { %s8736_s6 = sld [smem:[#allocation73_spill]]  ;;  %s6641_s27 = smov [#allocation14]  }
  0x45   : > { %s542_s29 = sshll.u32 %s8735_s3, 4  ;;  %s8737_s8 = sld [smem:[#allocation75_spill]]  ;;  %s543_s29 = int_to_ptr.hbm [resolvable:$true] %s542_s29 }
  0x46   : > { %5554 = dma.hbm_to_vmem [thread:$0]  (!%p6801_p6), %s543_s29, 128, %s545_s0, [#allocation10]  }
  0x47   : > { %s570_s3 = sshll.u32 %s6641_s27, 4  ;;  %s6642_s21 = smov [#allocation17]   ;;  %s571_s3 = int_to_ptr.vmem [resolvable:$true] %s570_s3 }
  0x48   : > { %s596_s19 = sshll.u32 %s6642_s21, 4  ;;  %s8738_s10 = sld [smem:[#allocation77_spill]]  ;;  %s597_s19 = int_to_ptr.vmem [resolvable:$true] %s596_s19 }
  0x49   : > { %s643_s5 = sshll.u32 %s8667_s12, 4  ;;  %s6643_s28 = smov [#allocation20]   ;;  %s644_s5 = int_to_ptr.hbm [resolvable:$true] %s643_s5 }
  0x4a   : > { %s568_s23 = sshll.u32 %s8736_s6, 4  ;;  %s622_s1 = sshll.u32 %s6643_s28, 4  ;;  %s569_s23 = int_to_ptr.hbm [resolvable:$true] %s568_s23  ;;  %s623_s1 = int_to_ptr.vmem [resolvable:$true] %s622_s1 }
  0x4b   : > { %s594_s4 = sshll.u32 %s8737_s8, 4  ;;  %s669_s2 = sshll.u32 %s8669_s14, 4  ;;  %s595_s4 = int_to_ptr.hbm [resolvable:$true] %s594_s4  ;;  %s670_s2 = int_to_ptr.hbm [resolvable:$true] %s669_s2 }
  0x4c   : > { %5560 = dma.hbm_to_vmem [thread:$0]  (!%p6801_p6), %s569_s23, 480, %s571_s3, [#allocation13]  }
  0x4d   : > { %5566 = dma.hbm_to_vmem [thread:$0]  (!%p6801_p6), %s595_s4, 16, %s597_s19, [#allocation16]  }
  0x4e   : > { %s620_s20 = sshll.u32 %s8738_s10, 4  ;;  %s6644_s23 = smov [#allocation23]   ;;  %s621_s20 = int_to_ptr.hbm [resolvable:$true] %s620_s20 }
  0x4f   : > { %5572 = dma.hbm_to_vmem [thread:$0]  (!%p6801_p6), %s621_s20, 128, %s623_s1, [#allocation19]  }
  0x50   : > { %s645_s27 = sshll.u32 %s6644_s23, 4  ;;  %s695_s26 = sshll.u32 %s8671_s16, 4  ;;  %s646_s27 = int_to_ptr.vmem [resolvable:$true] %s645_s27  ;;  %s696_s26 = int_to_ptr.hbm [resolvable:$true] %s695_s26 }
  0x51   : > { %5578 = dma.hbm_to_vmem [thread:$0]  (!%p6801_p6), %s644_s5, 1536, %s646_s27, [#allocation22], %s8734_s30, %s8734_s30, %s6628_s22  }
  0x52   : > { %s6645_s29 = smov [#allocation26]   ;;  %s6646_s0 = smov [#allocation29]  }
  0x53   : > { %s671_s20 = sshll.u32 %s6645_s29, 4  ;;  %s697_s28 = sshll.u32 %s6646_s0, 4  ;;  %s672_s20 = int_to_ptr.vmem [resolvable:$true] %s671_s20  ;;  %s698_s28 = int_to_ptr.vmem [resolvable:$true] %s697_s28 }
  0x54   : > { %5584 = dma.hbm_to_vmem [thread:$0]  (!%p6801_p6), %s670_s2, 512, %s672_s20, [#allocation25], %s8734_s30, %s8734_s30, %s6628_s22  }
  0x55   : > { %s8739_s23 = sld [smem:[#allocation51_spill]]  ;;  %s721_s27 = sshll.u32 %s8673_s18, 4  ;;  %s722_s27 = int_to_ptr.hbm [resolvable:$true] %s721_s27 }
  0x56   : > { %s8740_s3 = sld [smem:[#allocation50_spill]]  ;;  %s6647_s20 = smov [#allocation32]  }
  0x57   : > { %5590 = dma.hbm_to_vmem [thread:$0]  (!%p6801_p6), %s696_s26, 512, %s698_s28, [#allocation28], %s8734_s30, %s8734_s30, %s6628_s22  }
  0x58   : > { %s8741_s4 = sld [smem:[#allocation79_spill]]  ;;  %s723_s0 = sshll.u32 %s6647_s20, 4  ;;  %s724_s0 = int_to_ptr.vmem [resolvable:$true] %s723_s0 }
  0x59   : > { %s8742_s29 = sld [smem:[#allocation49_spill]]  ;;  %s6648_s26 = smov [#allocation33]  }
  0x5a   : > { %5596 = dma.hbm_to_vmem [thread:$0]  (!%p6801_p6), %s722_s27, 512, %s724_s0, [#allocation31], %s8734_s30, %s8734_s30, %s6628_s22  }
  0x5b   : > { %s738_s28 = sshll.u32 %s6648_s26, 4  ;;  %s6911_s5 = sadd.s32 1, %s6623_s24   ;;  %s739_s28 = int_to_ptr.vmem [resolvable:$true] %s738_s28 }
  0x5c   : > { %s53_s21 = sadd.s32 1, %s8739_s23  ;;  %s50_s2 = ssub.s32 %s6623_s24, %s6911_s5 }
  0x5d   : > { %p60_p7 = scmp.ne.s32.totalorder %s8739_s23, %s8740_s3  ;;  %p51_p8 = scmp.eq.s32.totalorder %s50_s2, 0 }
  0x5e   : > { %s736_s19 = sshll.u32 %s8741_s4, 4  ;;  %p61_p9 = scmp.eq.s32.totalorder %s6623_s24, 0  ;;  %s737_s19 = int_to_ptr.hbm [resolvable:$true] %s736_s19 }
  0x5f   : > { %5599 = dma.hbm_to_vmem [thread:$0]  (!%p6801_p6), %s737_s19, 16, %s739_s28, [#allocation34]  }
  0x60   : > { %p66_p10 = scmp.ne.s32.totalorder %s8740_s3, %s8742_s29  ;;  %p5625_p11 = scmp.lt.s32.totalorder %s6623_s24, 3 }
  0x61   : > { %s6923_s4 = scalar_select %p51_p8, %s8739_s23, %s53_s21  }
  0x62   : > { %p62_p12 = por %p61_p9, %p60_p7  ;;  %p6927_p13 = por %p67_p1, %p66_p10 }
  0x63   : > { %s6932_s25 = sand.u32 1, %s8739_s23   ;;  %s5460_s30 = smul.u32 1728, %s6623_s24 }
  0x64   : > { %s5459_s27 = smul.u32 1728, %s6932_s25  ;;  %s8745_s0 = sld [smem:[#allocation67_spill]] }
  0x65   : > { %p6939_p0 = pnand %p5625_p11, %p62_p12  ;;  %s750_s23 = scalar_lea.sflag [#allocation4], %s6932_s25 }
  0x66   : > { %s753_s1 = scalar_lea.vmem [#allocation3], %s5459_s27 }
  0x67   : > { %s761_s28 = sshll.u32 %s753_s1, 4  ;;  %p6457_p5 = pneg %p6939_p0  ;;  %s762_s28 = int_to_ptr.vmem [resolvable:$true] %s761_s28 }
  0x6a   : > { %s758_s26 = scalar_lea.hbm %s8745_s0, %s5460_s30  ;;  %s6460_s20 = scalar_lea.hbm %s8745_s0, 5184 }
  0x6b   : > { %s759_s29 = sshll.u32 %s758_s26, 4  ;;  %s760_s29 = int_to_ptr.hbm [resolvable:$true] %s759_s29 }
  0x6c   : > { %s6453_s21 = sshra.s32 %s760_s29, 4  ;;  %s6454_s21 = int_to_ptr.hbm [resolvable:$true] %s6453_s21 }
  0x6d   : > { %s6455_s2 = scalar_lea.hbm %s6454_s21, 1728  ;;  %p6461_p8 = scmp.lt.s32.totalorder %s6454_s21, %s8745_s0 }
  0x6e   : > { %p6456_p2 = scmp.ne.s32.totalorder %s6454_s21, %s6455_s2  ;;  %p6462_p9 = scmp.lt.s32.totalorder %s6460_s20, %s6455_s2 }
  0x70   : > { %p6458_p6 = pnand %p6457_p5, %p6456_p2  ;;  %p6463_p10 = por %p6462_p9, %p6461_p8 }
  0x72   : > { %p6459_p7 = pneg %p6458_p6 }
  0x74   : > { %p6464_p11 = pnand %p6463_p10, %p6459_p7 }
  0x76   : > { %6467 = shalt.err (!%p6464_p11)
}
  0x77   : > { %s6649_s27 = smov 384   ;;  %s6650_s1 = smov 24  }
  0x78   : > { %5603 = dma.hbm_to_vmem [thread:$0]  (!%p6939_p0), %s760_s29, 27648, %s762_s28, %s750_s23, %s6649_s27, %s6649_s27, %s6650_s1  }
  0x79   : > { %s771_s7 = sand.u32 1, %s6623_s24   ;;  %s5461_s30 = smul.u32 120, %s6932_s25 }
  0x7a   : > { %s5462_s19 = smul.u32 120, %s6623_s24  ;;  %s8747_s6 = sld [smem:[#allocation68_spill]] }
  0x7b   : > { %s775_s2 = scalar_lea.vmem [#allocation6], %s5461_s30  ;;  %s772_s0 = scalar_lea.sflag [#allocation7], %s771_s7 }
  0x7c   : > { %s783_s20 = sshll.u32 %s775_s2, 4  ;;  %s784_s20 = int_to_ptr.vmem [resolvable:$true] %s783_s20 }
  0x80   : > { %s780_s21 = scalar_lea.hbm %s8747_s6, %s5462_s19  ;;  %s6490_s29 = scalar_lea.hbm %s8747_s6, 360 }
  0x81   : > { %s781_s26 = sshll.u32 %s780_s21, 4  ;;  %s782_s26 = int_to_ptr.hbm [resolvable:$true] %s781_s26 }
  0x82   : > { %s6483_s10 = sshra.s32 %s782_s26, 4  ;;  %s6484_s10 = int_to_ptr.hbm [resolvable:$true] %s6483_s10 }
  0x83   : > { %s6485_s11 = scalar_lea.hbm %s6484_s10, 120  ;;  %p6491_p7 = scmp.lt.s32.totalorder %s6484_s10, %s8747_s6 }
  0x84   : > { %p6486_p12 = scmp.ne.s32.totalorder %s6484_s10, %s6485_s11  ;;  %p6492_p8 = scmp.lt.s32.totalorder %s6490_s29, %s6485_s11 }
  0x86   : > { %p6488_p2 = pnand %p6486_p12, %p6457_p5  ;;  %p6493_p9 = por %p6492_p8, %p6491_p7 }
  0x88   : > { %p6489_p6 = pneg %p6488_p2 }
  0x8a   : > { %p6494_p10 = pnand %p6493_p9, %p6489_p6 }
  0x8c   : > { %6497 = shalt.err (!%p6494_p10)
}
  0x8d   : > { %s6651_s7 = smov 640   ;;  %s6652_s28 = smov 40  }
  0x8e   : > { %5606 = dma.hbm_to_vmem [thread:$0]  (!%p6939_p0), %s782_s26, 1920, %s784_s20, %s772_s0, %s6651_s7, %s6651_s7, %s6652_s28  }
  0x8f   : > { %795 = sbr.rel (%p6790_p4) target bundleno = 2129 (0x851), region = 100  ;;  %s8749_s27 = sld [smem:[#allocation50_spill]] (!%p6790_p4) }
  0x95   : > { %s797_s1 = sand.u32 1, %s8749_s27  }
  0x96   : > { %s5463_s30 = smul.u32 1728, %s797_s1  ;;  %s798_s19 = scalar_lea.sflag [#allocation4], %s797_s1 }
  0x98   : > { %s6977_s21 = scalar_lea.vmem [#allocation3], %s5463_s30 }
  0x99   : > { %6558 = dma.done.wait (%p6927_p13), %s798_s19, 27648  }
  0x9a   : > { %6560 = vsyncadd (%p6927_p13), %s798_s19, 4294939648  ;;  %s8750_s10 = sld [smem:[#allocation52_spill]]  ;;  %s5464_s3 = smul.u32 120, %s797_s1 }
  0x9c   : > { %s6984_s2 = scalar_lea.vmem [#allocation6], %s5464_s3 }
  0xa0   : > { %s807_s11 = sand.u32 1, %s8750_s10  }
  0xa1   : > { %s808_s0 = scalar_lea.sflag [#allocation7], %s807_s11 }
  0xa2   : > { %6562 = dma.done.wait (%p6927_p13), %s808_s0, 1920  }
  0xa3   : > { %6564 = vsyncadd (%p6927_p13), %s808_s0, 4294965376 }
  0xa4   : > { %6566 = dma.done.wait (%p67_p1), [#allocation7], 4608  }
  0xa5   : > { %6568 = vsyncadd (%p67_p1), [#allocation7], 4294962688 }
  0xa6   : > { %6570 = dma.done.wait (%p67_p1), [#allocation10], 512  }
  0xa7   : > { %6572 = vsyncadd (%p67_p1), [#allocation10], 4294966784 }
  0xa8   : > { %6574 = dma.done.wait (%p67_p1), [#allocation13], 8160  }
  0xa9   : > { %6576 = vsyncadd (%p67_p1), [#allocation13], 4294959136 }
  0xaa   : > { %6578 = dma.done.wait (%p67_p1), [#allocation16], 10256  }
  0xab   : > { %6580 = vsyncadd (%p67_p1), [#allocation16], 4294957040 }
  0xac   : > { %6582 = dma.done.wait (%p67_p1), [#allocation19], 3200  }
  0xad   : > { %6584 = vsyncadd (%p67_p1), [#allocation19], 4294964096 }
  0xae   : > { %6586 = dma.done.wait (%p67_p1), [#allocation22], 1568  }
  0xaf   : > { %6588 = vsyncadd (%p67_p1), [#allocation22], 4294965728 }
  0xb0   : > { %6590 = dma.done.wait (%p67_p1), [#allocation25], 528  }
  0xb1   : > { %6592 = vsyncadd (%p67_p1), [#allocation25], 4294966768 }
  0xb2   : > { %6594 = dma.done.wait (%p67_p1), [#allocation28], 528  }
  0xb3   : > { %6596 = vsyncadd (%p67_p1), [#allocation28], 4294966768 }
  0xb4   : > { %6598 = dma.done.wait (%p67_p1), [#allocation31], 528  }
  0xb5   : > { %6600 = vsyncadd (%p67_p1), [#allocation31], 4294966768 }
  0xb6   : > { %6602 = dma.done.wait (%p67_p1), [#allocation34], 16  }
  0xb7   : > { %6604 = vsyncadd (%p67_p1), [#allocation34], 4294967280  ;;  %962 = sbr.rel (%p4900_p3) target bundleno = 198 (0xc6), region = 184 }
  0xbc   : > { %v6653_v0 = vmov 0.0   ;;  %vm965_vm0 = vcmask 261120   ;;  %vm972_vm1 = vcmask 254976  }
  0xbd   : > { %963 = vst [vmem:[#allocation2] sm:$0xff] %v6653_v0 }
  0xbe   : > { %964 = vst [vmem:[#allocation2 + $0x8] sm:$0xff] %v6653_v0 }
  0xbf   : > { %967 = vst [vmem:[#allocation2 + $0x18] sm:$0xff] %v6653_v0 }
  0xc0   : > { %968 = vst [vmem:[#allocation2 + $0x20] sm:$0xff] %v6653_v0 }
  0xc1   : > { %970 = vst [vmem:[#allocation2 + $0x30] sm:$0x3] %v6653_v0 }
  0xc2   : > { %971 = vst [vmem:[#allocation2 + $0x38] sm:$0x3] %v6653_v0 }
  0xc3   : > { %966 = vst.msk [vmem:[#allocation2 + $0x10] sm:$0xff] %vm965_vm0, %v6653_v0 }
  0xc4   : > { %969 = vst.msk [vmem:[#allocation2 + $0x28] sm:$0xff] %vm965_vm0, %v6653_v0 }
  0xc5   : > { %973 = vst.msk [vmem:[#allocation2 + $0x40] sm:$0x3] %vm972_vm1, %v6653_v0 }
  0xc6 PF: > { %v1043_v1 = vld [vmem:[%s6977_s21 + $0x168] sm:$0xff]  ;;  %v1040_v5 = vld [vmem:[%s6977_s21 + $0x150] sm:$0xff]  ;;  %v1037_v9 = vld [vmem:[%s6977_s21 + $0x138] sm:$0xff]  ;;  %vm1214_vm2 = vcmask 523264   ;;  %vm1625_vm3 = vcmask 261120   ;;  %vm1632_vm4 = vcmask 254976  }
  0xc7   : > { %v1091_v2 = vld [vmem:[%s6977_s21 + $0x2e8] sm:$0xff]  ;;  %1224 = vmatpush.msra.mxu0 %v1043_v1  ;;  %v1088_v6 = vld [vmem:[%s6977_s21 + $0x2d0] sm:$0xff]  ;;  %v1085_v10 = vld [vmem:[%s6977_s21 + $0x2b8] sm:$0xff]  ;;  %s8751_s22 = sld [smem:[#allocation52_spill]] }
  0xc8   : > { %v1139_v3 = vld [vmem:[%s6977_s21 + $0x468] sm:$0xff]  ;;  %1250 = vmatpush.msra.mxu1 %v1091_v2  ;;  %v1136_v7 = vld [vmem:[%s6977_s21 + $0x450] sm:$0xff]  ;;  %v1133_v11 = vld [vmem:[%s6977_s21 + $0x438] sm:$0xff] }
  0xc9   : > { %v1187_v4 = vld [vmem:[%s6977_s21 + $0x5e8] sm:$0xff]  ;;  %1276 = vmatpush.msra.mxu2 %v1139_v3  ;;  %v1184_v8 = vld [vmem:[%s6977_s21 + $0x5d0] sm:$0xff]  ;;  %1225 = vmatpush.msra.mxu0 %v1040_v5  ;;  %v1181_v12 = vld [vmem:[%s6977_s21 + $0x5b8] sm:$0xff] }
  0xca   : > { %1302 = vmatpush.msra.mxu3 %v1187_v4  ;;  %1251 = vmatpush.msra.mxu1 %v1088_v6  ;;  %v1034_v13 = vld [vmem:[%s6977_s21 + $0x120] sm:$0xff]  ;;  %v1031_v17 = vld [vmem:[%s6977_s21 + $0x108] sm:$0xff]  ;;  %v1028_v21 = vld [vmem:[%s6977_s21 + $0xf0] sm:$0xff] }
  0xcb   : > { %1277 = vmatpush.msra.mxu2 %v1136_v7  ;;  %v1082_v14 = vld [vmem:[%s6977_s21 + $0x2a0] sm:$0xff]  ;;  %1226 = vmatpush.msra.mxu0 %v1037_v9  ;;  %v1079_v18 = vld [vmem:[%s6977_s21 + $0x288] sm:$0xff]  ;;  %v1076_v22 = vld [vmem:[%s6977_s21 + $0x270] sm:$0xff] }
  0xcc   : > { %1303 = vmatpush.msra.mxu3 %v1184_v8  ;;  %1252 = vmatpush.msra.mxu1 %v1085_v10  ;;  %v1130_v15 = vld [vmem:[%s6977_s21 + $0x420] sm:$0xff]  ;;  %v1127_v19 = vld [vmem:[%s6977_s21 + $0x408] sm:$0xff]  ;;  %v1124_v23 = vld [vmem:[%s6977_s21 + $0x3f0] sm:$0xff] }
  0xcd   : > { %v1178_v16 = vld [vmem:[%s6977_s21 + $0x5a0] sm:$0xff]  ;;  %1278 = vmatpush.msra.mxu2 %v1133_v11  ;;  %1227 = vmatpush.msra.mxu0 %v1034_v13  ;;  %v1175_v20 = vld [vmem:[%s6977_s21 + $0x588] sm:$0xff]  ;;  %v1172_v24 = vld [vmem:[%s6977_s21 + $0x570] sm:$0xff]  ;;  %p4950_p1 = scmp.ne.s32.totalorder %s8751_s22, 2 }
  0xce   : > { %1304 = vmatpush.msra.mxu3 %v1181_v12  ;;  %1253 = vmatpush.msra.mxu1 %v1082_v14  ;;  %v1025_v25 = vld [vmem:[%s6977_s21 + $0xd8] sm:$0xff]  ;;  %v1022_v29 = vld [vmem:[%s6977_s21 + $0xc0] sm:$0xff]  ;;  %v1019_v33 = vld [vmem:[%s6977_s21 + $0xa8] sm:$0xff] }
  0xcf   : > { %1279 = vmatpush.msra.mxu2 %v1130_v15  ;;  %1228 = vmatpush.msra.mxu0 %v1031_v17  ;;  %v1073_v26 = vld [vmem:[%s6977_s21 + $0x258] sm:$0xff]  ;;  %v1070_v30 = vld [vmem:[%s6977_s21 + $0x240] sm:$0xff]  ;;  %v1067_v34 = vld [vmem:[%s6977_s21 + $0x228] sm:$0xff] }
  0xd0   : > { %1305 = vmatpush.msra.mxu3 %v1178_v16  ;;  %1254 = vmatpush.msra.mxu1 %v1079_v18  ;;  %v1121_v27 = vld [vmem:[%s6977_s21 + $0x3d8] sm:$0xff]  ;;  %v1118_v31 = vld [vmem:[%s6977_s21 + $0x3c0] sm:$0xff]  ;;  %v1115_v35 = vld [vmem:[%s6977_s21 + $0x3a8] sm:$0xff] }
  0xd1   : > { %1280 = vmatpush.msra.mxu2 %v1127_v19  ;;  %1229 = vmatpush.msra.mxu0 %v1028_v21  ;;  %v1169_v28 = vld [vmem:[%s6977_s21 + $0x558] sm:$0xff]  ;;  %v1166_v32 = vld [vmem:[%s6977_s21 + $0x540] sm:$0xff]  ;;  %v1163_v36 = vld [vmem:[%s6977_s21 + $0x528] sm:$0xff] }
  0xd2   : > { %1306 = vmatpush.msra.mxu3 %v1175_v20  ;;  %1255 = vmatpush.msra.mxu1 %v1076_v22  ;;  %v1016_v37 = vld [vmem:[%s6977_s21 + $0x90] sm:$0xff]  ;;  %v1013_v41 = vld [vmem:[%s6977_s21 + $0x78] sm:$0xff]  ;;  %v1010_v45 = vld [vmem:[%s6977_s21 + $0x60] sm:$0xff] }
  0xd3   : > { %1281 = vmatpush.msra.mxu2 %v1124_v23  ;;  %1230 = vmatpush.msra.mxu0 %v1025_v25  ;;  %v1064_v38 = vld [vmem:[%s6977_s21 + $0x210] sm:$0xff]  ;;  %v1061_v42 = vld [vmem:[%s6977_s21 + $0x1f8] sm:$0xff]  ;;  %v1058_v46 = vld [vmem:[%s6977_s21 + $0x1e0] sm:$0xff] }
  0xd4   : > { %1307 = vmatpush.msra.mxu3 %v1172_v24  ;;  %1256 = vmatpush.msra.mxu1 %v1073_v26  ;;  %v1112_v39 = vld [vmem:[%s6977_s21 + $0x390] sm:$0xff]  ;;  %v1109_v43 = vld [vmem:[%s6977_s21 + $0x378] sm:$0xff]  ;;  %v1106_v47 = vld [vmem:[%s6977_s21 + $0x360] sm:$0xff] }
  0xd5   : > { %1282 = vmatpush.msra.mxu2 %v1121_v27  ;;  %1231 = vmatpush.msra.mxu0 %v1022_v29  ;;  %v1160_v40 = vld [vmem:[%s6977_s21 + $0x510] sm:$0xff]  ;;  %v1157_v44 = vld [vmem:[%s6977_s21 + $0x4f8] sm:$0xff]  ;;  %v1154_v48 = vld [vmem:[%s6977_s21 + $0x4e0] sm:$0xff] }
  0xd6   : > { %1308 = vmatpush.msra.mxu3 %v1169_v28  ;;  %1257 = vmatpush.msra.mxu1 %v1070_v30  ;;  %v1007_v49 = vld [vmem:[%s6977_s21 + $0x48] sm:$0xff]  ;;  %v1004_v53 = vld [vmem:[%s6977_s21 + $0x30] sm:$0xff]  ;;  %v1001_v57 = vld [vmem:[%s6977_s21 + $0x18] sm:$0xff] }
  0xd7   : > { %1283 = vmatpush.msra.mxu2 %v1118_v31  ;;  %1232 = vmatpush.msra.mxu0 %v1019_v33  ;;  %v1055_v50 = vld [vmem:[%s6977_s21 + $0x1c8] sm:$0xff]  ;;  %v1052_v54 = vld [vmem:[%s6977_s21 + $0x1b0] sm:$0xff]  ;;  %v1049_v58 = vld [vmem:[%s6977_s21 + $0x198] sm:$0xff] }
  0xd8   : > { %1309 = vmatpush.msra.mxu3 %v1166_v32  ;;  %1258 = vmatpush.msra.mxu1 %v1067_v34  ;;  %v1103_v51 = vld [vmem:[%s6977_s21 + $0x348] sm:$0xff]  ;;  %v1100_v55 = vld [vmem:[%s6977_s21 + $0x330] sm:$0xff]  ;;  %v1097_v59 = vld [vmem:[%s6977_s21 + $0x318] sm:$0xff] }
  0xd9   : > { %1284 = vmatpush.msra.mxu2 %v1115_v35  ;;  %1233 = vmatpush.msra.mxu0 %v1016_v37  ;;  %v1151_v52 = vld [vmem:[%s6977_s21 + $0x4c8] sm:$0xff]  ;;  %v1148_v56 = vld [vmem:[%s6977_s21 + $0x4b0] sm:$0xff]  ;;  %v1145_v60 = vld [vmem:[%s6977_s21 + $0x498] sm:$0xff] }
  0xda   : > { %1310 = vmatpush.msra.mxu3 %v1163_v36  ;;  %1259 = vmatpush.msra.mxu1 %v1064_v38  ;;  %v998_v61 = vld [vmem:[%s6977_s21] sm:$0xff]  ;;  %v1044_v2 = vld [vmem:[%s6977_s21 + $0x170] sm:$0xff]  ;;  %v1211_v3 = vld [vmem:[%s6977_s21 + $0x6a8] sm:$0xff] }
  0xdb   : > { %1285 = vmatpush.msra.mxu2 %v1112_v39  ;;  %1234 = vmatpush.msra.mxu0 %v1013_v41  ;;  %v1046_v62 = vld [vmem:[%s6977_s21 + $0x180] sm:$0xff]  ;;  %v1092_v4 = vld [vmem:[%s6977_s21 + $0x2f0] sm:$0xff]  ;;  %v1041_v6 = vld [vmem:[%s6977_s21 + $0x158] sm:$0xff] }
  0xdc   : > { %1311 = vmatpush.msra.mxu3 %v1160_v40  ;;  %1260 = vmatpush.msra.mxu1 %v1061_v42  ;;  %v1094_v63 = vld [vmem:[%s6977_s21 + $0x300] sm:$0xff]  ;;  %v1140_v5 = vld [vmem:[%s6977_s21 + $0x470] sm:$0xff]  ;;  %v1089_v8 = vld [vmem:[%s6977_s21 + $0x2d8] sm:$0xff] }
  0xdd   : > { %1286 = vmatpush.msra.mxu2 %v1109_v43  ;;  %1235 = vmatpush.msra.mxu0 %v1010_v45  ;;  %v1142_v0 = vld [vmem:[%s6977_s21 + $0x480] sm:$0xff]  ;;  %v1208_v7 = vld [vmem:[%s6977_s21 + $0x690] sm:$0xff]  ;;  %v1137_v9 = vld [vmem:[%s6977_s21 + $0x458] sm:$0xff] }
  0xde   : > { %1312 = vmatpush.msra.mxu3 %v1157_v44  ;;  %1261 = vmatpush.msra.mxu1 %v1058_v46  ;;  %v7097_v1 = vld [vmem:[%s6984_s2] sm:$0xff]  ;;  %v1035_v14 = vld [vmem:[%s6977_s21 + $0x128] sm:$0xff]  ;;  %v1032_v20 = vld [vmem:[%s6977_s21 + $0x110] sm:$0xff] }
  0xdf   : > { %1287 = vmatpush.msra.mxu2 %v1106_v47  ;;  %1236 = vmatpush.msra.mxu0 %v1007_v49  ;;  %v1038_v10 = vld [vmem:[%s6977_s21 + $0x140] sm:$0xff]  ;;  %v1205_v11 = vld [vmem:[%s6977_s21 + $0x678] sm:$0xff]  ;;  %v1083_v16 = vld [vmem:[%s6977_s21 + $0x2a8] sm:$0xff] }
  0xe0   : > { %1313 = vmatpush.msra.mxu3 %v1154_v48  ;;  %1262 = vmatpush.msra.mxu1 %v1055_v50  ;;  %v1086_v12 = vld [vmem:[%s6977_s21 + $0x2c0] sm:$0xff]  ;;  %v1131_v17 = vld [vmem:[%s6977_s21 + $0x428] sm:$0xff]  ;;  %v1080_v22 = vld [vmem:[%s6977_s21 + $0x290] sm:$0xff] }
  0xe1   : > { %1288 = vmatpush.msra.mxu2 %v1103_v51  ;;  %1237 = vmatpush.msra.mxu0 %v1004_v53  ;;  %v1134_v13 = vld [vmem:[%s6977_s21 + $0x440] sm:$0xff]  ;;  %v1199_v21 = vld [vmem:[%s6977_s21 + $0x648] sm:$0xff]  ;;  %v1128_v23 = vld [vmem:[%s6977_s21 + $0x410] sm:$0xff] }
  0xe2   : > { %1314 = vmatpush.msra.mxu3 %v1151_v52  ;;  %1263 = vmatpush.msra.mxu1 %v1052_v54  ;;  %v1202_v15 = vld [vmem:[%s6977_s21 + $0x660] sm:$0xff]  ;;  %v1029_v24 = vld [vmem:[%s6977_s21 + $0xf8] sm:$0xff]  ;;  %v1196_v25 = vld [vmem:[%s6977_s21 + $0x630] sm:$0xff] }
  0xe3   : > { %1289 = vmatpush.msra.mxu2 %v1100_v55  ;;  %1238 = vmatpush.msra.mxu0 %v1001_v57  ;;  %v7117_v18 = vld [vmem:[%s6984_s2 + $0x8] sm:$0xff]  ;;  %v1077_v26 = vld [vmem:[%s6977_s21 + $0x278] sm:$0xff]  ;;  %v7133_v28 = vld [vmem:[%s6984_s2 + $0x10] sm:$0xff] }
  0xe4   : > { %1315 = vmatpush.msra.mxu3 %v1148_v56  ;;  %1264 = vmatpush.msra.mxu1 %v1049_v58  ;;  %v7120_v19 = vld [vmem:[%s6984_s2 + $0x28] sm:$0xff]  ;;  %v1125_v27 = vld [vmem:[%s6977_s21 + $0x3f8] sm:$0xff]  ;;  %v7148_v38 = vld [vmem:[%s6984_s2 + $0x30] sm:$0xff] }
  0xe5   : > { %1290 = vmatpush.msra.mxu2 %v1097_v59  ;;  %1239 = vmatpush.msra.mxu0 %v998_v61  ;;  %v1193_v29 = vld [vmem:[%s6977_s21 + $0x618] sm:$0xff]  ;;  %v1026_v30 = vld [vmem:[%s6977_s21 + $0xe0] sm:$0xff]  ;;  %v1023_v35 = vld [vmem:[%s6977_s21 + $0xc8] sm:$0xff] }
  0xe6   : > { %1316 = vmatpush.msra.mxu3 %v1145_v60  ;;  %1265 = vmatpush.msra.mxu1 %v1046_v62  ;;  %v1074_v31 = vld [vmem:[%s6977_s21 + $0x260] sm:$0xff]  ;;  %v7141_v33 = vld [vmem:[%s6984_s2 + $0x18] sm:$0xff]  ;;  %v1071_v36 = vld [vmem:[%s6977_s21 + $0x248] sm:$0xff] }
  0xe7   : > { %1291 = vmatpush.msra.mxu2 %v1094_v63  ;;  %1240 = vmatmul.f32.vlgmr.msra.gmra.mxu0 %v7097_v1  ;;  %v1122_v32 = vld [vmem:[%s6977_s21 + $0x3e0] sm:$0xff]  ;;  %v1119_v37 = vld [vmem:[%s6977_s21 + $0x3c8] sm:$0xff]  ;;  %v1188_v39 = vld [vmem:[%s6977_s21 + $0x5f0] sm:$0xff] }
  0xe8   : > { %1317 = vmatpush.msra.mxu3 %v1142_v0  ;;  %1354 = vmatpush.msrb.mxu1 %v1044_v2  ;;  %v1190_v34 = vld [vmem:[%s6977_s21 + $0x600] sm:$0xff]  ;;  %v1020_v40 = vld [vmem:[%s6977_s21 + $0xb0] sm:$0xff]  ;;  %v1185_v44 = vld [vmem:[%s6977_s21 + $0x5d8] sm:$0xff] }
  0xe9   : > { %1336 = vmatpush.msrb.mxu0 %v1211_v3  ;;  %1380 = vmatpush.msrb.mxu2 %v1092_v4  ;;  %v7154_v41 = vld [vmem:[%s6984_s2 + $0x50] sm:$0x3]  ;;  %v1017_v45 = vld [vmem:[%s6977_s21 + $0x98] sm:$0xff]  ;;  %v1182_v48 = vld [vmem:[%s6977_s21 + $0x5c0] sm:$0xff] }
  0xea   : > { %1406 = vmatpush.msrb.mxu3 %v1140_v5  ;;  %1355 = vmatpush.msrb.mxu1 %v1041_v6  ;;  %v1068_v42 = vld [vmem:[%s6977_s21 + $0x230] sm:$0xff]  ;;  %v1065_v46 = vld [vmem:[%s6977_s21 + $0x218] sm:$0xff]  ;;  %v1014_v50 = vld [vmem:[%s6977_s21 + $0x80] sm:$0xff] }
  0xeb   : > { %1337 = vmatpush.msrb.mxu0 %v1208_v7  ;;  %1381 = vmatpush.msrb.mxu2 %v1089_v8  ;;  %v1116_v43 = vld [vmem:[%s6977_s21 + $0x3b0] sm:$0xff]  ;;  %v1113_v47 = vld [vmem:[%s6977_s21 + $0x398] sm:$0xff]  ;;  %v1062_v51 = vld [vmem:[%s6977_s21 + $0x200] sm:$0xff] }
  0xec   : > { %1407 = vmatpush.msrb.mxu3 %v1137_v9  ;;  %1356 = vmatpush.msrb.mxu1 %v1038_v10  ;;  %v7166_v49 = vld [vmem:[%s6984_s2 + $0x38] sm:$0xff]  ;;  %v1110_v52 = vld [vmem:[%s6977_s21 + $0x380] sm:$0xff]  ;;  %v1179_v53 = vld [vmem:[%s6977_s21 + $0x5a8] sm:$0xff] }
  0xed   : > { %1338 = vmatpush.msrb.mxu0 %v1205_v11  ;;  %1382 = vmatpush.msrb.mxu2 %v1086_v12  ;;  %v7173_v54 = vld [vmem:[%s6984_s2 + $0x40] sm:$0xff]  ;;  %v1011_v55 = vld [vmem:[%s6977_s21 + $0x68] sm:$0xff]  ;;  %v7180_v58 = vld [vmem:[%s6984_s2 + $0x58] sm:$0x3] }
  0xee   : > { %1408 = vmatpush.msrb.mxu3 %v1134_v13  ;;  %1357 = vmatpush.msrb.mxu1 %v1035_v14  ;;  %v1059_v56 = vld [vmem:[%s6977_s21 + $0x1e8] sm:$0xff]  ;;  %v1176_v59 = vld [vmem:[%s6977_s21 + $0x590] sm:$0xff]  ;;  %v7186_v61 = vld [vmem:[%s6984_s2 + $0x20] sm:$0xff] }
  0xef   : > { %1339 = vmatpush.msrb.mxu0 %v1202_v15  ;;  %1383 = vmatpush.msrb.mxu2 %v1083_v16  ;;  %v1107_v57 = vld [vmem:[%s6977_s21 + $0x368] sm:$0xff]  ;;  %v1008_v60 = vld [vmem:[%s6977_s21 + $0x50] sm:$0xff]  ;;  %v1173_v0 = vld [vmem:[%s6977_s21 + $0x578] sm:$0xff] }
  0xf0   : > { %1409 = vmatpush.msrb.mxu3 %v1131_v17  ;;  %1266 = vmatmul.f32.vlgmr.msra.gmra.mxu1 %v7117_v18  ;;  %v1056_v62 = vld [vmem:[%s6977_s21 + $0x1d0] sm:$0xff]  ;;  %v1005_v2 = vld [vmem:[%s6977_s21 + $0x38] sm:$0xff]  ;;  %v1170_v5 = vld [vmem:[%s6977_s21 + $0x560] sm:$0xff] }
  0xf1   : > { %1243 = vmatmul.f32.gmra.mxu0 %v7120_v19  ;;  %1358 = vmatpush.msrb.mxu1 %v1032_v20  ;;  %v1104_v63 = vld [vmem:[%s6977_s21 + $0x350] sm:$0xff]  ;;  %v1053_v3 = vld [vmem:[%s6977_s21 + $0x1b8] sm:$0xff]  ;;  %v1002_v7 = vld [vmem:[%s6977_s21 + $0x20] sm:$0xff] }
  0xf2   : > { %1340 = vmatpush.msrb.mxu0 %v1199_v21  ;;  %1384 = vmatpush.msrb.mxu2 %v1080_v22  ;;  %v1101_v4 = vld [vmem:[%s6977_s21 + $0x338] sm:$0xff]  ;;  %v1050_v8 = vld [vmem:[%s6977_s21 + $0x1a0] sm:$0xff]  ;;  %v1167_v10 = vld [vmem:[%s6977_s21 + $0x548] sm:$0xff] }
  0xf3   : > { %1410 = vmatpush.msrb.mxu3 %v1128_v23  ;;  %1359 = vmatpush.msrb.mxu1 %v1029_v24  ;;  %v7199_v6 = vld [vmem:[%s6984_s2 + $0x60] sm:$0x3]  ;;  %v7206_v11 = vld [vmem:[%s6984_s2 + $0x68] sm:$0x3]  ;;  %v1164_v15 = vld [vmem:[%s6977_s21 + $0x530] sm:$0xff] }
  0xf4   : > { %1341 = vmatpush.msrb.mxu0 %v1196_v25  ;;  %1385 = vmatpush.msrb.mxu2 %v1077_v26  ;;  %v1098_v9 = vld [vmem:[%s6977_s21 + $0x320] sm:$0xff]  ;;  %v999_v12 = vld [vmem:[%s6977_s21 + $0x8] sm:$0xff]  ;;  %v1045_v16 = vld [vmem:[%s6977_s21 + $0x178] sm:$0xff] }
  0xf5   : > { %1411 = vmatpush.msrb.mxu3 %v1125_v27  ;;  %1292 = vmatmul.f32.vlgmr.msra.gmra.mxu2 %v7133_v28  ;;  %v1047_v13 = vld [vmem:[%s6977_s21 + $0x188] sm:$0xff]  ;;  %v1093_v17 = vld [vmem:[%s6977_s21 + $0x2f8] sm:$0xff]  ;;  %v1212_v22 = vld [vmem:[%s6977_s21 + $0x6b0] sm:$0xff] }
  0xf6   : > { %1342 = vmatpush.msrb.mxu0 %v1193_v29  ;;  %1360 = vmatpush.msrb.mxu1 %v1026_v30  ;;  %v1095_v14 = vld [vmem:[%s6977_s21 + $0x308] sm:$0xff]  ;;  %v1161_v21 = vld [vmem:[%s6977_s21 + $0x518] sm:$0xff]  ;;  %v1042_v23 = vld [vmem:[%s6977_s21 + $0x160] sm:$0xff] }
  0xf7   : > { %1386 = vmatpush.msrb.mxu2 %v1074_v31  ;;  %1412 = vmatpush.msrb.mxu3 %v1122_v32  ;;  %v7217_v20 = vld [vmem:[%s6984_s2 + $0x48] sm:$0xff]  ;;  %v1209_v26 = vld [vmem:[%s6977_s21 + $0x698] sm:$0xff]  ;;  %v1036_v32 = vld [vmem:[%s6977_s21 + $0x130] sm:$0xff] }
  0xf8   : > { %1318 = vmatmul.f32.vlgmr.msra.gmra.mxu3 %v7141_v33  ;;  %1343 = vmatpush.msrb.mxu0 %v1190_v34  ;;  %v1090_v24 = vld [vmem:[%s6977_s21 + $0x2e0] sm:$0xff]  ;;  %v1039_v27 = vld [vmem:[%s6977_s21 + $0x148] sm:$0xff]  ;;  %v1084_v34 = vld [vmem:[%s6977_s21 + $0x2b0] sm:$0xff] }
  0xf9   : > { %1361 = vmatpush.msrb.mxu1 %v1023_v35  ;;  %1387 = vmatpush.msrb.mxu2 %v1071_v36  ;;  %v1158_v25 = vld [vmem:[%s6977_s21 + $0x500] sm:$0xff]  ;;  %v1087_v29 = vld [vmem:[%s6977_s21 + $0x2c8] sm:$0xff]  ;;  %v1152_v35 = vld [vmem:[%s6977_s21 + $0x4d0] sm:$0xff] }
  0xfa   : > { %1413 = vmatpush.msrb.mxu3 %v1119_v37  ;;  %1269 = vmatmul.f32.gmra.mxu1 %v7148_v38  ;;  %v1155_v30 = vld [vmem:[%s6977_s21 + $0x4e8] sm:$0xff]  ;;  %v1206_v31 = vld [vmem:[%s6977_s21 + $0x680] sm:$0xff]  ;;  %v1033_v37 = vld [vmem:[%s6977_s21 + $0x118] sm:$0xff] }
  0xfb   : > { %1432 = vmatpush.msra.mxu0 %v1188_v39  ;;  %1362 = vmatpush.msrb.mxu1 %v1020_v40  ;;  %v1203_v36 = vld [vmem:[%s6977_s21 + $0x668] sm:$0xff]  ;;  %v1081_v39 = vld [vmem:[%s6977_s21 + $0x298] sm:$0xff] }
  0xfc   : > { %1246 = vmatmul.f32.gmra.mxu0 %v7154_v41  ;;  %1388 = vmatpush.msrb.mxu2 %v1068_v42  ;;  %v7241_v40 = vld [vmem:[%s6984_s2 + $0x70] sm:$0x3]  ;;  %v1149_v42 = vld [vmem:[%s6977_s21 + $0x4b8] sm:$0xff] }
  0xfd   : > { %1414 = vmatpush.msrb.mxu3 %v1116_v43  ;;  %1433 = vmatpush.msra.mxu0 %v1185_v44  ;;  %v1200_v43 = vld [vmem:[%s6977_s21 + $0x650] sm:$0xff]  ;;  %v1030_v44 = vld [vmem:[%s6977_s21 + $0x100] sm:$0xff] }
  0xfe   : > { %1363 = vmatpush.msrb.mxu1 %v1017_v45  ;;  %1389 = vmatpush.msrb.mxu2 %v1065_v46  ;;  %v1078_v45 = vld [vmem:[%s6977_s21 + $0x280] sm:$0xff] }
  0xff   : > { %1415 = vmatpush.msrb.mxu3 %v1113_v47  ;;  %1434 = vmatpush.msra.mxu0 %v1182_v48  ;;  %v1146_v46 = vld [vmem:[%s6977_s21 + $0x4a0] sm:$0xff]  ;;  %v1197_v47 = vld [vmem:[%s6977_s21 + $0x638] sm:$0xff]  ;;  %v1027_v48 = vld [vmem:[%s6977_s21 + $0xe8] sm:$0xff] }
 0x100   : > { %1295 = vmatmul.f32.gmra.mxu2 %v7166_v49  ;;  %1364 = vmatpush.msrb.mxu1 %v1014_v50  ;;  %v1075_v50 = vld [vmem:[%s6977_s21 + $0x268] sm:$0xff] }
 0x101   : > { %1390 = vmatpush.msrb.mxu2 %v1062_v51  ;;  %1416 = vmatpush.msrb.mxu3 %v1110_v52  ;;  %v1143_v51 = vld [vmem:[%s6977_s21 + $0x488] sm:$0xff]  ;;  %v1194_v52 = vld [vmem:[%s6977_s21 + $0x620] sm:$0xff] }
 0x102   : > { %1435 = vmatpush.msra.mxu0 %v1179_v53  ;;  %1321 = vmatmul.f32.gmra.mxu3 %v7173_v54  ;;  %v1024_v53 = vld [vmem:[%s6977_s21 + $0xd0] sm:$0xff] }
 0x103   : > { %1365 = vmatpush.msrb.mxu1 %v1011_v55  ;;  %1391 = vmatpush.msrb.mxu2 %v1059_v56  ;;  %v1072_v55 = vld [vmem:[%s6977_s21 + $0x250] sm:$0xff]  ;;  %v1141_v56 = vld [vmem:[%s6977_s21 + $0x478] sm:$0xff] }
 0x104   : > { %1417 = vmatpush.msrb.mxu3 %v1107_v57  ;;  %1272 = vmatmul.f32.gmra.mxu1 %v7180_v58  ;;  %v1191_v57 = vld [vmem:[%s6977_s21 + $0x608] sm:$0xff] }
 0x105   : > { %1436 = vmatpush.msra.mxu0 %v1176_v59  ;;  %1366 = vmatpush.msrb.mxu1 %v1008_v60  ;;  %v1021_v59 = vld [vmem:[%s6977_s21 + $0xb8] sm:$0xff] }
 0x106   : > { %4941 = vmatmul.msk.f32.vlgmr.msrb.gmra.mxu0 %vm1214_vm2, %v7186_v61  ;;  %1392 = vmatpush.msrb.mxu2 %v1056_v62  ;;  %v1069_v60 = vld [vmem:[%s6977_s21 + $0x238] sm:$0xff]  ;;  %v1138_v62 = vld [vmem:[%s6977_s21 + $0x460] sm:$0xff] }
 0x107   : > { %1418 = vmatpush.msrb.mxu3 %v1104_v63  ;;  %1437 = vmatpush.msra.mxu0 %v1173_v0  ;;  %v1189_v63 = vld [vmem:[%s6977_s21 + $0x5f8] sm:$0xff]  ;;  %v1018_v0 = vld [vmem:[%s6977_s21 + $0xa0] sm:$0xff] }
 0x108   : > { %1367 = vmatpush.msrb.mxu1 %v1005_v2  ;;  %1393 = vmatpush.msrb.mxu2 %v1053_v3  ;;  %v1066_v2 = vld [vmem:[%s6977_s21 + $0x220] sm:$0xff]  ;;  %v1135_v3 = vld [vmem:[%s6977_s21 + $0x448] sm:$0xff] }
 0x109   : > { %1419 = vmatpush.msrb.mxu3 %v1101_v4  ;;  %1438 = vmatpush.msra.mxu0 %v1170_v5  ;;  %v1186_v4 = vld [vmem:[%s6977_s21 + $0x5e0] sm:$0xff]  ;;  %v1015_v5 = vld [vmem:[%s6977_s21 + $0x88] sm:$0xff] }
 0x10a   : > { %1298 = vmatmul.f32.gmra.mxu2 %v7199_v6  ;;  %1368 = vmatpush.msrb.mxu1 %v1002_v7  ;;  %v1063_v7 = vld [vmem:[%s6977_s21 + $0x208] sm:$0xff] }
 0x10b   : > { %1394 = vmatpush.msrb.mxu2 %v1050_v8  ;;  %1420 = vmatpush.msrb.mxu3 %v1098_v9  ;;  %v1132_v8 = vld [vmem:[%s6977_s21 + $0x430] sm:$0xff]  ;;  %v1183_v9 = vld [vmem:[%s6977_s21 + $0x5c8] sm:$0xff] }
 0x10c   : > { %1439 = vmatpush.msra.mxu0 %v1167_v10  ;;  %1324 = vmatmul.f32.gmra.mxu3 %v7206_v11  ;;  %v1012_v10 = vld [vmem:[%s6977_s21 + $0x70] sm:$0xff] }
 0x10d   : > { %1369 = vmatpush.msrb.mxu1 %v999_v12  ;;  %1395 = vmatpush.msrb.mxu2 %v1047_v13  ;;  %v1060_v12 = vld [vmem:[%s6977_s21 + $0x1f0] sm:$0xff]  ;;  %v1129_v13 = vld [vmem:[%s6977_s21 + $0x418] sm:$0xff] }
 0x10e   : > { %1421 = vmatpush.msrb.mxu3 %v1095_v14  ;;  %1370 = vmatmul.f32.vlgmr.msrb.gmra.mxu1 %v7097_v1  ;;  %v1180_v14 = vld [vmem:[%s6977_s21 + $0x5b0] sm:$0xff] }
 0x10f   : > { %1440 = vmatpush.msra.mxu0 %v1164_v15  ;;  %1484 = vmatpush.msra.mxu2 %v1045_v16  ;;  %v1009_v15 = vld [vmem:[%s6977_s21 + $0x58] sm:$0xff] }
 0x110   : > { %1510 = vmatpush.msra.mxu3 %v1093_v17  ;;  %4942 = vmatmul.msk.f32.gmra.mxu0 %vm1214_vm2, %v7217_v20  ;;  %v1057_v16 = vld [vmem:[%s6977_s21 + $0x1d8] sm:$0xff]  ;;  %v1126_v17 = vld [vmem:[%s6977_s21 + $0x400] sm:$0xff] }
 0x111   : > { %1441 = vmatpush.msra.mxu0 %v1161_v21  ;;  %1466 = vmatpush.msra.mxu1 %v1212_v22  ;;  %v1177_v21 = vld [vmem:[%s6977_s21 + $0x598] sm:$0xff]  ;;  %v1006_v22 = vld [vmem:[%s6977_s21 + $0x40] sm:$0xff] }
 0x112   : > { %1485 = vmatpush.msra.mxu2 %v1042_v23  ;;  %1511 = vmatpush.msra.mxu3 %v1090_v24  ;;  %v1054_v23 = vld [vmem:[%s6977_s21 + $0x1c0] sm:$0xff]  ;;  %v1123_v24 = vld [vmem:[%s6977_s21 + $0x3e8] sm:$0xff] }
 0x113   : > { %1442 = vmatpush.msra.mxu0 %v1158_v25  ;;  %1467 = vmatpush.msra.mxu1 %v1209_v26  ;;  %v1174_v25 = vld [vmem:[%s6977_s21 + $0x580] sm:$0xff]  ;;  %v1003_v26 = vld [vmem:[%s6977_s21 + $0x28] sm:$0xff] }
 0x114   : > { %1486 = vmatpush.msra.mxu2 %v1039_v27  ;;  %1512 = vmatpush.msra.mxu3 %v1087_v29  ;;  %v1051_v27 = vld [vmem:[%s6977_s21 + $0x1a8] sm:$0xff]  ;;  %v1120_v29 = vld [vmem:[%s6977_s21 + $0x3d0] sm:$0xff] }
 0x115   : > { %1396 = vmatmul.f32.vlgmr.msrb.gmra.mxu2 %v7117_v18  ;;  %1443 = vmatpush.msra.mxu0 %v1155_v30  ;;  %v1171_v30 = vld [vmem:[%s6977_s21 + $0x568] sm:$0xff] }
 0x116   : > { %1468 = vmatpush.msra.mxu1 %v1206_v31  ;;  %1487 = vmatpush.msra.mxu2 %v1036_v32  ;;  %v1000_v31 = vld [vmem:[%s6977_s21 + $0x10] sm:$0xff] }
 0x117   : > { %1513 = vmatpush.msra.mxu3 %v1084_v34  ;;  %1373 = vmatmul.f32.gmra.mxu1 %v7120_v19  ;;  %v1048_v32 = vld [vmem:[%s6977_s21 + $0x190] sm:$0xff]  ;;  %v1117_v34 = vld [vmem:[%s6977_s21 + $0x3b8] sm:$0xff] }
 0x118   : > { %1422 = vmatmul.f32.vlgmr.msrb.gmra.mxu3 %v7133_v28  ;;  %1444 = vmatpush.msra.mxu0 %v1152_v35  ;;  %v1168_v35 = vld [vmem:[%s6977_s21 + $0x550] sm:$0xff] }
 0x119   : > { %1469 = vmatpush.msra.mxu1 %v1203_v36  ;;  %1488 = vmatpush.msra.mxu2 %v1033_v37  ;;  %v1213_v36 = vld [vmem:[%s6977_s21 + $0x6b8] sm:$0xff] }
 0x11a   : > { %1514 = vmatpush.msra.mxu3 %v1081_v39  ;;  %4943 = vmatmul.msk.f32.gmra.mxu0 %vm1214_vm2, %v7241_v40  ;;  %v1165_v37 = vld [vmem:[%s6977_s21 + $0x538] sm:$0xff]  ;;  %v1114_v39 = vld [vmem:[%s6977_s21 + $0x3a0] sm:$0xff] }
 0x11b   : > { %1445 = vmatpush.msra.mxu0 %v1149_v42  ;;  %1470 = vmatpush.msra.mxu1 %v1200_v43  ;;  %v1210_v42 = vld [vmem:[%s6977_s21 + $0x6a0] sm:$0xff] }
 0x11c   : > { %1489 = vmatpush.msra.mxu2 %v1030_v44  ;;  %1515 = vmatpush.msra.mxu3 %v1078_v45  ;;  %v1162_v43 = vld [vmem:[%s6977_s21 + $0x520] sm:$0xff]  ;;  %v1159_v44 = vld [vmem:[%s6977_s21 + $0x508] sm:$0xff]  ;;  %v1108_v45 = vld [vmem:[%s6977_s21 + $0x370] sm:$0xff] }
 0x11d   : > { %1446 = vmatpush.msra.mxu0 %v1146_v46  ;;  %1471 = vmatpush.msra.mxu1 %v1197_v47  ;;  %v1156_v46 = vld [vmem:[%s6977_s21 + $0x4f0] sm:$0xff]  ;;  %v1105_v47 = vld [vmem:[%s6977_s21 + $0x358] sm:$0xff] }
 0x11e   : > { %1490 = vmatpush.msra.mxu2 %v1027_v48  ;;  %1516 = vmatpush.msra.mxu3 %v1075_v50  ;;  %v1204_v48 = vld [vmem:[%s6977_s21 + $0x670] sm:$0xff]  ;;  %v1153_v50 = vld [vmem:[%s6977_s21 + $0x4d8] sm:$0xff] }
 0x11f   : > { %1399 = vmatmul.f32.gmra.mxu2 %v7148_v38  ;;  %1447 = vmatpush.msra.mxu0 %v1143_v51  ;;  %v1102_v51 = vld [vmem:[%s6977_s21 + $0x340] sm:$0xff] }
 0x120   : > { %1472 = vmatpush.msra.mxu1 %v1194_v52  ;;  %1491 = vmatpush.msra.mxu2 %v1024_v53  ;;  %v1150_v52 = vld [vmem:[%s6977_s21 + $0x4c0] sm:$0xff]  ;;  %v1201_v53 = vld [vmem:[%s6977_s21 + $0x658] sm:$0xff] }
 0x121   : > { %1517 = vmatpush.msra.mxu3 %v1072_v55  ;;  %1536 = vmatpush.msrb.mxu0 %v1141_v56  ;;  %v1099_v55 = vld [vmem:[%s6977_s21 + $0x328] sm:$0xff]  ;;  %v1198_v56 = vld [vmem:[%s6977_s21 + $0x640] sm:$0xff] }
 0x122   : > { %1425 = vmatmul.f32.gmra.mxu3 %v7166_v49  ;;  %1376 = vmatmul.f32.gmra.mxu1 %v7154_v41 }
 0x123   : > { %1473 = vmatpush.msra.mxu1 %v1191_v57  ;;  %1492 = vmatpush.msra.mxu2 %v1021_v59  ;;  %v1144_v57 = vld [vmem:[%s6977_s21 + $0x490] sm:$0xff]  ;;  %v1195_v59 = vld [vmem:[%s6977_s21 + $0x628] sm:$0xff] }
 0x124   : > { %1518 = vmatpush.msra.mxu3 %v1069_v60  ;;  %1448 = vmatmul.f32.vlgmr.msra.gmra.mxu0 %v7141_v33  ;;  %v1192_v60 = vld [vmem:[%s6977_s21 + $0x610] sm:$0xff] }
 0x125   : > { %1537 = vmatpush.msrb.mxu0 %v1138_v62  ;;  %1562 = vmatpush.msrb.mxu1 %v1189_v63 }
 0x126   : > { %1493 = vmatpush.msra.mxu2 %v1018_v0  ;;  %1519 = vmatpush.msra.mxu3 %v1066_v2 }
 0x127   : > { %1538 = vmatpush.msrb.mxu0 %v1135_v3  ;;  %1563 = vmatpush.msrb.mxu1 %v1186_v4  ;;  %v974_v3 = vld [vmem:[#allocation2] sm:$0xff] }
 0x128   : > { %1494 = vmatpush.msra.mxu2 %v1015_v5  ;;  %1520 = vmatpush.msra.mxu3 %v1063_v7 }
 0x129   : > { %1402 = vmatmul.f32.gmra.mxu2 %v7180_v58  ;;  %1539 = vmatpush.msrb.mxu0 %v1132_v8 }
 0x12a   : > { %1564 = vmatpush.msrb.mxu1 %v1183_v9  ;;  %1495 = vmatpush.msra.mxu2 %v1012_v10  ;;  %v977_v10 = vld [vmem:[#allocation2 + $0x18] sm:$0xff] }
 0x12b   : > { %1521 = vmatpush.msra.mxu3 %v1060_v12  ;;  %1540 = vmatpush.msrb.mxu0 %v1129_v13 }
 0x12c   : > { %1428 = vmatmul.f32.gmra.mxu3 %v7199_v6  ;;  %1565 = vmatpush.msrb.mxu1 %v1180_v14 }
 0x12d   : > { %4944 = vmatmul.msk.f32.vlgmr.msra.gmra.mxu1 %vm1214_vm2, %v7186_v61  ;;  %1496 = vmatpush.msra.mxu2 %v1009_v15 }
 0x12e   : > { %1522 = vmatpush.msra.mxu3 %v1057_v16  ;;  %1451 = vmatmul.f32.gmra.mxu0 %v7173_v54 }
 0x12f   : > { %1541 = vmatpush.msrb.mxu0 %v1126_v17  ;;  %1566 = vmatpush.msrb.mxu1 %v1177_v21 }
 0x130   : > { %1497 = vmatpush.msra.mxu2 %v1006_v22  ;;  %1523 = vmatpush.msra.mxu3 %v1054_v23 }
 0x131   : > { %1542 = vmatpush.msrb.mxu0 %v1123_v24  ;;  %1567 = vmatpush.msrb.mxu1 %v1174_v25  ;;  %v980_v24 = vld [vmem:[#allocation2 + $0x30] sm:$0x3] }
 0x132   : > { %1498 = vmatpush.msra.mxu2 %v1003_v26  ;;  %1524 = vmatpush.msra.mxu3 %v1051_v27 }
 0x133   : > { %1543 = vmatpush.msrb.mxu0 %v1120_v29  ;;  %1568 = vmatpush.msrb.mxu1 %v1171_v30 }
 0x134   : > { %1499 = vmatpush.msra.mxu2 %v1000_v31  ;;  %1525 = vmatpush.msra.mxu3 %v1048_v32 }
 0x135   : > { %1500 = vmatmul.f32.vlgmr.msra.gmra.mxu2 %v7097_v1  ;;  %1526 = vmatmul.f32.vlgmr.msra.gmra.mxu3 %v7117_v18  ;;  %v1111_v1 = vld [vmem:[%s6977_s21 + $0x388] sm:$0xff] }
 0x136   : > { %1544 = vmatpush.msrb.mxu0 %v1117_v34  ;;  %1569 = vmatpush.msrb.mxu1 %v1168_v35  ;;  %v1207_v18 = vld [vmem:[%s6977_s21 + $0x688] sm:$0xff] }
 0x137   : > { %1596 = vmatpush.msrb.mxu2 %v1213_v36  ;;  %4945 = vmatmul.msk.f32.gmra.mxu1 %vm1214_vm2, %v7217_v20 }
 0x138   : > { %1454 = vmatmul.f32.gmra.mxu0 %v7206_v11  ;;  %1570 = vmatpush.msrb.mxu1 %v1165_v37 }
 0x139   : > { %1545 = vmatpush.msrb.mxu0 %v1114_v39  ;;  %1597 = vmatpush.msrb.mxu2 %v1210_v42  ;;  %v975_v39 = vld [vmem:[#allocation2 + $0x8] sm:$0xff] }
 0x13a   : > { %1571 = vmatpush.msrb.mxu1 %v1162_v43 }
 0x13b   : > { %1546 = vmatpush.msrb.mxu0 %v1111_v1  ;;  %1598 = vmatpush.msrb.mxu2 %v1207_v18 }
 0x13c   : > { %1572 = vmatpush.msrb.mxu1 %v1159_v44 }
 0x13d   : > { %1547 = vmatpush.msrb.mxu0 %v1108_v45  ;;  %1503 = vmatmul.f32.gmra.mxu2 %v7120_v19  ;;  %v1147_v19 = vld [vmem:[%s6977_s21 + $0x4a8] sm:$0xff] }
 0x13e   : > { %1529 = vmatmul.f32.gmra.mxu3 %v7148_v38  ;;  %1573 = vmatpush.msrb.mxu1 %v1156_v46  ;;  %v1096_v38 = vld [vmem:[%s6977_s21 + $0x310] sm:$0xff] }
 0x13f   : > { %1548 = vmatpush.msrb.mxu0 %v1105_v47  ;;  %4946 = vmatmul.msk.f32.gmra.mxu1 %vm1214_vm2, %v7241_v40 }
 0x140   : > { %1599 = vmatpush.msrb.mxu2 %v1204_v48  ;;  %1574 = vmatpush.msrb.mxu1 %v1153_v50  ;;  %v978_v50 = vld [vmem:[#allocation2 + $0x20] sm:$0xff] }
 0x141   : > { %1549 = vmatpush.msrb.mxu0 %v1102_v51 }
 0x142   : > { %1575 = vmatpush.msrb.mxu1 %v1150_v52  ;;  %1600 = vmatpush.msrb.mxu2 %v1201_v53 }
 0x143   : > { %1550 = vmatpush.msrb.mxu0 %v1099_v55 }
 0x144   : > { %1576 = vmatpush.msrb.mxu1 %v1147_v19  ;;  %1601 = vmatpush.msrb.mxu2 %v1198_v56 }
 0x145   : > { %1551 = vmatpush.msrb.mxu0 %v1096_v38  ;;  %1506 = vmatmul.f32.gmra.mxu2 %v7154_v41 }
 0x146   : > { %1552 = vmatmul.f32.vlgmr.msrb.gmra.mxu0 %v7133_v28  ;;  %1532 = vmatmul.f32.gmra.mxu3 %v7180_v58 }
 0x147   : > { %1577 = vmatpush.msrb.mxu1 %v1144_v57  ;;  %1602 = vmatpush.msrb.mxu2 %v1195_v59 }
 0x148   : > { %1578 = vmatmul.f32.vlgmr.msrb.gmra.mxu1 %v7141_v33 }
 0x149   : > { %1603 = vmatpush.msrb.mxu2 %v1192_v60  ;;  %v981_v60 = vld [vmem:[#allocation2 + $0x38] sm:$0x3] }
 0x14d   : > { %4947 = vmatmul.msk.f32.vlgmr.msrb.gmra.mxu2 %vm1214_vm2, %v7186_v61 }
 0x14e   : > { %1555 = vmatmul.f32.gmra.mxu0 %v7166_v49 }
 0x150   : > { %1581 = vmatmul.f32.gmra.mxu1 %v7173_v54 }
 0x155   : > { %4948 = vmatmul.msk.f32.gmra.mxu2 %vm1214_vm2, %v7217_v20 }
 0x156   : > { %1558 = vmatmul.f32.gmra.mxu0 %v7199_v6 }
 0x158   : > { %1584 = vmatmul.f32.gmra.mxu1 %v7206_v11 }
 0x15d   : > { %4949 = vmatmul.msk.f32.gmra.mxu2 %vm1214_vm2, %v7241_v40 }
 0x164   : > { %v1241_v28 = vpop.f32.mrf.mxu0 }
 0x16d   : > { %v1267_v33 = vpop.f32.mrf.mxu1 }
 0x16e   : > { %v1244_v41 = vpop.f32.mrf.mxu0  ;;  %v1268_v61 = vadd.f32 %v1267_v33, %v1241_v28 }
 0x177   : > { %v1270_v58 = vpop.f32.mrf.mxu1 }
 0x178   : > { %v1293_v63 = vpop.f32.mrf.mxu2  ;;  %v1271_v4 = vadd.f32 %v1270_v58, %v1244_v41 }
 0x179   : > { %v1247_v62 = vpop.f32.mrf.mxu0  ;;  %v1294_v49 = vadd.f32 %v1293_v63, %v1268_v61 }
 0x17b   : > { %v1319_v0 = vpop.f32.mrf.mxu3 }
 0x17c   : > { %v1320_v54 = vadd.f32 %v1319_v0, %v1294_v49 }
 0x181   : > { %v1273_v2 = vpop.f32.mrf.mxu1 }
 0x182   : > { %v1274_v13 = vadd.f32 %v1273_v2, %v1247_v62 }
 0x183   : > { %v1345_v20 = vpop.f32.mrf.mxu0  ;;  %v1296_v5 = vpop.f32.mrf.mxu2 }
 0x184   : > { %v1346_v6 = vadd.f32 %v1345_v20, %v1320_v54  ;;  %v1297_v7 = vadd.f32 %v1296_v5, %v1271_v4  ;;  %v976_v4 = vld [vmem:[#allocation2 + $0x10] sm:$0xff] }
 0x185   : > { %v1322_v40 = vpop.f32.mrf.mxu3 }
 0x186   : > { %v1614_v11 = vadd.f32 %v1346_v6, %v974_v3  ;;  %v1323_v8 = vadd.f32 %v1322_v40, %v1297_v7 }
 0x188   : > { %1623 = vst [vmem:[#allocation2] sm:$0xff] %v1614_v11 }
 0x18b   : > { %v1371_v9 = vpop.f32.mrf.mxu1 }
 0x18d   : > { %v1348_v12 = vpop.f32.mrf.mxu0  ;;  %v1299_v15 = vpop.f32.mrf.mxu2 }
 0x18e   : > { %v1349_v14 = vadd.f32 %v1348_v12, %v1323_v8  ;;  %v1300_v17 = vadd.f32 %v1299_v15, %v1274_v13  ;;  %v979_v13 = vld [vmem:[#allocation2 + $0x28] sm:$0xff] }
 0x18f   : > { %v1325_v21 = vpop.f32.mrf.mxu3 }
 0x190   : > { %v1617_v16 = vadd.f32 %v1349_v14, %v977_v10  ;;  %v1326_v22 = vadd.f32 %v1325_v21, %v1300_v17 }
 0x192   : > { %1627 = vst [vmem:[#allocation2 + $0x18] sm:$0xff] %v1617_v16 }
 0x194   : > { %v1374_v23 = vpop.f32.mrf.mxu1 }
 0x197   : > { %v1351_v25 = vpop.f32.mrf.mxu0 }
 0x198   : > { %v1352_v26 = vadd.f32 %v1351_v25, %v1326_v22  ;;  %v1397_v29 = vpop.f32.mrf.mxu2 }
 0x199   : > { %v1398_v32 = vadd.f32 %v1397_v29, %v1371_v9 }
 0x19a   : > { %v1620_v27 = vadd.f32 %v1352_v26, %v980_v24  ;;  %v982_v24 = vld [vmem:[#allocation2 + $0x40] sm:$0x3] }
 0x19b   : > { %v1423_v31 = vpop.f32.mrf.mxu3 }
 0x19c   : > { %1630 = vst [vmem:[#allocation2 + $0x30] sm:$0x3] %v1620_v27  ;;  %v1424_v36 = vadd.f32 %v1423_v31, %v1398_v32 }
 0x19f   : > { %v1377_v30 = vpop.f32.mrf.mxu1 }
 0x1a1   : > { %v1449_v34 = vpop.f32.mrf.mxu0 }
 0x1a2   : > { %v1400_v35 = vpop.f32.mrf.mxu2  ;;  %v1450_v37 = vadd.f32 %v1449_v34, %v1424_v36 }
 0x1a3   : > { %v1401_v18 = vadd.f32 %v1400_v35, %v1374_v23 }
 0x1a5   : > { %v1426_v1 = vpop.f32.mrf.mxu3 }
 0x1a6   : > { %v1427_v47 = vadd.f32 %v1426_v1, %v1401_v18 }
 0x1aa   : > { %v1475_v42 = vpop.f32.mrf.mxu1 }
 0x1ab   : > { %v1476_v43 = vadd.f32 %v1475_v42, %v1450_v37  ;;  %v1452_v45 = vpop.f32.mrf.mxu0 }
 0x1ac   : > { %v1403_v46 = vpop.f32.mrf.mxu2  ;;  %v1453_v48 = vadd.f32 %v1452_v45, %v1427_v47 }
 0x1ad   : > { %v1615_v44 = vadd.f32 %v1476_v43, %v975_v39  ;;  %v1404_v52 = vadd.f32 %v1403_v46, %v1377_v30 }
 0x1af   : > { %1624 = vst [vmem:[#allocation2 + $0x8] sm:$0xff] %v1615_v44  ;;  %v1429_v55 = vpop.f32.mrf.mxu3 }
 0x1b0   : > { %v1430_v57 = vadd.f32 %v1429_v55, %v1404_v52 }
 0x1b4   : > { %v1478_v51 = vpop.f32.mrf.mxu1 }
 0x1b5   : > { %v1479_v53 = vadd.f32 %v1478_v51, %v1453_v48  ;;  %v1455_v56 = vpop.f32.mrf.mxu0 }
 0x1b6   : > { %v1456_v59 = vadd.f32 %v1455_v56, %v1430_v57 }
 0x1b7   : > { %v1618_v19 = vadd.f32 %v1479_v53, %v978_v50 }
 0x1b8   : > { %v1501_v38 = vpop.f32.mrf.mxu2  ;;  %v1527_v62 = vpop.f32.mrf.mxu3 }
 0x1b9   : > { %1628 = vst [vmem:[#allocation2 + $0x20] sm:$0xff] %v1618_v19  ;;  %v1528_v0 = vadd.f32 %v1527_v62, %v1501_v38 }
 0x1bc   : > { %v1481_v28 = vpop.f32.mrf.mxu1 }
 0x1bd   : > { %v1482_v33 = vadd.f32 %v1481_v28, %v1456_v59 }
 0x1bf   : > { %v1621_v41 = vadd.f32 %v1482_v33, %v981_v60 }
 0x1c0   : > { %v1504_v58 = vpop.f32.mrf.mxu2 }
 0x1c1   : > { %1631 = vst [vmem:[#allocation2 + $0x38] sm:$0x3] %v1621_v41  ;;  %v1530_v2 = vpop.f32.mrf.mxu3 }
 0x1c2   : > { %v1531_v5 = vadd.f32 %v1530_v2, %v1504_v58 }
 0x1c3   : > { %v1553_v61 = vpop.f32.mrf.mxu0 }
 0x1c4   : > { %v1554_v54 = vadd.f32 %v1553_v61, %v1528_v0 }
 0x1c5   : > { %v1579_v63 = vpop.f32.mrf.mxu1 }
 0x1c6   : > { %v1580_v20 = vadd.f32 %v1579_v63, %v1554_v54 }
 0x1c8   : > { %v1507_v49 = vpop.f32.mrf.mxu2 }
 0x1c9   : > { %v1533_v9 = vpop.f32.mrf.mxu3 }
 0x1ca   : > { %v1534_v15 = vadd.f32 %v1533_v9, %v1507_v49 }
 0x1cb   : > { %v1556_v3 = vpop.f32.mrf.mxu0 }
 0x1cc   : > { %v1557_v40 = vadd.f32 %v1556_v3, %v1531_v5 }
 0x1cd   : > { %v1582_v7 = vpop.f32.mrf.mxu1 }
 0x1ce   : > { %v1583_v10 = vadd.f32 %v1582_v7, %v1557_v40 }
 0x1d0   : > { %v1605_v6 = vpop.f32.mrf.mxu2 }
 0x1d1   : > { %v1606_v11 = vadd.f32 %v1605_v6, %v1580_v20 }
 0x1d3   : > { %v1616_v8 = vadd.f32 %v1606_v11, %v976_v4  ;;  %v1559_v12 = vpop.f32.mrf.mxu0 }
 0x1d4   : > { %v1560_v17 = vadd.f32 %v1559_v12, %v1534_v15 }
 0x1d5   : > { %1626 = vst.msk [vmem:[#allocation2 + $0x10] sm:$0xff] %vm1625_vm3, %v1616_v8  ;;  %v1585_v22 = vpop.f32.mrf.mxu1 }
 0x1d6   : > { %v1586_v23 = vadd.f32 %v1585_v22, %v1560_v17 }
 0x1d8   : > { %v1608_v14 = vpop.f32.mrf.mxu2 }
 0x1d9   : > { %v1609_v16 = vadd.f32 %v1608_v14, %v1583_v10 }
 0x1db   : > { %v1619_v21 = vadd.f32 %v1609_v16, %v979_v13 }
 0x1dd   : > { %1629 = vst.msk [vmem:[#allocation2 + $0x28] sm:$0xff] %vm1625_vm3, %v1619_v21 }
 0x1e0   : > { %v1611_v25 = vpop.f32.mrf.mxu2 }
 0x1e1   : > { %v1612_v26 = vadd.f32 %v1611_v25, %v1586_v23  ;;  %1637 = sbr.rel (%p4950_p1) target bundleno = 2118 (0x846), region = 188 }
 0x1e3   : > { %v1622_v27 = vadd.f32 %v1612_v26, %v982_v24 }
 0x1e5   : > { %1633 = vst.msk [vmem:[#allocation2 + $0x40] sm:$0x3] %vm1632_vm4, %v1622_v27 }
 0x1e6   : > { %v1662_v29 = vld [vmem:[#allocation8 + $0x78] sm:$0xff]  ;;  %v1661_v31 = vld [vmem:[#allocation8 + $0x70] sm:$0xff]  ;;  %v1660_v34 = vld [vmem:[#allocation8 + $0x68] sm:$0xff]  ;;  %vm1937_vm5 = vcmask 1040384   ;;  %vm1781_vm6 = vcmask 1041408   ;;  %vm1777_vm7 = vcmask 146432  }
 0x1e7   : > { %v1678_v30 = vld [vmem:[#allocation8 + $0xf8] sm:$0xff]  ;;  %1692 = vmatpush.msra.mxu0 %v1662_v29  ;;  %v1677_v32 = vld [vmem:[#allocation8 + $0xf0] sm:$0xff]  ;;  %v1676_v35 = vld [vmem:[#allocation8 + $0xe8] sm:$0xff]  ;;  %vm1933_vm8 = vcmask 72704  }
 0x1e8   : > { %1718 = vmatpush.msra.mxu1 %v1678_v30  ;;  %v1659_v36 = vld [vmem:[#allocation8 + $0x60] sm:$0xff]  ;;  %v1658_v39 = vld [vmem:[#allocation8 + $0x58] sm:$0xff]  ;;  %v1657_v1 = vld [vmem:[#allocation8 + $0x50] sm:$0xff] }
 0x1e9   : > { %1693 = vmatpush.msra.mxu0 %v1661_v31  ;;  %v1675_v37 = vld [vmem:[#allocation8 + $0xe0] sm:$0xff]  ;;  %v1674_v42 = vld [vmem:[#allocation8 + $0xd8] sm:$0xff]  ;;  %v1673_v18 = vld [vmem:[#allocation8 + $0xd0] sm:$0xff] }
 0x1ea   : > { %1719 = vmatpush.msra.mxu1 %v1677_v32  ;;  %v1682_v43 = vld [vmem:[#allocation8 + $0x118] sm:$0xff]  ;;  %v1681_v44 = vld [vmem:[#allocation8 + $0x110] sm:$0xff]  ;;  %v1680_v45 = vld [vmem:[#allocation8 + $0x108] sm:$0xff] }
 0x1eb   : > { %1694 = vmatpush.msra.mxu0 %v1660_v34  ;;  %1756 = vmatpush.msra.mxu2 %v1682_v43  ;;  %v1656_v46 = vld [vmem:[#allocation8 + $0x48] sm:$0xff]  ;;  %v1679_v48 = vld [vmem:[#allocation8 + $0x100] sm:$0xff]  ;;  %v1640_v52 = vld [vmem:[#allocation2 + $0x10] sm:$0xff] }
 0x1ec   : > { %1720 = vmatpush.msra.mxu1 %v1676_v35  ;;  %v1672_v47 = vld [vmem:[#allocation8 + $0xc8] sm:$0xff]  ;;  %v1655_v50 = vld [vmem:[#allocation8 + $0x40] sm:$0xff]  ;;  %v1654_v53 = vld [vmem:[#allocation8 + $0x38] sm:$0xff] }
 0x1ed   : > { %1695 = vmatpush.msra.mxu0 %v1659_v36  ;;  %1757 = vmatpush.msra.mxu2 %v1681_v44  ;;  %v1671_v51 = vld [vmem:[#allocation8 + $0xc0] sm:$0xff]  ;;  %v1670_v55 = vld [vmem:[#allocation8 + $0xb8] sm:$0xff]  ;;  %v1653_v19 = vld [vmem:[#allocation8 + $0x30] sm:$0xff] }
 0x1ee   : > { %1721 = vmatpush.msra.mxu1 %v1675_v37  ;;  %v1669_v56 = vld [vmem:[#allocation8 + $0xb0] sm:$0xff]  ;;  %v1652_v38 = vld [vmem:[#allocation8 + $0x28] sm:$0xff]  ;;  %v1651_v59 = vld [vmem:[#allocation8 + $0x20] sm:$0xff] }
 0x1ef   : > { %1696 = vmatpush.msra.mxu0 %v1658_v39  ;;  %1758 = vmatpush.msra.mxu2 %v1680_v45  ;;  %v1668_v57 = vld [vmem:[#allocation8 + $0xa8] sm:$0xff]  ;;  %v1667_v60 = vld [vmem:[#allocation8 + $0xa0] sm:$0xff]  ;;  %v1643_v28 = vld [vmem:[#allocation2 + $0x28] sm:$0xff] }
 0x1f0   : > { %1722 = vmatpush.msra.mxu1 %v1674_v42  ;;  %v1650_v33 = vld [vmem:[#allocation8 + $0x18] sm:$0xff]  ;;  %v1649_v58 = vld [vmem:[#allocation8 + $0x10] sm:$0xff]  ;;  %v1648_v61 = vld [vmem:[#allocation8 + $0x8] sm:$0xff] }
 0x1f1   : > { %1697 = vmatpush.msra.mxu0 %v1657_v1  ;;  %1759 = vmatpush.msra.mxu2 %v1679_v48  ;;  %v1666_v41 = vld [vmem:[#allocation8 + $0x98] sm:$0xff]  ;;  %v1665_v62 = vld [vmem:[#allocation8 + $0x90] sm:$0xff]  ;;  %v1664_v63 = vld [vmem:[#allocation8 + $0x88] sm:$0xff] }
 0x1f2   : > { %1723 = vmatpush.msra.mxu1 %v1673_v18  ;;  %4951 = vmatmul.msk.f32.vlgmr.msra.gmra.mxu2 %vm1625_vm3, %v1640_v52  ;;  %v1647_v49 = vld [vmem:[#allocation8] sm:$0xff]  ;;  %v1638_v54 = vld [vmem:[#allocation2] sm:$0xff]  ;;  %v1639_v2 = vld [vmem:[#allocation2 + $0x8] sm:$0xff] }
 0x1f3   : > { %1698 = vmatpush.msra.mxu0 %v1656_v46  ;;  %v1663_v0 = vld [vmem:[#allocation8 + $0x80] sm:$0xff]  ;;  %v1646_v3 = vld [vmem:[#allocation2 + $0x40] sm:$0x3]  ;;  %v1644_v6 = vld [vmem:[#allocation2 + $0x30] sm:$0x3] }
 0x1f4   : > { %1724 = vmatpush.msra.mxu1 %v1672_v47  ;;  %v1641_v20 = vld [vmem:[#allocation2 + $0x18] sm:$0xff]  ;;  %v1642_v4 = vld [vmem:[#allocation2 + $0x20] sm:$0xff]  ;;  %v1848_v8 = vld [vmem:[#allocation12 + $0x158] sm:$0x1] }
 0x1f5   : > { %1699 = vmatpush.msra.mxu0 %v1655_v50  ;;  %v1645_v5 = vld [vmem:[#allocation2 + $0x38] sm:$0x3]  ;;  %v1838_v7 = vld [vmem:[#allocation12 + $0x108] sm:$0x1]  ;;  %v1773_v24 = vld [vmem:[#allocation9 + $0x10] sm:$0x3] }
 0x1f6   : > { %1725 = vmatpush.msra.mxu1 %v1671_v51  ;;  %v1845_v40 = vld [vmem:[#allocation12 + $0x140] sm:$0x1]  ;;  %4962 = vmatpush.msk.msrb.mxu2 %vm1937_vm5, %v1838_v7  ;;  %v1772_v27 = vld [vmem:[#allocation9 + $0x8] sm:$0xff]  ;;  %v1770_v35 = vld [vmem:[#allocation11] sm:$0x3f] }
 0x1f7   : > { %1700 = vmatpush.msra.mxu0 %v1654_v53  ;;  %v1771_v31 = vld [vmem:[#allocation9] sm:$0xff]  ;;  %v1835_v36 = vld [vmem:[#allocation12 + $0xf0] sm:$0x1]  ;;  %v1808_v39 = vld [vmem:[#allocation12 + $0x18] sm:$0xff] }
 0x1f8   : > { %1726 = vmatpush.msra.mxu1 %v1670_v55  ;;  %v1805_v37 = vld [vmem:[#allocation12] sm:$0xff]  ;;  %v1815_v42 = vld [vmem:[#allocation12 + $0x50] sm:$0xff]  ;;  %2103 = vmatpush.msrb.mxu2 %v1808_v39  ;;  %v1818_v43 = vld [vmem:[#allocation12 + $0x68] sm:$0xff] }
 0x1f9   : > { %1701 = vmatpush.msra.mxu0 %v1653_v19  ;;  %v1836_v1 = vld [vmem:[#allocation12 + $0xf8] sm:$0x1]  ;;  %v1849_v44 = vld [vmem:[#allocation12 + $0x160] sm:$0x1]  ;;  %v1806_v46 = vld [vmem:[#allocation12 + $0x8] sm:$0xff] }
 0x1fa   : > { %1727 = vmatpush.msra.mxu1 %v1669_v56  ;;  %4952 = vmatmul.msk.f32.gmra.mxu2 %vm1625_vm3, %v1643_v28  ;;  %v1840_v18 = vld [vmem:[#allocation12 + $0x118] sm:$0x1]  ;;  %v1810_v47 = vld [vmem:[#allocation12 + $0x28] sm:$0xff]  ;;  %v1819_v48 = vld [vmem:[#allocation12 + $0x70] sm:$0xff] }
 0x1fb   : > { %1702 = vmatpush.msra.mxu0 %v1652_v38  ;;  %4966 = vmatpush.msk.msra.mxu2 %vm1937_vm5, %v1840_v18  ;;  %v1852_v45 = vld [vmem:[#allocation12 + $0x178] sm:$0x1]  ;;  %v1822_v50 = vld [vmem:[#allocation12 + $0x88] sm:$0xff]  ;;  %v1837_v52 = vld [vmem:[#allocation12 + $0x100] sm:$0x1] }
 0x1fc   : > { %1728 = vmatpush.msra.mxu1 %v1668_v57  ;;  %v1842_v53 = vld [vmem:[#allocation12 + $0x128] sm:$0x1]  ;;  %v1853_v55 = vld [vmem:[#allocation12 + $0x180] sm:$0x1]  ;;  %v1856_v19 = vld [vmem:[#allocation12 + $0x198] sm:$0x1] }
 0x1fd   : > { %1703 = vmatpush.msra.mxu0 %v1651_v59  ;;  %2143 = vmatpush.msra.mxu2 %v1810_v47  ;;  %v1807_v56 = vld [vmem:[#allocation12 + $0x10] sm:$0xff]  ;;  %v1812_v38 = vld [vmem:[#allocation12 + $0x38] sm:$0xff]  ;;  %v1826_v59 = vld [vmem:[#allocation12 + $0xa8] sm:$0xff] }
 0x1fe   : > { %1729 = vmatpush.msra.mxu1 %v1667_v60  ;;  %v1823_v57 = vld [vmem:[#allocation12 + $0x90] sm:$0xff]  ;;  %v1846_v28 = vld [vmem:[#allocation12 + $0x148] sm:$0x1]  ;;  %v1813_v7 = vld [vmem:[#allocation12 + $0x40] sm:$0xff] }
 0x1ff   : > { %1704 = vmatpush.msra.mxu0 %v1650_v33  ;;  %v1839_v60 = vld [vmem:[#allocation12 + $0x110] sm:$0x1]  ;;  %v1857_v33 = vld [vmem:[#allocation12 + $0x1a0] sm:$0x1]  ;;  %v7472_v18 = vld [vmem:[#allocation15 + $0x18] sm:$0xff] }
 0x200   : > { %1730 = vmatpush.msra.mxu1 %v1666_v41  ;;  %v1860_v41 = vld [vmem:[#allocation12 + $0x1b8] sm:$0x1]  ;;  %v7466_v39 = vld [vmem:[#allocation15 + $0x20] sm:$0xff]  ;;  %v7478_v47 = vld [vmem:[#allocation15 + $0x10] sm:$0xff] }
 0x201   : > { %1705 = vmatpush.msra.mxu0 %v1649_v58  ;;  %v1809_v58 = vld [vmem:[#allocation12 + $0x20] sm:$0xff] }
 0x202   : > { %1731 = vmatpush.msra.mxu1 %v1665_v62  ;;  %4953 = vmatmul.msk.f32.gmra.mxu2 %vm1625_vm3, %v1646_v3  ;;  %v1816_v62 = vld [vmem:[#allocation12 + $0x58] sm:$0xff]  ;;  %v1811_v3 = vld [vmem:[#allocation12 + $0x30] sm:$0xff] }
 0x203   : > { %1706 = vmatpush.msra.mxu0 %v1648_v61  ;;  %v1827_v61 = vld [vmem:[#allocation12 + $0xb0] sm:$0xff] }
 0x204   : > { %1732 = vmatpush.msra.mxu1 %v1664_v63  ;;  %v1830_v63 = vld [vmem:[#allocation12 + $0xc8] sm:$0xff] }
 0x205   : > { %1707 = vmatpush.msra.mxu0 %v1647_v49  ;;  %v1841_v49 = vld [vmem:[#allocation12 + $0x120] sm:$0x1] }
 0x206   : > { %1733 = vmatpush.msra.mxu1 %v1663_v0  ;;  %1708 = vmatmul.f32.vlgmr.msra.gmra.mxu0 %v1638_v54  ;;  %v1850_v0 = vld [vmem:[#allocation12 + $0x168] sm:$0x1]  ;;  %v1861_v54 = vld [vmem:[#allocation12 + $0x1c0] sm:$0x1] }
 0x207   : > { %1734 = vmatmul.f32.vlgmr.msra.gmra.mxu1 %v1639_v2  ;;  %4982 = vmatpush.msk.msrb.mxu0 %vm1937_vm5, %v1848_v8  ;;  %v1864_v2 = vld [vmem:[#allocation12 + $0x1d8] sm:$0x1] }
 0x208   : > { %4976 = vmatpush.msk.msrb.mxu1 %vm1937_vm5, %v1845_v40  ;;  %v1824_v40 = vld [vmem:[#allocation12 + $0x98] sm:$0xff] }
 0x209   : > { %2303 = vmatpush.msrb.mxu0 %v1818_v43  ;;  %v1844_v8 = vld [vmem:[#allocation12 + $0x138] sm:$0x1]  ;;  %v5401_v43 = vld [vmem:[#allocation15 + $0xb0] sm:$0xff] }
 0x20a   : > { %2243 = vmatpush.msrb.mxu1 %v1815_v42  ;;  %v7468_v42 = vld [vmem:[#allocation15 + $0x60] sm:$0xff] }
 0x20b   : > { %4990 = vmatpush.msk.msra.mxu0 %vm1937_vm5, %v1852_v45  ;;  %v5400_v45 = vld [vmem:[#allocation15 + $0xa8] sm:$0xff] }
 0x20c   : > { %4984 = vmatpush.msk.msra.mxu1 %vm1937_vm5, %v1849_v44  ;;  %v7474_v44 = vld [vmem:[#allocation15 + $0x58] sm:$0xff] }
 0x20d   : > { %2383 = vmatpush.msra.mxu0 %v1822_v50  ;;  %v5399_v50 = vld [vmem:[#allocation15 + $0xa0] sm:$0xff] }
 0x20e   : > { %1711 = vmatmul.f32.gmra.mxu0 %v1641_v20  ;;  %2323 = vmatpush.msra.mxu1 %v1819_v48  ;;  %v1820_v20 = vld [vmem:[#allocation12 + $0x78] sm:$0xff]  ;;  %v7480_v48 = vld [vmem:[#allocation15 + $0x50] sm:$0xff] }
 0x20f   : > { %1737 = vmatmul.f32.gmra.mxu1 %v1642_v4  ;;  %v1831_v4 = vld [vmem:[#allocation12 + $0xd0] sm:$0xff] }
 0x216   : > { %1714 = vmatmul.f32.gmra.mxu0 %v1644_v6  ;;  %v1834_v6 = vld [vmem:[#allocation12 + $0xe8] sm:$0xff] }
 0x217   : > { %1740 = vmatmul.f32.gmra.mxu1 %v1645_v5  ;;  %v1843_v5 = vld [vmem:[#allocation12 + $0x130] sm:$0x1] }
 0x275   : > { %v1761_v11 = vpop.f32.mrf.mxu2 }
 0x27d   : > { %v1764_v12 = vpop.f32.mrf.mxu2 }
 0x283   : > { %v1709_v9 = vpop.f32.mrf.mxu0 }
 0x284   : > { %v1735_v10 = vpop.f32.mrf.mxu1 }
 0x285   : > { %v1767_v16 = vpop.f32.mrf.mxu2  ;;  %v1736_v22 = vadd.f32 %v1735_v10, %v1709_v9  ;;  %v1858_v9 = vld [vmem:[#allocation12 + $0x1a8] sm:$0x1] }
 0x286   : > { %v1814_v10 = vld [vmem:[#allocation12 + $0x48] sm:$0xff] }
 0x287   : > { %v1762_v29 = vadd.f32 %v1761_v11, %v1736_v22  ;;  %v1854_v11 = vld [vmem:[#allocation12 + $0x188] sm:$0x1]  ;;  %v1855_v22 = vld [vmem:[#allocation12 + $0x190] sm:$0x1] }
 0x289   : > { %v1774_v34 = vmul.f32 %v1771_v31, %v1762_v29  ;;  %v1859_v29 = vld [vmem:[#allocation12 + $0x1b0] sm:$0x1] }
 0x28a   : > { %v1863_v31 = vld [vmem:[#allocation12 + $0x1d0] sm:$0x1] }
 0x28b   : > { %v1712_v13 = vpop.f32.mrf.mxu0 }
 0x28c   : > { %v1738_v14 = vpop.f32.mrf.mxu1 }
 0x28d   : > { %v1739_v15 = vadd.f32 %v1738_v14, %v1712_v13  ;;  %v1847_v13 = vld [vmem:[#allocation12 + $0x150] sm:$0x1]  ;;  %v1862_v14 = vld [vmem:[#allocation12 + $0x1c8] sm:$0x1] }
 0x28f   : > { %v1765_v25 = vadd.f32 %v1764_v12, %v1739_v15  ;;  %v1828_v12 = vld [vmem:[#allocation12 + $0xb8] sm:$0xff]  ;;  %v1817_v15 = vld [vmem:[#allocation12 + $0x60] sm:$0xff] }
 0x291   : > { %v1775_v32 = vmul.f32 %v1772_v27, %v1765_v25  ;;  %v7436_v25 = vld [vmem:[#allocation15 + $0x78] sm:$0xff]  ;;  %v7443_v27 = vld [vmem:[#allocation15 + $0x70] sm:$0xff] }
 0x293   : > { %v1715_v17 = vpop.f32.mrf.mxu0 }
 0x294   : > { %v1741_v21 = vpop.f32.mrf.mxu1 }
 0x295   : > { %v1742_v23 = vadd.f32 %v1741_v21, %v1715_v17  ;;  %v1851_v17 = vld [vmem:[#allocation12 + $0x170] sm:$0x1]  ;;  %v1821_v21 = vld [vmem:[#allocation12 + $0x80] sm:$0xff] }
 0x297   : > { %v1768_v26 = vadd.f32 %v1767_v16, %v1742_v23  ;;  %v1832_v16 = vld [vmem:[#allocation12 + $0xd8] sm:$0xff]  ;;  %v1825_v23 = vld [vmem:[#allocation12 + $0xa0] sm:$0xff] }
 0x299   : > { %v1776_v30 = vmul.f32 %v1773_v24, %v1768_v26  ;;  %v7434_v24 = vld [vmem:[#allocation15 + $0x38] sm:$0xff]  ;;  %v7441_v26 = vld [vmem:[#allocation15 + $0x30] sm:$0xff] }
 0x29b   : > { %4954 = vmatpush.msk.msra.mxu3 %vm1781_vm6, %v1776_v30  ;;  %v1829_v30 = vld [vmem:[#allocation12 + $0xc0] sm:$0xff] }
 0x29d   : > { %1799 = vmatpush.msra.mxu3 %v1775_v32  ;;  %v1833_v32 = vld [vmem:[#allocation12 + $0xe0] sm:$0xff] }
 0x29f   : > { %1800 = vmatpush.msra.mxu3 %v1774_v34  ;;  %v7457_v34 = vld [vmem:[#allocation15 + $0x28] sm:$0xff] }
 0x2a0   : > { %4955 = vmatmul.msk.f32.vlgmr.msra.gmra.mxu3 %vm1777_vm7, %v1770_v35  ;;  %v7459_v35 = vld [vmem:[#allocation15 + $0x68] sm:$0xff] }
 0x2a1   : > { %4956 = vmatpush.msk.msrb.mxu3 %vm1937_vm5, %v1835_v36  ;;  %v7461_v36 = vld [vmem:[#allocation15 + $0xb8] sm:$0xff] }
 0x2a3   : > { %2043 = vmatpush.msrb.mxu3 %v1805_v37  ;;  %v5410_v37 = vld [vmem:[#allocation15 + $0xf8] sm:$0xff] }
 0x2a5   : > { %4958 = vmatpush.msk.msra.mxu3 %vm1937_vm5, %v1836_v1  ;;  %v5409_v1 = vld [vmem:[#allocation15 + $0xf0] sm:$0xff] }
 0x2a7   : > { %2063 = vmatpush.msra.mxu3 %v1806_v46  ;;  %v5408_v46 = vld [vmem:[#allocation15 + $0xe8] sm:$0xff] }
 0x323   : > { %v7361_v51 = vpop.f32.mrf.mxu3 }
 0x324   : > { %4957 = vmatmul.msk.f32.vlgmr.msrb.gmra.mxu3 %vm1933_vm8, %v7361_v51  ;;  %4963 = vmatmul.msk.f32.vlgmr.msrb.gmra.mxu2 %vm1933_vm8, %v7361_v51 }
 0x325   : > { %4977 = vmatmul.msk.f32.vlgmr.msrb.gmra.mxu1 %vm1933_vm8, %v7361_v51  ;;  %4983 = vmatmul.msk.f32.vlgmr.msrb.gmra.mxu0 %vm1933_vm8, %v7361_v51 }
 0x326   : > { %4960 = vmatpush.msk.msrb.mxu3 %vm1937_vm5, %v1837_v52  ;;  %4970 = vmatpush.msk.msrb.mxu2 %vm1937_vm5, %v1842_v53  ;;  %v7484_v52 = vld [vmem:[#allocation15 + $0x8] sm:$0xff] }
 0x327   : > { %4992 = vmatpush.msk.msrb.mxu1 %vm1937_vm5, %v1853_v55  ;;  %4998 = vmatpush.msk.msrb.mxu0 %vm1937_vm5, %v1856_v19  ;;  %v7486_v53 = vld [vmem:[#allocation15 + $0x48] sm:$0xff]  ;;  %v5398_v55 = vld [vmem:[#allocation15 + $0x98] sm:$0xff] }
 0x328   : > { %2083 = vmatpush.msrb.mxu3 %v1807_v56  ;;  %2183 = vmatpush.msrb.mxu2 %v1812_v38  ;;  %v5406_v19 = vld [vmem:[#allocation15 + $0xd8] sm:$0xff]  ;;  %v7490_v56 = vld [vmem:[#allocation15] sm:$0xff] }
 0x329   : > { %2403 = vmatpush.msrb.mxu1 %v1823_v57  ;;  %2463 = vmatpush.msrb.mxu0 %v1826_v59  ;;  %v7492_v38 = vld [vmem:[#allocation15 + $0x40] sm:$0xff]  ;;  %v5397_v57 = vld [vmem:[#allocation15 + $0x90] sm:$0xff] }
 0x32a   : > { %v5405_v59 = vld [vmem:[#allocation15 + $0xd0] sm:$0xff] }
 0x32c   : > { %4959 = vmatmul.msk.f32.vlgmr.msra.gmra.mxu3 %vm1933_vm8, %v7361_v51  ;;  %4967 = vmatmul.msk.f32.vlgmr.msra.gmra.mxu2 %vm1933_vm8, %v7361_v51 }
 0x32d   : > { %4985 = vmatmul.msk.f32.vlgmr.msra.gmra.mxu1 %vm1933_vm8, %v7361_v51  ;;  %4991 = vmatmul.msk.f32.vlgmr.msra.gmra.mxu0 %vm1933_vm8, %v7361_v51 }
 0x32e   : > { %4964 = vmatpush.msk.msra.mxu3 %vm1937_vm5, %v1839_v60  ;;  %4978 = vmatpush.msk.msra.mxu2 %vm1937_vm5, %v1846_v28  ;;  %v7496_v28 = vld [vmem:[#allocation14] sm:$0xff] }
 0x32f   : > { %5000 = vmatpush.msk.msra.mxu1 %vm1937_vm5, %v1857_v33  ;;  %5006 = vmatpush.msk.msra.mxu0 %vm1937_vm5, %v1860_v41  ;;  %v1873_v33 = vperm.slane %v7496_v28, 0 }
 0x330   : > { %2123 = vmatpush.msra.mxu3 %v1809_v58  ;;  %2263 = vmatpush.msra.mxu2 %v1816_v62  ;;  %v7499_v58 = vld [vmem:[#allocation15 + $0x138] sm:$0xff] }
 0x331   : > { %2483 = vmatpush.msra.mxu1 %v1827_v61  ;;  %2543 = vmatpush.msra.mxu0 %v1830_v63  ;;  %v7501_v62 = vld [vmem:[#allocation15 + $0x178] sm:$0xff]  ;;  %v1874_v63 = vperm.slane %v7496_v28, 1 }
 0x332   : > { %8752 = vst [vmem:[#allocation54_spill] sm:$0xff] %v7501_v62 }
 0x334   : > { %4961 = vmatmul.msk.f32.vlgmr.msrb.gmra.mxu3 %vm1933_vm8, %v7361_v51  ;;  %4971 = vmatmul.msk.f32.vlgmr.msrb.gmra.mxu2 %vm1933_vm8, %v7361_v51 }
 0x335   : > { %4993 = vmatmul.msk.f32.vlgmr.msrb.gmra.mxu1 %vm1933_vm8, %v7361_v51  ;;  %4999 = vmatmul.msk.f32.vlgmr.msrb.gmra.mxu0 %vm1933_vm8, %v7361_v51 }
 0x336   : > { %4968 = vmatpush.msk.msrb.mxu3 %vm1937_vm5, %v1841_v49  ;;  %4986 = vmatpush.msk.msrb.mxu2 %vm1937_vm5, %v1850_v0  ;;  %v5396_v49 = vld [vmem:[#allocation15 + $0x88] sm:$0xff] }
 0x337   : > { %5008 = vmatpush.msk.msrb.mxu1 %vm1937_vm5, %v1861_v54  ;;  %5014 = vmatpush.msk.msrb.mxu0 %vm1937_vm5, %v1864_v2  ;;  %v5404_v0 = vld [vmem:[#allocation15 + $0xc8] sm:$0xff]  ;;  %v7508_v2 = vld [vmem:[#allocation15 + $0x130] sm:$0xff] }
 0x338   : > { %2163 = vmatpush.msrb.mxu3 %v1811_v3  ;;  %2343 = vmatpush.msrb.mxu2 %v1820_v20  ;;  %8753 = vst [vmem:[#allocation55_spill] sm:$0xff] %v7508_v2  ;;  %v5425_v3 = vld [vmem:[#allocation15 + $0x170] sm:$0xff]  ;;  %v1876_v20 = vperm.slane %v7496_v28, 3 }
 0x339   : > { %2563 = vmatpush.msrb.mxu1 %v1831_v4  ;;  %2623 = vmatpush.msrb.mxu0 %v1834_v6  ;;  %v5395_v6 = vld [vmem:[#allocation15 + $0x80] sm:$0xff] }
 0x33c   : > { %4965 = vmatmul.msk.f32.vlgmr.msra.gmra.mxu3 %vm1933_vm8, %v7361_v51  ;;  %4979 = vmatmul.msk.f32.vlgmr.msra.gmra.mxu2 %vm1933_vm8, %v7361_v51 }
 0x33d   : > { %5001 = vmatmul.msk.f32.vlgmr.msra.gmra.mxu1 %vm1933_vm8, %v7361_v51  ;;  %5007 = vmatmul.msk.f32.vlgmr.msra.gmra.mxu0 %vm1933_vm8, %v7361_v51 }
 0x33e   : > { %4972 = vmatpush.msk.msra.mxu3 %vm1937_vm5, %v1843_v5  ;;  %4994 = vmatpush.msk.msra.mxu2 %vm1937_vm5, %v1854_v11  ;;  %v5403_v5 = vld [vmem:[#allocation15 + $0xc0] sm:$0xff] }
 0x33f   : > { %3922 = vmatpush.bf16.msra.mxu1 %v7434_v24  ;;  %3961 = vmatpush.bf16.msra.mxu0 %v5410_v37  ;;  %v5441_v37 = vld [vmem:[#allocation15 + $0x1f0] sm:$0xff] }
 0x340   : > { %2203 = vmatpush.msra.mxu3 %v1813_v7  ;;  %2423 = vmatpush.msra.mxu2 %v1824_v40  ;;  %v1875_v40 = vperm.slane %v7496_v28, 2 }
 0x343   : > { %3923 = vmatpush.bf16.msra.mxu1 %v7441_v26  ;;  %3962 = vmatpush.bf16.msra.mxu0 %v5409_v1 }
 0x344   : > { %4969 = vmatmul.msk.f32.vlgmr.msrb.gmra.mxu3 %vm1933_vm8, %v7361_v51  ;;  %4987 = vmatmul.msk.f32.vlgmr.msrb.gmra.mxu2 %vm1933_vm8, %v7361_v51 }
 0x345   : > { %5009 = vmatmul.msk.f32.vlgmr.msrb.gmra.mxu1 %vm1933_vm8, %v7361_v51  ;;  %5015 = vmatmul.msk.f32.vlgmr.msrb.gmra.mxu0 %vm1933_vm8, %v7361_v51 }
 0x346   : > { %4974 = vmatpush.msk.msrb.mxu3 %vm1937_vm5, %v1844_v8  ;;  %5002 = vmatpush.msk.msrb.mxu2 %vm1937_vm5, %v1858_v9 }
 0x347   : > { %3924 = vmatpush.bf16.msra.mxu1 %v7457_v34  ;;  %3963 = vmatpush.bf16.msra.mxu0 %v5408_v46 }
 0x348   : > { %2223 = vmatpush.msrb.mxu3 %v1814_v10  ;;  %2503 = vmatpush.msrb.mxu2 %v1828_v12 }
 0x34b   : > { %3925 = vmatpush.bf16.msra.mxu1 %v7466_v39 }
 0x34c   : > { %4973 = vmatmul.msk.f32.vlgmr.msra.gmra.mxu3 %vm1933_vm8, %v7361_v51  ;;  %4995 = vmatmul.msk.f32.vlgmr.msra.gmra.mxu2 %vm1933_vm8, %v7361_v51 }
 0x34d   : > { %4980 = vmatpush.msk.msra.mxu3 %vm1937_vm5, %v1847_v13  ;;  %5010 = vmatpush.msk.msra.mxu2 %vm1937_vm5, %v1862_v14  ;;  %v7522_v14 = vld [vmem:[#allocation15 + $0x128] sm:$0xff] }
 0x34e   : > { %8754 = vst [vmem:[#allocation56_spill] sm:$0xff] %v7522_v14 }
 0x34f   : > { %2283 = vmatpush.msra.mxu3 %v1817_v15  ;;  %2583 = vmatpush.msra.mxu2 %v1832_v16  ;;  %v5424_v15 = vld [vmem:[#allocation15 + $0x168] sm:$0xff]  ;;  %v5434_v16 = vld [vmem:[#allocation15 + $0x1b8] sm:$0xff] }
 0x350   : > { %3926 = vmatpush.bf16.msra.mxu1 %v7472_v18 }
 0x354   : > { %4975 = vmatmul.msk.f32.vlgmr.msrb.gmra.mxu3 %vm1933_vm8, %v7361_v51  ;;  %5003 = vmatmul.msk.f32.vlgmr.msrb.gmra.mxu2 %vm1933_vm8, %v7361_v51 }
 0x355   : > { %4988 = vmatpush.msk.msrb.mxu3 %vm1937_vm5, %v1851_v17  ;;  %3935 = vmatpush.bf16.msrb.mxu2 %v7436_v25  ;;  %v1878_v17 = vperm.slane %v7496_v28, 5 }
 0x356   : > { %3927 = vmatpush.bf16.msra.mxu1 %v7478_v47 }
 0x357   : > { %2363 = vmatpush.msrb.mxu3 %v1821_v21  ;;  %v5442_v21 = vld [vmem:[#allocation15 + $0x1f8] sm:$0xff] }
 0x359   : > { %3936 = vmatpush.bf16.msrb.mxu2 %v7443_v27 }
 0x35a   : > { %3928 = vmatpush.bf16.msra.mxu1 %v7484_v52 }
 0x35c   : > { %4981 = vmatmul.msk.f32.vlgmr.msra.gmra.mxu3 %vm1933_vm8, %v7361_v51  ;;  %5011 = vmatmul.msk.f32.vlgmr.msra.gmra.mxu2 %vm1933_vm8, %v7361_v51 }
 0x35d   : > { %4996 = vmatpush.msk.msra.mxu3 %vm1937_vm5, %v1855_v22  ;;  %3937 = vmatpush.bf16.msrb.mxu2 %v7459_v35 }
 0x35e   : > { %3929 = vmatpush.bf16.msra.mxu1 %v7490_v56 }
 0x35f   : > { %2443 = vmatpush.msra.mxu3 %v1825_v23  ;;  %v5415_v23 = vld [vmem:[#allocation15 + $0x120] sm:$0xff] }
 0x361   : > { %3938 = vmatpush.bf16.msrb.mxu2 %v7468_v42 }
 0x362   : > { %3974 = vmatpush.bf16.msrb.mxu1 %v7499_v58 }
 0x364   : > { %4989 = vmatmul.msk.f32.vlgmr.msrb.gmra.mxu3 %vm1933_vm8, %v7361_v51 }
 0x365   : > { %5004 = vmatpush.msk.msrb.mxu3 %vm1937_vm5, %v1859_v29  ;;  %3939 = vmatpush.bf16.msrb.mxu2 %v7474_v44  ;;  %v5423_v29 = vld [vmem:[#allocation15 + $0x160] sm:$0xff] }
 0x366   : > { %3975 = vmatpush.bf16.msrb.mxu1 %v7508_v2 }
 0x367   : > { %2523 = vmatpush.msrb.mxu3 %v1829_v30  ;;  %v5433_v30 = vld [vmem:[#allocation15 + $0x1b0] sm:$0xff] }
 0x369   : > { %3940 = vmatpush.bf16.msrb.mxu2 %v7480_v48 }
 0x36a   : > { %3976 = vmatpush.bf16.msrb.mxu1 %v7522_v14 }
 0x36c   : > { %4997 = vmatmul.msk.f32.vlgmr.msra.gmra.mxu3 %vm1933_vm8, %v7361_v51 }
 0x36d   : > { %5012 = vmatpush.msk.msra.mxu3 %vm1937_vm5, %v1863_v31  ;;  %3941 = vmatpush.bf16.msrb.mxu2 %v7486_v53 }
 0x36e   : > { %3977 = vmatpush.bf16.msrb.mxu1 %v5415_v23  ;;  %v5431_v23 = vld [vmem:[#allocation15 + $0x1a0] sm:$0xff] }
 0x36f   : > { %2603 = vmatpush.msra.mxu3 %v1833_v32 }
 0x371   : > { %3942 = vmatpush.bf16.msrb.mxu2 %v7492_v38 }
 0x374   : > { %5005 = vmatmul.msk.f32.vlgmr.msrb.gmra.mxu3 %vm1933_vm8, %v7361_v51 }
 0x375   : > { %3948 = vmatpush.bf16.msrb.mxu3 %v7461_v36  ;;  %3987 = vmatpush.bf16.msra.mxu2 %v7501_v62 }
 0x379   : > { %3949 = vmatpush.bf16.msrb.mxu3 %v5401_v43  ;;  %3988 = vmatpush.bf16.msra.mxu2 %v5425_v3 }
 0x37c   : > { %5013 = vmatmul.msk.f32.vlgmr.msra.gmra.mxu3 %vm1933_vm8, %v7361_v51  ;;  %v5407_v51 = vld [vmem:[#allocation15 + $0xe0] sm:$0xff] }
 0x37d   : > { %3950 = vmatpush.bf16.msrb.mxu3 %v5400_v45  ;;  %3964 = vmatpush.bf16.msra.mxu0 %v5407_v51  ;;  %v1880_v45 = vperm.slane %v7496_v28, 7 }
 0x37e   : > { %3989 = vmatpush.bf16.msra.mxu2 %v5424_v15 }
 0x381   : > { %3951 = vmatpush.bf16.msrb.mxu3 %v5399_v50  ;;  %3965 = vmatpush.bf16.msra.mxu0 %v5406_v19 }
 0x382   : > { %3990 = vmatpush.bf16.msra.mxu2 %v5423_v29 }
 0x385   : > { %3952 = vmatpush.bf16.msrb.mxu3 %v5398_v55  ;;  %3966 = vmatpush.bf16.msra.mxu0 %v5405_v59 }
 0x389   : > { %3953 = vmatpush.bf16.msrb.mxu3 %v5397_v57  ;;  %3967 = vmatpush.bf16.msra.mxu0 %v5404_v0  ;;  %v1877_v0 = vperm.slane %v7496_v28, 4 }
 0x38d   : > { %3954 = vmatpush.bf16.msrb.mxu3 %v5396_v49  ;;  %3968 = vmatpush.bf16.msra.mxu0 %v5403_v5  ;;  %v5422_v5 = vld [vmem:[#allocation15 + $0x158] sm:$0xff] }
 0x38e   : > { %3991 = vmatpush.bf16.msra.mxu2 %v5422_v5  ;;  %v5430_v5 = vld [vmem:[#allocation15 + $0x198] sm:$0xff] }
 0x391   : > { %3955 = vmatpush.bf16.msrb.mxu3 %v5395_v6  ;;  %4013 = vmatpush.bf16.msrb.mxu0 %v5442_v21  ;;  %v7551_v6 = vld [vmem:[#allocation15 + $0x118] sm:$0xff]  ;;  %v7569_v21 = vld [vmem:[#allocation15 + $0x110] sm:$0xff] }
 0x392   : > { %8755 = vst [vmem:[#allocation57_spill] sm:$0xff] %v7551_v6  ;;  %3978 = vmatpush.bf16.msrb.mxu1 %v7551_v6 }
 0x393   : > { %8756 = vst [vmem:[#allocation58_spill] sm:$0xff] %v7569_v21 }
 0x395   : > { %4000 = vmatpush.bf16.msra.mxu3 %v5434_v16  ;;  %4014 = vmatpush.bf16.msrb.mxu0 %v5441_v37 }
 0x396   : > { %3979 = vmatpush.bf16.msrb.mxu1 %v7569_v21 }
 0x399   : > { %4001 = vmatpush.bf16.msra.mxu3 %v5433_v30 }
 0x3a2   : > { %v2245_v49 = vpop.f32.mrf.mxu1 }
 0x3a7   : > { %v2045_v60 = vpop.f32.mrf.mxu3  ;;  %v2105_v61 = vpop.f32.mrf.mxu2 }
 0x3a8   : > { %v7506_v54 = vadd.f32 %v2045_v60, %v1873_v33  ;;  %v7515_v7 = vadd.f32 %v2105_v61, %v1876_v20  ;;  %v7540_v60 = vld [vmem:[#allocation14 + $0x8] sm:$0xff] }
 0x3a9   : > { %v1884_v30 = vperm.slane %v7540_v60, 3 }
 0x3aa   : > { %v5016_v11 = vmul.f32 -1.442695, %v7506_v54  ;;  %v5019_v12 = vmul.f32 -1.442695, %v7515_v7 }
 0x3ac   : > { %5713 = vpow2.f32 %v5016_v11  ;;  %v5432_v11 = vld [vmem:[#allocation15 + $0x1a8] sm:$0xff] }
 0x3ad   : > { %4002 = vmatpush.bf16.msra.mxu3 %v5432_v11  ;;  %v2305_v11 = vpop.f32.mrf.mxu0 }
 0x3af   : > { %v2065_v41 = vpop.f32.mrf.mxu3  ;;  %v2145_v10 = vpop.f32.mrf.mxu2 }
 0x3b0   : > { %v7511_v4 = vadd.f32 %v2065_v41, %v1874_v63  ;;  %v7527_v32 = vadd.f32 %v2145_v10, %v1878_v17  ;;  %v1883_v41 = vperm.slane %v7540_v60, 2 }
 0x3b1   : > { %4003 = vmatpush.bf16.msra.mxu3 %v5431_v23 }
 0x3b2   : > { %v5017_v8 = vmul.f32 -1.442695, %v7511_v4  ;;  %v5714_v31 = vpop.eup %5713  ;;  %v5021_v46 = vmul.f32 -1.442695, %v7527_v32 }
 0x3b3   : > { %v7529_v1 = vadd.f32 1.0, %v5714_v31  ;;  %v5439_v31 = vld [vmem:[#allocation15 + $0x1e0] sm:$0xff] }
 0x3b4   : > { %5715 = vpow2.f32 %v5017_v8  ;;  %v5440_v8 = vld [vmem:[#allocation15 + $0x1e8] sm:$0xff] }
 0x3b5   : > { %5717 = vpow2.f32 %v5019_v12  ;;  %4015 = vmatpush.bf16.msrb.mxu0 %v5440_v8  ;;  %4004 = vmatpush.bf16.msra.mxu3 %v5430_v5  ;;  %vm2753_vm9 = vweird.f32 %v7529_v1  ;;  %v5437_v5 = vld [vmem:[#allocation15 + $0x1d0] sm:$0xff] }
 0x3b7   : > { %v2085_v9 = vpop.f32.mrf.mxu3  ;;  %v2185_v50 = vpop.f32.mrf.mxu2 }
 0x3b8   : > { %v7520_v13 = vadd.f32 %v2085_v9, %v1875_v40  ;;  %v7536_v19 = vadd.f32 %v2185_v50, %v1880_v45  ;;  %v7555_v9 = vadd.f32 %v2245_v49, %v1883_v41  ;;  %v1886_v41 = vperm.slane %v7540_v60, 5 }
 0x3b9   : > { %4016 = vmatpush.bf16.msrb.mxu0 %v5439_v31  ;;  %v1879_v49 = vperm.slane %v7496_v28, 6 }
 0x3ba   : > { %v5018_v22 = vmul.f32 -1.442695, %v7520_v13  ;;  %v5716_v43 = vpop.eup %5715  ;;  %v5023_v33 = vmul.f32 -1.442695, %v7536_v19  ;;  %v5026_v37 = vmul.f32 -1.442695, %v7555_v9 }
 0x3bb   : > { %v5718_v51 = vpop.eup %5717  ;;  %v7533_v55 = vadd.f32 1.0, %v5716_v43 }
 0x3bc   : > { %5719 = vpow2.f32 %v5018_v22  ;;  %v7538_v57 = vadd.f32 1.0, %v5718_v51  ;;  %v5421_v22 = vld [vmem:[#allocation15 + $0x150] sm:$0xff] }
 0x3bd   : > { %5721 = vrcp.f32 %v7529_v1  ;;  %3992 = vmatpush.bf16.msra.mxu2 %v5421_v22  ;;  %v5438_v22 = vld [vmem:[#allocation15 + $0x1d8] sm:$0xff]  ;;  %vm2768_vm13 = vweird.f32 %v7533_v55 }
 0x3be   : > { %5723 = vpow2.f32 %v5021_v46  ;;  %4017 = vmatpush.bf16.msrb.mxu0 %v5438_v22  ;;  %vm2798_vm1 = vweird.f32 %v7538_v57 }
 0x3bf   : > { %5725 = vrcp.f32 %v7533_v55  ;;  %v2125_v20 = vpop.f32.mrf.mxu3  ;;  %v2265_v43 = vpop.f32.mrf.mxu2 }
 0x3c0   : > { %5727 = vrcp.f32 %v7538_v57  ;;  %v7559_v10 = vadd.f32 %v2125_v20, %v1877_v0  ;;  %v7586_v20 = vld [vmem:[#allocation15 + $0x148] sm:$0xff] }
 0x3c1   : > { %5729 = vpow2.f32 %v5023_v33  ;;  %v7580_v33 = vadd.f32 %v2265_v43, %v1884_v30  ;;  %8758 = vst [vmem:[#allocation60_spill] sm:$0xff] %v7586_v20  ;;  %3993 = vmatpush.bf16.msra.mxu2 %v7586_v20  ;;  %v7601_v43 = vadd.f32 %v2305_v11, %v1886_v41 }
 0x3c2   : > { %v5720_v59 = vpop.eup %5719  ;;  %v5020_v29 = vmul.f32 -1.442695, %v7559_v10  ;;  %4018 = vmatpush.bf16.msrb.mxu0 %v5437_v5 }
 0x3c3   : > { %v7546_v61 = vadd.f32 1.0, %v5720_v59  ;;  %v7548_v63 = vpop.eup %5721  ;;  %v5027_v30 = vmul.f32 -1.442695, %v7580_v33  ;;  %8759 = vst [vmem:[#allocation61_spill] sm:$0xff] %v7601_v43  ;;  %v7638_v5 = vmul.f32 -1.442695, %v7601_v43 }
 0x3c4   : > { %v5724_v3 = vpop.eup %5723  ;;  %v2749_v15 = vmul.f32 %v7548_v63, %v7529_v1  ;;  %vm2754_vm10 = vweird.f32 %v7548_v63 }
 0x3c5   : > { %v7553_v40 = vpop.eup %5725  ;;  %5731 = vrcp.f32 %v7546_v61  ;;  %v7567_v17 = vadd.f32 1.0, %v5724_v3  ;;  %v7584_v3 = vld [vmem:[#allocation15 + $0x108] sm:$0xff]  ;;  %vm7627_vm12 = vmor %vm2753_vm9, %vm2754_vm10  ;;  %vm2783_vm7 = vweird.f32 %v7546_v61 }
 0x3c6   : > { %v7561_v12 = vpop.eup %5727  ;;  %v2764_v16 = vmul.f32 %v7553_v40, %v7533_v55  ;;  %5733 = vpow2.f32 %v5020_v29  ;;  %v2750_v51 = vsub.f32 1.0, %v2749_v15  ;;  %8757 = vst [vmem:[#allocation59_spill] sm:$0xff] %v7584_v3  ;;  %3980 = vmatpush.bf16.msrb.mxu1 %v7584_v3  ;;  %vm2769_vm11 = vweird.f32 %v7553_v40 }
 0x3c7   : > { %v5730_v45 = vpop.eup %5729  ;;  %v2794_v46 = vmul.f32 %v7561_v12, %v7538_v57  ;;  %5735 = vrcp.f32 %v7567_v17  ;;  %v2165_v0 = vpop.f32.mrf.mxu3  ;;  %v2774_v3 = vand.u32 2147483648, %v7533_v55  ;;  %vm7643_vm14 = vmor %vm2768_vm13, %vm2769_vm11  ;;  %vm2799_vm15 = vweird.f32 %v7561_v12 }
 0x3c8   : > { %v2765_v59 = vsub.f32 1.0, %v2764_v16  ;;  %5737 = vpow2.f32 %v5026_v37  ;;  %v7590_v16 = vadd.f32 1.0, %v5730_v45  ;;  %v2751_v23 = vmul.f32 %v7548_v63, %v2750_v51  ;;  %v7607_v51 = vld [vmem:[#allocation15 + $0x140] sm:$0xff]  ;;  %vm7662_vm5 = vmor %vm2798_vm1, %vm2799_vm15 }
 0x3c9   : > { %v2795_v8 = vsub.f32 1.0, %v2794_v46  ;;  %v7597_v31 = vadd.f32 %v2165_v0, %v1879_v49  ;;  %v2759_v45 = vand.u32 2147483648, %v7529_v1  ;;  %v7605_v46 = vld [vmem:[#allocation15 + $0x100] sm:$0xff]  ;;  %8761 = vst [vmem:[#allocation63_spill] sm:$0xff] %v7607_v51  ;;  %3994 = vmatpush.bf16.msra.mxu2 %v7607_v51  ;;  %v5436_v51 = vld [vmem:[#allocation15 + $0x1c8] sm:$0xff]  ;;  %v2775_v2 = vor.u32 1.1754944e-38, %v2774_v3 }
 0x3ca   : > { %v2766_v29 = vmul.f32 %v7553_v40, %v2765_v59  ;;  %8760 = vst [vmem:[#allocation62_spill] sm:$0xff] %v7605_v46  ;;  %v5429_v59 = vld [vmem:[#allocation15 + $0x190] sm:$0xff]  ;;  %5739 = vrcp.f32 %v7590_v16  ;;  %v2752_v41 = vadd.f32 %v7548_v63, %v2751_v23  ;;  %3981 = vmatpush.bf16.msrb.mxu1 %v7605_v46  ;;  %v2804_v46 = vand.u32 2147483648, %v7538_v57  ;;  %4019 = vmatpush.bf16.msrb.mxu0 %v5436_v51 }
 0x3cb   : > { %v7577_v50 = vpop.eup %5731  ;;  %v2796_v49 = vmul.f32 %v7561_v12, %v2795_v8  ;;  %5741 = vpow2.f32 %v5027_v30  ;;  %4005 = vmatpush.bf16.msra.mxu3 %v5429_v59  ;;  %v5428_v30 = vld [vmem:[#allocation15 + $0x188] sm:$0xff]  ;;  %v2760_v14 = vor.u32 1.1754944e-38, %v2759_v45  ;;  %vm2828_vm10 = vweird.f32 %v7567_v17 }
 0x3cc   : > { %v2779_v15 = vmul.f32 %v7577_v50, %v7546_v61  ;;  %v5734_v28 = vpop.eup %5733  ;;  %v2767_v11 = vadd.f32 %v7553_v40, %v2766_v29  ;;  %v2757_v29 = vand.u32 2147483647, %v7529_v1  ;;  %vm2784_vm6 = vweird.f32 %v7577_v50 }
 0x3cd   : > { %v7599_v37 = vpop.eup %5735  ;;  %v7615_v20 = vadd.f32 1.0, %v5734_v28  ;;  %v2772_v28 = vand.u32 2147483647, %v7533_v55  ;;  %v2756_v55 = vsel %vm7627_vm12, %v7548_v63, %v2752_v41  ;;  %v2802_v63 = vand.u32 2147483647, %v7538_v57  ;;  %vm7686_vm9 = vmor %vm2783_vm7, %vm2784_vm6 }
 0x3ce   : > { %v2780_v0 = vsub.f32 1.0, %v2779_v15  ;;  %v5738_v22 = vpop.eup %5737  ;;  %v2824_v8 = vmul.f32 %v7599_v37, %v7567_v17  ;;  %v5022_v15 = vmul.f32 -1.442695, %v7597_v31  ;;  %v2771_v6 = vsel %vm7643_vm14, %v7553_v40, %v2767_v11 }
 0x3cf   : > { %5743 = vrcp.f32 %v7615_v20  ;;  %v7635_v59 = vadd.f32 1.0, %v5738_v22  ;;  %v2797_v22 = vadd.f32 %v7561_v12, %v2796_v49  ;;  %4006 = vmatpush.bf16.msra.mxu3 %v5428_v30  ;;  %vm2758_vm0 = vcmp.eq.f32.partialorder %v2757_v29, 8.507059e+37  ;;  %v5427_v49 = vld [vmem:[#allocation15 + $0x180] sm:$0xff] }
 0x3d0   : > { %v2781_v1 = vmul.f32 %v7577_v50, %v2780_v0  ;;  %v7656_v43 = vpop.eup %5739  ;;  %v2825_v62 = vsub.f32 1.0, %v2824_v8  ;;  %5745 = vpow2.f32 %v5022_v15  ;;  %vm2773_vm4 = vcmp.eq.f32.partialorder %v2772_v28, 8.507059e+37  ;;  %v5435_v0 = vld [vmem:[#allocation15 + $0x1c0] sm:$0xff]  ;;  %v2205_v15 = vpop.f32.mrf.mxu3 }
 0x3d1   : > { %v5742_v41 = vpop.eup %5741  ;;  %v2761_v23 = vsel %vm2758_vm0, %v2760_v14, %v2756_v55  ;;  %v2776_v21 = vsel %vm2773_vm4, %v2775_v2, %v2771_v6  ;;  %v2801_v57 = vsel %vm7662_vm5, %v7561_v12, %v2797_v22  ;;  %v2805_v51 = vor.u32 1.1754944e-38, %v2804_v46  ;;  %4020 = vmatpush.bf16.msrb.mxu0 %v5435_v0 }
 0x3d2   : > { %v2782_v3 = vadd.f32 %v7577_v50, %v2781_v1  ;;  %v2789_v14 = vand.u32 2147483648, %v7546_v61  ;;  %v2854_v11 = vmul.f32 %v7656_v43, %v7590_v16  ;;  %v2826_v8 = vmul.f32 %v7599_v37, %v2825_v62  ;;  %v2325_v62 = vpop.f32.mrf.mxu1 }
 0x3d3   : > { %v2787_v2 = vand.u32 2147483647, %v7546_v61  ;;  %4007 = vmatpush.bf16.msra.mxu3 %v5427_v49  ;;  %5747 = vrcp.f32 %v7635_v59  ;;  %v3198_v12 = vmul.f32 %v2761_v23, %v7506_v54  ;;  %vm2803_vm8 = vcmp.eq.f32.partialorder %v2802_v63, 8.507059e+37 }
 0x3d4   : > { %v3199_v46 = vmul.f32 %v2776_v21, %v7511_v4  ;;  %v2806_v29 = vsel %vm2803_vm8, %v2805_v51, %v2801_v57  ;;  %v2786_v28 = vsel %vm7686_vm9, %v7577_v50, %v2782_v3  ;;  %v7693_v1 = vadd.f32 1.0, %v5742_v41 }
 0x3d5   : > { %v7668_v45 = vpop.eup %5743  ;;  %vm2829_vm11 = vweird.f32 %v7599_v37  ;;  %v2790_v54 = vor.u32 1.1754944e-38, %v2789_v14  ;;  %v2855_v4 = vsub.f32 1.0, %v2854_v11  ;;  %v2827_v55 = vadd.f32 %v7599_v37, %v2826_v8 }
 0x3d6   : > { %v2809_v6 = vmul.f32 %v7668_v45, %v7615_v20  ;;  %v5746_v61 = vpop.eup %5745  ;;  %vm2788_vm12 = vcmp.eq.f32.partialorder %v2787_v2, 8.507059e+37  ;;  %v7701_v49 = vpack.c.bf16 %v3199_v46, %v3198_v12  ;;  %v2834_v50 = vand.u32 2147483648, %v7567_v17  ;;  %vm7715_vm14 = vmor %vm2828_vm10, %vm2829_vm11 }
 0x3d7   : > { %v7699_v63 = vadd.f32 1.0, %v5746_v61  ;;  %v2791_v0 = vsel %vm2788_vm12, %v2790_v54, %v2786_v28  ;;  %vm2814_vm13 = vweird.f32 %v7668_v45  ;;  %v2832_v41 = vand.u32 2147483647, %v7567_v17 }
 0x3d8   : > { %v2810_v30 = vsub.f32 1.0, %v2809_v6  ;;  %v2819_v40 = vand.u32 2147483648, %v7615_v20  ;;  %5749 = vrcp.f32 %v7693_v1  ;;  %v2856_v57 = vmul.f32 %v7656_v43, %v2855_v4 }
 0x3d9   : > { %v7709_v21 = vpop.eup %5747  ;;  %vm2813_vm15 = vweird.f32 %v7615_v20  ;;  %v2817_v51 = vand.u32 2147483647, %v7615_v20  ;;  %5751 = vrcp.f32 %v7699_v63  ;;  %v1887_v14 = vperm.slane %v7540_v60, 6 }
 0x3da   : > { %v2811_v22 = vmul.f32 %v7668_v45, %v2810_v30  ;;  %v2831_v11 = vsel %vm7715_vm14, %v7599_v37, %v2827_v55  ;;  %v3200_v17 = vmul.f32 %v2791_v0, %v7520_v13  ;;  %vm7728_vm0 = vmor %vm2813_vm15, %vm2814_vm13  ;;  %v1881_v2 = vperm.slane %v7540_v60, 0 }
 0x3db   : > { %5753 = vpow2.f32 %v7638_v5  ;;  %v3412_v20 = vunpack.c.l.b16 %v7701_v49  ;;  %v2835_v6 = vor.u32 1.1754944e-38, %v2834_v50  ;;  %v3201_v46 = vmul.f32 %v2806_v29, %v7515_v7  ;;  %v2225_v5 = vpop.f32.mrf.mxu3  ;;  %v7747_v7 = vld [vmem:[#allocation15 + $0x238] sm:$0xff] }
 0x3dc   : > { %v2812_v23 = vadd.f32 %v7668_v45, %v2811_v22  ;;  %vm2833_vm1 = vcmp.eq.f32.partialorder %v2832_v41, 8.507059e+37  ;;  %v2862_v13 = vand.u32 2147483647, %v7590_v16  ;;  %v2820_v37 = vor.u32 1.1754944e-38, %v2819_v40 }
 0x3dd   : > { %v2836_v61 = vsel %vm2833_vm1, %v2835_v6, %v2831_v11  ;;  %v2857_v28 = vadd.f32 %v7656_v43, %v2856_v57  ;;  %vm2859_vm4 = vweird.f32 %v7656_v43  ;;  %vm2818_vm5 = vcmp.eq.f32.partialorder %v2817_v51, 8.507059e+37 }
 0x3de   : > { %v2816_v12 = vsel %vm7728_vm0, %v7668_v45, %v2812_v23  ;;  %v7742_v30 = vpop.eup %5749  ;;  %v3229_v54 = vpack.c.bf16 %v3201_v46, %v3200_v17  ;;  %vm2858_vm6 = vweird.f32 %v7590_v16  ;;  %v7745_v4 = vadd.f32 %v2205_v15, %v1881_v2 }
 0x3df   : > { %v2821_v45 = vsel %vm2818_vm5, %v2820_v37, %v2816_v12  ;;  %v5752_v29 = vpop.eup %5751  ;;  %v3413_v55 = vunpack.c.h.b16 %v7701_v49  ;;  %v2864_v22 = vand.u32 2147483648, %v7590_v16  ;;  %v1888_v50 = vperm.slane %v7540_v60, 7  ;;  %vm7761_vm7 = vmor %vm2858_vm6, %vm2859_vm4  ;;  %v2345_v16 = vpop.f32.mrf.mxu2 }
 0x3e0   : > { %v3422_v0 = vpack.c.b16 %v3412_v20, %v3412_v20  ;;  %v7754_v41 = vmul.f32 %v7709_v21, %v7635_v59  ;;  %v7756_v23 = vadd.f32 %v2325_v62, %v1887_v14  ;;  %v3203_v40 = vmul.f32 %v2836_v61, %v7527_v32  ;;  %v7780_v20 = vld [vmem:[#allocation15 + $0x278] sm:$0xff] }
 0x3e1   : > { %v2839_v49 = vmul.f32 %v5752_v29, %v7699_v63  ;;  %v7766_v3 = vpop.eup %5753  ;;  %v2861_v57 = vsel %vm7761_vm7, %v7656_v43, %v2857_v28  ;;  %vm7771_vm8 = vcmp.eq.f32.partialorder %v2862_v13, 8.507059e+37  ;;  %v3202_v32 = vmul.f32 %v2821_v45, %v7559_v10  ;;  %v7782_v43 = vld [vmem:[#allocation15 + $0x230] sm:$0xff] }
 0x3e2   : > { %v2914_v14 = vmul.f32 %v7742_v30, %v7693_v1  ;;  %3930 = vmatmul.bf16.vlgmr.msra.gmra.mxu1 %v3422_v0  ;;  %v3414_v11 = vunpack.c.l.b16 %v3229_v54  ;;  %v3415_v17 = vunpack.c.h.b16 %v3229_v54  ;;  %v5024_v2 = vmul.f32 -1.442695, %v7745_v4  ;;  %v7798_v0 = vld [vmem:[#allocation15 + $0x228] sm:$0xff] }
 0x3e3   : > { %v2840_v8 = vsub.f32 1.0, %v2839_v49  ;;  %4026 = vmatpush.bf16.msra.mxu1 %v7747_v7  ;;  %v2865_v6 = vor.u32 1.1754944e-38, %v2864_v22  ;;  %v2849_v12 = vand.u32 2147483648, %v7699_v63  ;;  %v7785_v46 = vadd.f32 %v2345_v16, %v1888_v50  ;;  %v2285_v16 = vpop.f32.mrf.mxu3 }
 0x3e4   : > { %v3423_v10 = vpack.c.b16 %v3413_v55, %v3413_v55  ;;  %vm2844_vm9 = vweird.f32 %v5752_v29  ;;  %v2847_v37 = vand.u32 2147483647, %v7699_v63  ;;  %5755 = vpow2.f32 %v5024_v2  ;;  %v7796_v55 = vld [vmem:[#allocation15 + $0x270] sm:$0xff]  ;;  %v7820_v2 = vld [vmem:[#allocation15 + $0x220] sm:$0xff] }
 0x3e5   : > { %v2841_v13 = vmul.f32 %v5752_v29, %v2840_v8  ;;  %v2866_v62 = vsel %vm7771_vm8, %v2865_v6, %v2861_v57  ;;  %v7790_v61 = vpack.c.bf16 %v3203_v40, %v3202_v32  ;;  %v2915_v28 = vsub.f32 1.0, %v2914_v14 }
 0x3e6   : > { %3943 = vmatmul.bf16.vlgmr.msrb.gmra.mxu2 %v3423_v10  ;;  %v1882_v54 = vperm.slane %v7540_v60, 1  ;;  %vm2843_vm10 = vweird.f32 %v7699_v63  ;;  %v3424_v22 = vpack.c.b16 %v3414_v11, %v3414_v11  ;;  %v3425_v50 = vpack.c.b16 %v3415_v17, %v3415_v17 }
 0x3e7   : > { %v2842_v45 = vadd.f32 %v5752_v29, %v2841_v13  ;;  %4039 = vmatpush.bf16.msrb.mxu2 %v7780_v20  ;;  %4027 = vmatpush.bf16.msra.mxu1 %v7782_v43  ;;  %v2900_v40 = vsub.f32 1.0, %v7754_v41  ;;  %vm2845_vm11 = vmor %vm2843_vm10, %vm2844_vm9  ;;  %v2850_v15 = vor.u32 1.1754944e-38, %v2849_v12  ;;  %v5031_v49 = vmul.f32 -1.442695, %v7785_v46 }
 0x3e8   : > { %vm2848_vm12 = vcmp.eq.f32.partialorder %v2847_v37, 8.507059e+37  ;;  %v7803_v63 = vadd.f32 %v2225_v5, %v1882_v54  ;;  %3956 = vmatmul.bf16.vlgmr.msrb.gmra.mxu3 %v3424_v22  ;;  %3969 = vmatmul.bf16.vlgmr.msra.gmra.mxu0 %v3425_v50  ;;  %v1885_v51 = vperm.slane %v7540_v60, 4  ;;  %v5030_v32 = vmul.f32 -1.442695, %v7756_v23  ;;  %v7816_v60 = vld [vmem:[#allocation15 + $0x268] sm:$0xff] }
 0x3e9   : > { %v2846_v57 = vsel %vm2845_vm11, %v5752_v29, %v2842_v45  ;;  %v3205_v14 = vmul.f32 %v2866_v62, %v7536_v19  ;;  %v3416_v41 = vunpack.c.l.b16 %v7790_v61  ;;  %4087 = vmatpush.bf16.msrb.mxu3 %v7434_v24  ;;  %4100 = vmatpush.bf16.msra.mxu0 %v7436_v25  ;;  %v2916_v29 = vmul.f32 %v7742_v30, %v2915_v28  ;;  %v7837_v62 = vld [vmem:[#allocation15 + $0x260] sm:$0xff] }
 0x3ea   : > { %v2851_v11 = vsel %vm2848_vm12, %v2850_v15, %v2846_v57  ;;  %v5756_v17 = vpop.eup %5755  ;;  %v5025_v8 = vmul.f32 -1.442695, %v7803_v63  ;;  %v7818_v19 = vadd.f32 %v2285_v16, %v1885_v51  ;;  %v2901_v24 = vmul.f32 %v7709_v21, %v2900_v40 }
 0x3eb   : > { %v3204_v5 = vmul.f32 %v2851_v11, %v7597_v31  ;;  %4040 = vmatpush.bf16.msrb.mxu2 %v7796_v55  ;;  %4028 = vmatpush.bf16.msra.mxu1 %v7798_v0  ;;  %5757 = vpow2.f32 %v5031_v49  ;;  %v7823_v25 = vadd.f32 1.0, %v5756_v17  ;;  %v3417_v12 = vunpack.c.h.b16 %v7790_v61  ;;  %v7839_v61 = vld [vmem:[#allocation15 + $0x218] sm:$0xff] }
 0x3ec   : > { %5759 = vpow2.f32 %v5025_v8  ;;  %v5028_v31 = vmul.f32 -1.442695, %v7818_v19  ;;  %v3426_v10 = vpack.c.b16 %v3416_v41, %v3416_v41  ;;  %v7831_v13 = vadd.f32 1.0, %v7766_v3  ;;  %v2385_v41 = vpop.f32.mrf.mxu0 }
 0x3ed   : > { %v3231_v6 = vpack.c.bf16 %v3205_v14, %v3204_v5  ;;  %5761 = vrcp.f32 %v7823_v25  ;;  %4088 = vmatpush.bf16.msrb.mxu3 %v7441_v26  ;;  %4101 = vmatpush.bf16.msra.mxu0 %v7443_v27  ;;  %v2917_v37 = vadd.f32 %v7742_v30, %v2916_v29  ;;  %vm2919_vm13 = vweird.f32 %v7742_v30  ;;  %v7843_v27 = vld [vmem:[#allocation14 + $0x10] sm:$0xff] }
 0x3ee   : > { %5763 = vpow2.f32 %v5030_v32  ;;  %v2902_v26 = vadd.f32 %v7709_v21, %v2901_v24  ;;  %vm2904_vm14 = vweird.f32 %v7709_v21  ;;  %vm2918_vm15 = vweird.f32 %v7693_v1  ;;  %v7872_v32 = vld [vmem:[#allocation15 + $0x210] sm:$0xff] }
 0x3ef   : > { %4041 = vmatpush.bf16.msrb.mxu2 %v7816_v60  ;;  %4029 = vmatpush.bf16.msra.mxu1 %v7820_v2  ;;  %v2924_v3 = vand.u32 2147483648, %v7693_v1  ;;  %v2922_v28 = vand.u32 2147483647, %v7693_v1  ;;  %v3418_v54 = vunpack.c.l.b16 %v3231_v6  ;;  %v3419_v45 = vunpack.c.h.b16 %v3231_v6  ;;  %vm7852_vm1 = vmor %vm2918_vm15, %vm2919_vm13 }
 0x3f0   : > { %5765 = vpow2.f32 %v5028_v31  ;;  %vm2903_vm0 = vweird.f32 %v7635_v59  ;;  %v2909_v50 = vand.u32 2147483648, %v7635_v59  ;;  %v3427_v15 = vpack.c.b16 %v3417_v12, %v3417_v12 }
 0x3f1   : > { %v5758_v22 = vpop.eup %5757  ;;  %4089 = vmatpush.bf16.msrb.mxu3 %v7457_v34  ;;  %vm7859_vm4 = vmor %vm2903_vm0, %vm2904_vm14  ;;  %v2907_v16 = vand.u32 2147483647, %v7635_v59  ;;  %v1890_v57 = vperm.slane %v7843_v27, 1  ;;  %v2921_v51 = vsel %vm7852_vm1, %v7742_v30, %v2917_v37  ;;  %v7870_v34 = vld [vmem:[#allocation15 + $0x258] sm:$0xff]  ;;  %5767 = vrcp.f32 %v7831_v13  ;;  %4102 = vmatpush.bf16.msra.mxu0 %v7459_v35  ;;  %v7895_v37 = vld [vmem:[#allocation15 + $0x208] sm:$0xff] }
 0x3f2   : > { %3982 = vmatmul.bf16.vlgmr.msrb.gmra.mxu1 %v3426_v10  ;;  %v5760_v49 = vpop.eup %5759  ;;  %v2906_v59 = vsel %vm7859_vm4, %v7709_v21, %v2902_v26  ;;  %v2925_v11 = vor.u32 1.1754944e-38, %v2924_v3  ;;  %vm2923_vm5 = vcmp.eq.f32.partialorder %v2922_v28, 8.507059e+37  ;;  %v3428_v5 = vpack.c.b16 %v3418_v54, %v3418_v54  ;;  %v7893_v10 = vld [vmem:[#allocation15 + $0x250] sm:$0xff] }
 0x3f3   : > { %4042 = vmatpush.bf16.msrb.mxu2 %v7837_v62  ;;  %4030 = vmatpush.bf16.msra.mxu1 %v7839_v61  ;;  %v7874_v14 = vpop.eup %5761  ;;  %v7880_v17 = vadd.f32 1.0, %v5760_v49  ;;  %v3429_v8 = vpack.c.b16 %v3419_v45, %v3419_v45  ;;  %v2910_v24 = vor.u32 1.1754944e-38, %v2909_v50  ;;  %v7885_v31 = vadd.f32 1.0, %v5758_v22  ;;  %v2365_v45 = vpop.f32.mrf.mxu3 }
 0x3f4   : > { %v5764_v30 = vpop.eup %5763  ;;  %v2869_v29 = vmul.f32 %v7874_v14, %v7823_v25  ;;  %v2926_v6 = vsel %vm2923_vm5, %v2925_v11, %v2921_v51  ;;  %vm2908_vm6 = vcmp.eq.f32.partialorder %v2907_v16, 8.507059e+37  ;;  %v7889_v12 = vadd.f32 %v2385_v41, %v1890_v57  ;;  %v2405_v16 = vpop.f32.mrf.mxu1 }
 0x3f5   : > { %5769 = vrcp.f32 %v7880_v17  ;;  %4090 = vmatpush.bf16.msrb.mxu3 %v7466_v39  ;;  %v2911_v26 = vsel %vm2908_vm6, %v2910_v24, %v2906_v59  ;;  %v1889_v28 = vperm.slane %v7843_v27, 0  ;;  %4103 = vmatpush.bf16.msra.mxu0 %v7468_v42  ;;  %v7901_v39 = vadd.f32 1.0, %v5764_v30  ;;  %v7914_v42 = vld [vmem:[#allocation15 + $0x248] sm:$0xff]  ;;  %v7938_v30 = vld [vmem:[#allocation15 + $0x240] sm:$0xff] }
 0x3f6   : > { %3995 = vmatmul.bf16.vlgmr.msra.gmra.mxu2 %v3427_v15  ;;  %v5766_v21 = vpop.eup %5765  ;;  %v2870_v35 = vsub.f32 1.0, %v2869_v29  ;;  %v3209_v54 = vmul.f32 %v2926_v6, %v7580_v33  ;;  %5771 = vrcp.f32 %v7885_v31  ;;  %v3208_v40 = vmul.f32 %v2911_v26, %v7555_v9 }
 0x3f7   : > { %4043 = vmatpush.bf16.msrb.mxu2 %v7870_v34  ;;  %4031 = vmatpush.bf16.msra.mxu1 %v7872_v32  ;;  %v7897_v3 = vadd.f32 1.0, %v5766_v21  ;;  %v7904_v22 = vpop.eup %5767  ;;  %v5033_v15 = vmul.f32 -1.442695, %v7889_v12  ;;  %v1891_v49 = vperm.slane %v7843_v27, 2  ;;  %v7919_v1 = vadd.f32 %v2365_v45, %v1889_v28 }
 0x3f8   : > { %4008 = vmatmul.bf16.vlgmr.msra.gmra.mxu3 %v3428_v5  ;;  %4021 = vmatmul.bf16.vlgmr.msrb.gmra.mxu0 %v3429_v8  ;;  %v2871_v50 = vmul.f32 %v7874_v14, %v2870_v35  ;;  %v2944_v9 = vmul.f32 %v7904_v22, %v7831_v13  ;;  %v7927_v57 = vpack.c.bf16 %v3209_v54, %v3208_v40  ;;  %vm2874_vm7 = vweird.f32 %v7874_v14  ;;  %v2425_v8 = vpop.f32.mrf.mxu2 }
 0x3f9   : > { %4091 = vmatpush.bf16.msrb.mxu3 %v7472_v18  ;;  %5773 = vrcp.f32 %v7897_v3  ;;  %4104 = vmatpush.bf16.msra.mxu0 %v7474_v44  ;;  %v7922_v18 = vld [vmem:[#allocation15 + $0x200] sm:$0xff]  ;;  %v2877_v44 = vand.u32 2147483647, %v7823_v25  ;;  %v2879_v41 = vand.u32 2147483648, %v7823_v25  ;;  %v1892_v11 = vperm.slane %v7843_v27, 3 }
 0x3fa   : > { %5775 = vrcp.f32 %v7901_v39  ;;  %v2872_v51 = vadd.f32 %v7874_v14, %v2871_v50  ;;  %v7942_v5 = vadd.f32 %v2405_v16, %v1891_v49  ;;  %vm2873_vm8 = vweird.f32 %v7823_v25 }
 0x3fb   : > { %4044 = vmatpush.bf16.msrb.mxu2 %v7893_v10  ;;  %4032 = vmatpush.bf16.msra.mxu1 %v7895_v37  ;;  %v7916_v33 = vpop.eup %5769  ;;  %5777 = vpow2.f32 %v5033_v15  ;;  %v2945_v21 = vsub.f32 1.0, %v2944_v9  ;;  %vm2949_vm9 = vweird.f32 %v7904_v22  ;;  %v4057_v35 = vunpack.c.l.b16 %v7927_v57  ;;  %vm7954_vm10 = vmor %vm2873_vm8, %vm2874_vm7 }
 0x3fc   : > { %v2884_v59 = vmul.f32 %v7916_v33, %v7880_v17  ;;  %v7940_v29 = vpop.eup %5771  ;;  %v2892_v25 = vand.u32 2147483647, %v7880_v17  ;;  %v2894_v28 = vand.u32 2147483648, %v7880_v17  ;;  %vm2889_vm11 = vweird.f32 %v7916_v33 }
 0x3fd   : > { %4092 = vmatpush.bf16.msrb.mxu3 %v7478_v47  ;;  %v5032_v47 = vmul.f32 -1.442695, %v7919_v1  ;;  %4105 = vmatpush.bf16.msra.mxu0 %v7480_v48  ;;  %v2876_v48 = vsel %vm7954_vm10, %v7874_v14, %v2872_v51  ;;  %vm2948_vm12 = vweird.f32 %v7831_v13  ;;  %vm2878_vm13 = vcmp.eq.f32.partialorder %v2877_v44, 8.507059e+37 }
 0x3fe   : > { %v2885_v24 = vsub.f32 1.0, %v2884_v59  ;;  %v2880_v40 = vor.u32 1.1754944e-38, %v2879_v41  ;;  %v7974_v15 = vadd.f32 %v2425_v8, %v1892_v11  ;;  %vm2888_vm14 = vweird.f32 %v7880_v17  ;;  %v7987_v41 = vld [vmem:[#allocation15 + $0xb0] sm:$0xff]  ;;  %vm8029_vm6 = vmor %vm2948_vm12, %vm2949_vm9 }
 0x3ff   : > { %4045 = vmatpush.bf16.msrb.mxu2 %v7914_v42  ;;  %4033 = vmatpush.bf16.msra.mxu1 %v7922_v18  ;;  %v7948_v6 = vpop.eup %5773  ;;  %5779 = vpow2.f32 %v5032_v47  ;;  %v2946_v16 = vmul.f32 %v7904_v22, %v2945_v21  ;;  %v4058_v51 = vunpack.c.h.b16 %v7927_v57  ;;  %vm2890_vm15 = vmor %vm2888_vm14, %vm2889_vm11  ;;  %v2895_v44 = vor.u32 1.1754944e-38, %v2894_v28 }
 0x400   : > { %v2886_v54 = vmul.f32 %v7916_v33, %v2885_v24  ;;  %v2929_v45 = vmul.f32 %v7948_v6, %v7897_v3  ;;  %v7969_v50 = vpop.eup %5775  ;;  %v2881_v59 = vsel %vm2878_vm13, %v2880_v40, %v2876_v48  ;;  %vm2893_vm0 = vcmp.eq.f32.partialorder %v2892_v25, 8.507059e+37 }
 0x401   : > { %4093 = vmatpush.bf16.msrb.mxu3 %v7484_v52  ;;  %v7979_v52 = vld [vmem:[#allocation15 + $0xf8] sm:$0xff]  ;;  %4106 = vmatpush.bf16.msra.mxu0 %v7486_v53  ;;  %v5778_v9 = vpop.eup %5777  ;;  %v2959_v17 = vmul.f32 %v7969_v50, %v7901_v39  ;;  %v4067_v57 = vpack.c.b16 %v4057_v35, %v4057_v35  ;;  %v5035_v24 = vmul.f32 -1.442695, %v7974_v15  ;;  %v3206_v21 = vmul.f32 %v2881_v59, %v7745_v4  ;;  %v8008_v4 = vld [vmem:[#allocation15 + $0xa8] sm:$0xff] }
 0x402   : > { %v2887_v14 = vadd.f32 %v7916_v33, %v2886_v54  ;;  %v2930_v49 = vsub.f32 1.0, %v2929_v45  ;;  %vm2934_vm1 = vweird.f32 %v7948_v6  ;;  %v5034_v35 = vmul.f32 -1.442695, %v7942_v5 }
 0x403   : > { %4113 = vmatpush.bf16.msrb.mxu1 %v7461_v36  ;;  %v2974_v36 = vmul.f32 %v7940_v29, %v7885_v31  ;;  %4046 = vmatpush.bf16.msrb.mxu2 %v7938_v30  ;;  %v4068_v25 = vpack.c.b16 %v4058_v51, %v4058_v51  ;;  %v2960_v54 = vsub.f32 1.0, %v2959_v17  ;;  %vm2933_vm4 = vweird.f32 %v7897_v3  ;;  %v8037_v17 = vld [vmem:[#allocation15 + $0xe8] sm:$0xff] }
 0x404   : > { %v2891_v11 = vsel %vm2890_vm15, %v7916_v33, %v2887_v14  ;;  %v2931_v53 = vmul.f32 %v7948_v6, %v2930_v49  ;;  %v8001_v33 = vld [vmem:[#allocation15 + $0xf0] sm:$0xff]  ;;  %v2954_v40 = vand.u32 2147483648, %v7831_v13  ;;  %v8016_v14 = vadd.f32 1.0, %v5778_v9  ;;  %vm8020_vm5 = vmor %vm2933_vm4, %vm2934_vm1 }
 0x405   : > { %4094 = vmatpush.bf16.msrb.mxu3 %v7490_v56  ;;  %v2975_v8 = vsub.f32 1.0, %v2974_v36  ;;  %v2896_v47 = vsel %vm2893_vm0, %v2895_v44, %v2891_v11  ;;  %4107 = vmatpush.bf16.msra.mxu0 %v7492_v38  ;;  %v2947_v56 = vadd.f32 %v7904_v22, %v2946_v16  ;;  %v5780_v48 = vpop.eup %5779  ;;  %v2937_v38 = vand.u32 2147483647, %v7897_v3  ;;  %v8787_v16 = vld [vmem:[#allocation55_spill] sm:$0xff] }
 0x406   : > { %v3207_v26 = vmul.f32 %v2896_v47, %v7803_v63  ;;  %v2932_v28 = vadd.f32 %v7948_v6, %v2931_v53  ;;  %v8784_v63 = vld [vmem:[#allocation54_spill] sm:$0xff]  ;;  %v2952_v36 = vand.u32 2147483647, %v7831_v13  ;;  %5781 = vpow2.f32 %v5035_v24 }
 0x407   : > { %4126 = vmatpush.bf16.msra.mxu2 %v7979_v52  ;;  %4114 = vmatpush.bf16.msrb.mxu1 %v7987_v41  ;;  %v2976_v9 = vmul.f32 %v7940_v29, %v2975_v8  ;;  %v2951_v13 = vsel %vm8029_vm6, %v7904_v22, %v2947_v56  ;;  %5783 = vpow2.f32 %v5034_v35  ;;  %v8043_v53 = vadd.f32 1.0, %v5780_v48  ;;  %v8048_v8 = vld [vmem:[#allocation15 + $0x170] sm:$0xff]  ;;  %v8791_v22 = vld [vmem:[#allocation56_spill] sm:$0xff] }
 0x408   : > { %v3232_v45 = vpack.c.bf16 %v3207_v26, %v3206_v21  ;;  %4095 = vmatmul.bf16.vlgmr.msrb.gmra.mxu3 %v4067_v57  ;;  %4108 = vmatmul.bf16.vlgmr.msra.gmra.mxu0 %v4068_v25  ;;  %v2936_v44 = vsel %vm8020_vm5, %v7948_v6, %v2932_v28  ;;  %v8045_v57 = vld [vmem:[#allocation15 + $0xa0] sm:$0xff]  ;;  %8790 = vst [vmem:[#allocation54_spill] sm:$0xff] %v8048_v8  ;;  %vm2938_vm7 = vcmp.eq.f32.partialorder %v2937_v38, 8.507059e+37  ;;  %v2955_v21 = vor.u32 1.1754944e-38, %v2954_v40  ;;  %v8069_v38 = vld [vmem:[#allocation15 + $0x168] sm:$0xff] }
 0x409   : > { %4139 = vmatpush.bf16.msra.mxu3 %v7499_v58  ;;  %v2939_v58 = vand.u32 2147483648, %v7897_v3  ;;  %4152 = vmatpush.bf16.msrb.mxu0 %v8784_v63  ;;  %v2961_v6 = vmul.f32 %v7969_v50, %v2960_v54  ;;  %vm2953_vm8 = vcmp.eq.f32.partialorder %v2952_v36, 8.507059e+37  ;;  %5785 = vrcp.f32 %v8016_v14  ;;  %v8062_v63 = vld [vmem:[#allocation15 + $0x98] sm:$0xff]  ;;  %8792 = vst [vmem:[#allocation55_spill] sm:$0xff] %v8069_v38 }
 0x40a   : > { %v3420_v51 = vunpack.c.l.b16 %v3232_v45  ;;  %v3421_v59 = vunpack.c.h.b16 %v3232_v45  ;;  %v2977_v28 = vadd.f32 %v7940_v29, %v2976_v9  ;;  %vm2979_vm9 = vweird.f32 %v7940_v29 }
 0x40b   : > { %4127 = vmatpush.bf16.msra.mxu2 %v8001_v33  ;;  %4115 = vmatpush.bf16.msrb.mxu1 %v8008_v4  ;;  %v2940_v11 = vor.u32 1.1754944e-38, %v2939_v58  ;;  %v2956_v35 = vsel %vm2953_vm8, %v2955_v21, %v2951_v13  ;;  %vm2964_vm10 = vweird.f32 %v7969_v50  ;;  %v2984_v25 = vand.u32 2147483648, %v7885_v31  ;;  %v8059_v58 = vld [vmem:[#allocation15 + $0xe0] sm:$0xff]  ;;  %v2465_v13 = vpop.f32.mrf.mxu0 }
 0x40c   : > { %v3430_v24 = vpack.c.b16 %v3420_v51, %v3420_v51  ;;  %v3431_v47 = vpack.c.b16 %v3421_v59, %v3421_v59  ;;  %v5782_v56 = vpop.eup %5781  ;;  %5787 = vrcp.f32 %v8043_v53  ;;  %v2962_v48 = vadd.f32 %v7969_v50, %v2961_v6 }
 0x40d   : > { %4140 = vmatpush.bf16.msra.mxu3 %v8787_v16  ;;  %4153 = vmatpush.bf16.msrb.mxu0 %v8048_v8  ;;  %v2941_v26 = vsel %vm2938_vm7, %v2940_v11, %v2936_v44  ;;  %vm2978_vm11 = vweird.f32 %v7885_v31  ;;  %v2982_v54 = vand.u32 2147483647, %v7885_v31  ;;  %v5784_v36 = vpop.eup %5783  ;;  %vm2963_vm12 = vweird.f32 %v7901_v39  ;;  %v8081_v31 = vld [vmem:[#allocation15 + $0x120] sm:$0xff]  ;;  %v8800_v16 = vld [vmem:[#allocation57_spill] sm:$0xff] }
 0x40e   : > { %4034 = vmatmul.bf16.vlgmr.msra.gmra.mxu1 %v3430_v24  ;;  %4047 = vmatmul.bf16.vlgmr.msrb.gmra.mxu2 %v3431_v47  ;;  %v3210_v45 = vmul.f32 %v2941_v26, %v7818_v19  ;;  %v2969_v40 = vand.u32 2147483648, %v7901_v39  ;;  %v1894_v49 = vperm.slane %v7843_v27, 5  ;;  %vm8077_vm13 = vmor %vm2978_vm11, %vm2979_vm9  ;;  %8795 = vst [vmem:[#allocation56_spill] sm:$0xff] %v8081_v31  ;;  %v8796_v19 = vld [vmem:[#allocation61_spill] sm:$0xff]  ;;  %v2967_v9 = vand.u32 2147483647, %v7901_v39 }
 0x40f   : > { %4128 = vmatpush.bf16.msra.mxu2 %v8037_v17  ;;  %4116 = vmatpush.bf16.msrb.mxu1 %v8045_v57  ;;  %v3211_v3 = vmul.f32 %v2956_v35, %v8796_v19  ;;  %v2981_v51 = vsel %vm8077_vm13, %v7940_v29, %v2977_v28  ;;  %v8089_v59 = vadd.f32 1.0, %v5782_v56  ;;  %vm8093_vm14 = vmor %vm2963_vm12, %vm2964_vm10  ;;  %v2985_v11 = vor.u32 1.1754944e-38, %v2984_v25  ;;  %v8098_v24 = vld [vmem:[#allocation15 + $0xd8] sm:$0xff]  ;;  %v8101_v39 = vld [vmem:[#allocation15 + $0x90] sm:$0xff]  ;;  %v8104_v29 = vpop.eup %5785 }
 0x410   : > { %v1893_v6 = vperm.slane %v7843_v27, 4  ;;  %v2966_v47 = vsel %vm8093_vm14, %v7969_v50, %v2962_v48  ;;  %v8109_v21 = vadd.f32 1.0, %v5784_v36  ;;  %vm2983_vm15 = vcmp.eq.f32.partialorder %v2982_v54, 8.507059e+37  ;;  %v8111_v28 = vld [vmem:[#allocation15 + $0x160] sm:$0xff]  ;;  %v8122_v54 = vld [vmem:[#allocation15 + $0xd0] sm:$0xff] }
 0x411   : > { %4141 = vmatpush.bf16.msra.mxu3 %v8791_v22  ;;  %4154 = vmatpush.bf16.msrb.mxu0 %v8069_v38  ;;  %v3234_v26 = vpack.c.bf16 %v3211_v3, %v3210_v45  ;;  %v2445_v22 = vpop.f32.mrf.mxu3  ;;  %8799 = vst [vmem:[#allocation61_spill] sm:$0xff] %v8111_v28  ;;  %v2970_v35 = vor.u32 1.1754944e-38, %v2969_v40  ;;  %v2986_v25 = vsel %vm2983_vm15, %v2985_v11, %v2981_v51  ;;  %vm2968_vm0 = vcmp.eq.f32.partialorder %v2967_v9, 8.507059e+37  ;;  %v8125_v45 = vld [vmem:[#allocation15 + $0x88] sm:$0xff]  ;;  %v8132_v3 = vld [vmem:[#allocation15 + $0x158] sm:$0xff] }
 0x412   : > { %v8114_v56 = vpop.eup %5787  ;;  %v8117_v19 = vadd.f32 %v2465_v13, %v1894_v49  ;;  %5789 = vrcp.f32 %v8089_v59  ;;  %v8120_v48 = vadd.f32 %v2445_v22, %v1893_v6  ;;  %v3213_v36 = vmul.f32 %v2986_v25, %v7785_v46  ;;  %8801 = vst [vmem:[#allocation57_spill] sm:$0xff] %v8132_v3  ;;  %v8802_v51 = vld [vmem:[#allocation58_spill] sm:$0xff]  ;;  %v2505_v6 = vpop.f32.mrf.mxu2  ;;  %v8143_v22 = vld [vmem:[#allocation15 + $0xc8] sm:$0xff]  ;;  %v8806_v38 = vld [vmem:[#allocation59_spill] sm:$0xff] }
 0x413   : > { %4129 = vmatpush.bf16.msra.mxu2 %v8059_v58  ;;  %4117 = vmatpush.bf16.msrb.mxu1 %v8062_v63  ;;  %v2971_v50 = vsel %vm2968_vm0, %v2970_v35, %v2966_v47  ;;  %5791 = vrcp.f32 %v8109_v21  ;;  %v4059_v40 = vunpack.c.l.b16 %v3234_v26  ;;  %v2989_v49 = vmul.f32 %v8114_v56, %v8043_v53  ;;  %v8146_v35 = vld [vmem:[#allocation15 + $0x80] sm:$0xff] }
 0x414   : > { %v3004_v9 = vmul.f32 %v8104_v29, %v8016_v14  ;;  %v3212_v44 = vmul.f32 %v2971_v50, %v7756_v23  ;;  %v5037_v13 = vmul.f32 -1.442695, %v8117_v19  ;;  %v1896_v11 = vperm.slane %v7843_v27, 7  ;;  %8803 = vst [vmem:[#allocation58_spill] sm:$0xff] %v8146_v35 }
 0x415   : > { %4142 = vmatpush.bf16.msra.mxu3 %v8081_v31  ;;  %4155 = vmatpush.bf16.msrb.mxu0 %v8111_v28  ;;  %v1895_v46 = vperm.slane %v7843_v27, 6  ;;  %v5036_v47 = vmul.f32 -1.442695, %v8120_v48  ;;  %v4069_v50 = vpack.c.b16 %v4059_v40, %v4059_v40  ;;  %v8154_v27 = vld [vmem:[#allocation15 + $0x1b8] sm:$0xff]  ;;  %v2485_v31 = vpop.f32.mrf.mxu1  ;;  %vm3009_vm1 = vweird.f32 %v8104_v29 }
 0x416   : > { %v3235_v23 = vpack.c.bf16 %v3213_v36, %v3212_v44  ;;  %8805 = vst [vmem:[#allocation65_spill] sm:$0xff] %v8154_v27  ;;  %v3005_v28 = vsub.f32 1.0, %v3004_v9  ;;  %5793 = vpow2.f32 %v5037_v13  ;;  %v8164_v36 = vld [vmem:[#allocation15 + $0xc0] sm:$0xff]  ;;  %v8170_v44 = vld [vmem:[#allocation15 + $0x1f8] sm:$0xff]  ;;  %vm2994_vm4 = vweird.f32 %v8114_v56 }
 0x417   : > { %4130 = vmatpush.bf16.msra.mxu2 %v8098_v24  ;;  %4118 = vmatpush.bf16.msrb.mxu1 %v8101_v39  ;;  %5795 = vpow2.f32 %v5036_v47  ;;  %8807 = vst [vmem:[#allocation59_spill] sm:$0xff] %v8164_v36  ;;  %v8167_v40 = vadd.f32 %v2485_v31, %v1895_v46  ;;  %v8809_v13 = vld [vmem:[#allocation60_spill] sm:$0xff]  ;;  %v8811_v31 = vld [vmem:[#allocation62_spill] sm:$0xff]  ;;  %vm2993_vm5 = vweird.f32 %v8043_v53  ;;  %vm3008_vm6 = vweird.f32 %v8016_v14 }
 0x418   : > { %v8149_v25 = vpop.eup %5789  ;;  %8808 = vst [vmem:[#allocation66_spill] sm:$0xff] %v8170_v44  ;;  %v4062_v47 = vunpack.c.h.b16 %v3235_v23  ;;  %vm8207_vm7 = vmor %vm2993_vm5, %vm2994_vm4  ;;  %vm3038_vm13 = vweird.f32 %v8089_v59  ;;  %vm3023_vm15 = vweird.f32 %v8109_v21 }
 0x419   : > { %4143 = vmatpush.bf16.msra.mxu3 %v8800_v16  ;;  %4156 = vmatpush.bf16.msrb.mxu0 %v8132_v3  ;;  %v4060_v16 = vunpack.c.h.b16 %v3234_v26  ;;  %v8151_v3 = vld [vmem:[#allocation15 + $0x150] sm:$0xff]  ;;  %v8158_v8 = vpop.eup %5791  ;;  %v3034_v26 = vmul.f32 %v8149_v25, %v8089_v59  ;;  %vm8214_vm8 = vmor %vm3008_vm6, %vm3009_vm1  ;;  %vm3039_vm11 = vweird.f32 %v8149_v25 }
 0x41a   : > { %8804 = vst [vmem:[#allocation64_spill] sm:$0xff] %v8151_v3  ;;  %vm3024_vm12 = vweird.f32 %v8158_v8  ;;  %vm8254_vm14 = vmor %vm3038_vm13, %vm3039_vm11 }
 0x41b   : > { %4131 = vmatpush.bf16.msra.mxu2 %v8122_v54  ;;  %4119 = vmatpush.bf16.msrb.mxu1 %v8125_v45  ;;  %v4070_v9 = vpack.c.b16 %v4060_v16, %v4060_v16  ;;  %v3012_v16 = vand.u32 2147483647, %v8016_v14  ;;  %vm8272_vm0 = vmor %vm3023_vm15, %vm3024_vm12 }
 0x41d   : > { %4144 = vmatpush.bf16.msra.mxu3 %v8802_v51  ;;  %v2990_v51 = vsub.f32 1.0, %v2989_v49  ;;  %4157 = vmatpush.bf16.msrb.mxu0 %v8151_v3  ;;  %v4061_v49 = vunpack.c.l.b16 %v3235_v23  ;;  %vm3013_vm9 = vcmp.eq.f32.partialorder %v3012_v16, 8.507059e+37  ;;  %v3042_v16 = vand.u32 2147483647, %v8089_v59 }
 0x41f   : > { %4132 = vmatpush.bf16.msra.mxu2 %v8143_v22  ;;  %4120 = vmatpush.bf16.msrb.mxu1 %v8146_v35  ;;  %v8160_v35 = vadd.f32 %v2505_v6, %v1896_v11  ;;  %v3006_v11 = vmul.f32 %v8104_v29, %v3005_v28  ;;  %v3019_v6 = vmul.f32 %v8158_v8, %v8109_v21  ;;  %v3035_v28 = vsub.f32 1.0, %v3034_v26 }
 0x420   : > { %v4071_v23 = vpack.c.b16 %v4061_v49, %v4061_v49  ;;  %v2999_v26 = vand.u32 2147483648, %v8043_v53  ;;  %v3014_v49 = vand.u32 2147483648, %v8016_v14  ;;  %vm3043_vm1 = vcmp.eq.f32.partialorder %v3042_v16, 8.507059e+37 }
 0x421   : > { %4145 = vmatpush.bf16.msra.mxu3 %v8806_v38  ;;  %v2991_v38 = vmul.f32 %v8114_v56, %v2990_v51  ;;  %4158 = vmatpush.bf16.msrb.mxu0 %v8809_v13  ;;  %v5039_v46 = vmul.f32 -1.442695, %v8160_v35  ;;  %v5794_v51 = vpop.eup %5793  ;;  %v5038_v13 = vmul.f32 -1.442695, %v8167_v40 }
 0x422   : > { %4121 = vmatmul.bf16.vlgmr.msrb.gmra.mxu1 %v4069_v50  ;;  %v8177_v50 = vld [vmem:[#allocation15 + $0x1b0] sm:$0xff] }
 0x423   : > { %4165 = vmatpush.bf16.msra.mxu1 %v8154_v27  ;;  %4133 = vmatpush.bf16.msra.mxu2 %v8164_v36  ;;  %8810 = vst [vmem:[#allocation60_spill] sm:$0xff] %v8177_v50  ;;  %v2992_v3 = vadd.f32 %v8114_v56, %v2991_v38  ;;  %v4072_v36 = vpack.c.b16 %v4062_v47, %v4062_v47  ;;  %v8194_v27 = vld [vmem:[#allocation15 + $0x1a8] sm:$0xff]  ;;  %5797 = vpow2.f32 %v5039_v46  ;;  %v2997_v38 = vand.u32 2147483647, %v8043_v53 }
 0x424   : > { %5799 = vpow2.f32 %v5038_v13  ;;  %v8223_v46 = vld [vmem:[#allocation15 + $0x1e8] sm:$0xff] }
 0x425   : > { %4146 = vmatpush.bf16.msra.mxu3 %v8811_v31  ;;  %v3007_v31 = vadd.f32 %v8104_v29, %v3006_v11  ;;  %v8202_v11 = vadd.f32 1.0, %v5794_v51  ;;  %v2996_v14 = vsel %vm8207_vm7, %v8114_v56, %v2992_v3  ;;  %v8230_v51 = vld [vmem:[#allocation15 + $0x1a0] sm:$0xff]  ;;  %v3015_v56 = vor.u32 1.1754944e-38, %v3014_v49 }
 0x426   : > { %4134 = vmatmul.bf16.vlgmr.msra.gmra.mxu2 %v4070_v9  ;;  %v8812_v9 = vld [vmem:[#allocation63_spill] sm:$0xff]  ;;  %vm2998_vm10 = vcmp.eq.f32.partialorder %v2997_v38, 8.507059e+37 }
 0x427   : > { %4178 = vmatpush.bf16.msrb.mxu2 %v8170_v44  ;;  %4166 = vmatpush.bf16.msra.mxu1 %v8177_v50  ;;  %v8188_v50 = vld [vmem:[#allocation15 + $0x1f0] sm:$0xff]  ;;  %v3020_v44 = vsub.f32 1.0, %v3019_v6  ;;  %v3036_v6 = vmul.f32 %v8149_v25, %v3035_v28  ;;  %v3000_v28 = vor.u32 1.1754944e-38, %v2999_v26  ;;  %5801 = vrcp.f32 %v8202_v11  ;;  %v8261_v38 = vld [vmem:[#allocation14 + $0x18] sm:$0x3f] }
 0x428   : > { %4159 = vmatpush.bf16.msrb.mxu0 %v8812_v9  ;;  %4147 = vmatmul.bf16.vlgmr.msra.gmra.mxu3 %v4071_v23  ;;  %v3044_v23 = vand.u32 2147483648, %v8089_v59  ;;  %v8240_v9 = vld [vmem:[#allocation15 + $0x1e0] sm:$0xff]  ;;  %v3027_v59 = vand.u32 2147483647, %v8109_v21  ;;  %v1900_v26 = vperm.slane %v8261_v38, 3 }
 0x429   : > { %4191 = vmatpush.bf16.msrb.mxu3 %v7747_v7  ;;  %v5796_v7 = vpop.eup %5795  ;;  %v3037_v3 = vadd.f32 %v8149_v25, %v3036_v6  ;;  %v3001_v13 = vsel %vm2998_vm10, %v3000_v28, %v2996_v14  ;;  %v8277_v14 = vld [vmem:[#allocation15 + $0x1d8] sm:$0xff] }
 0x42a   : > { %v8221_v53 = vadd.f32 1.0, %v5796_v7  ;;  %v8247_v7 = vld [vmem:[#allocation15 + $0x198] sm:$0xff]  ;;  %v3214_v49 = vmul.f32 %v3001_v13, %v7919_v1  ;;  %vm3028_vm4 = vcmp.eq.f32.partialorder %v3027_v59, 8.507059e+37  ;;  %v8318_v1 = vld [vmem:[#allocation15 + $0x1c8] sm:$0xff] }
 0x42b   : > { %4179 = vmatpush.bf16.msrb.mxu2 %v8188_v50  ;;  %4167 = vmatpush.bf16.msra.mxu1 %v8194_v27 }
 0x42c   : > { %4204 = vmatpush.bf16.msra.mxu0 %v7780_v20  ;;  %5803 = vrcp.f32 %v8221_v53  ;;  %v3045_v20 = vor.u32 1.1754944e-38, %v3044_v23  ;;  %vm3053_vm7 = vweird.f32 %v8221_v53 }
 0x42d   : > { %4160 = vmatmul.bf16.vlgmr.msrb.gmra.mxu0 %v4072_v36  ;;  %4192 = vmatpush.bf16.msrb.mxu3 %v7782_v43  ;;  %v3011_v43 = vsel %vm8214_vm8, %v8104_v29, %v3007_v31  ;;  %v3021_v36 = vmul.f32 %v8158_v8, %v3020_v44  ;;  %v5798_v29 = vpop.eup %5797  ;;  %v3029_v31 = vand.u32 2147483648, %v8109_v21  ;;  %v1897_v21 = vperm.slane %v8261_v38, 0 }
 0x42e   : > { %v3016_v44 = vsel %vm3013_vm9, %v3015_v56, %v3011_v43  ;;  %v8266_v6 = vadd.f32 1.0, %v5798_v29  ;;  %v2525_v43 = vpop.f32.mrf.mxu3  ;;  %vm3068_vm8 = vweird.f32 %v8202_v11 }
 0x42f   : > { %4180 = vmatpush.bf16.msrb.mxu2 %v8223_v46  ;;  %4168 = vmatpush.bf16.msra.mxu1 %v8230_v51  ;;  %v3215_v47 = vmul.f32 %v3016_v44, %v7889_v12  ;;  %v3030_v56 = vor.u32 1.1754944e-38, %v3029_v31  ;;  %v2545_v44 = vpop.f32.mrf.mxu0  ;;  %v8296_v23 = vadd.f32 %v2525_v43, %v1897_v21  ;;  %v8307_v31 = vld [vmem:[#allocation15 + $0x188] sm:$0xff]  ;;  %v2565_v21 = vpop.f32.mrf.mxu1 }
 0x430   : > { %4205 = vmatpush.bf16.msra.mxu0 %v7796_v55  ;;  %v3022_v55 = vadd.f32 %v8158_v8, %v3021_v36  ;;  %v8287_v36 = vld [vmem:[#allocation15 + $0x190] sm:$0xff]  ;;  %5805 = vrcp.f32 %v8266_v6  ;;  %vm3098_vm15 = vweird.f32 %v8266_v6 }
 0x431   : > { %4193 = vmatpush.bf16.msrb.mxu3 %v7798_v0  ;;  %v5800_v0 = vpop.eup %5799  ;;  %v3236_v29 = vpack.c.bf16 %v3215_v47, %v3214_v49  ;;  %v5040_v47 = vmul.f32 -1.442695, %v8296_v23 }
 0x432   : > { %v8285_v12 = vadd.f32 1.0, %v5800_v0 }
 0x433   : > { %4181 = vmatpush.bf16.msrb.mxu2 %v8240_v9  ;;  %4169 = vmatpush.bf16.msra.mxu1 %v8247_v7  ;;  %v4063_v49 = vunpack.c.l.b16 %v3236_v29  ;;  %v4064_v43 = vunpack.c.h.b16 %v3236_v29 }
 0x434   : > { %4206 = vmatpush.bf16.msra.mxu0 %v7816_v60  ;;  %v3041_v60 = vsel %vm8254_vm14, %v8149_v25, %v3037_v3  ;;  %v8280_v25 = vpop.eup %5801  ;;  %v1898_v3 = vperm.slane %v8261_v38, 1  ;;  %5807 = vrcp.f32 %v8285_v12 }
 0x435   : > { %4194 = vmatpush.bf16.msrb.mxu3 %v7820_v2  ;;  %v3026_v2 = vsel %vm8272_vm0, %v8158_v8, %v3022_v55  ;;  %v8291_v28 = vpop.eup %5803  ;;  %v3046_v13 = vsel %vm3043_vm1, %v3045_v20, %v3041_v60  ;;  %v8298_v55 = vld [vmem:[#allocation15 + $0x1d0] sm:$0xff]  ;;  %v2585_v60 = vpop.f32.mrf.mxu2  ;;  %5809 = vpow2.f32 %v5040_v47  ;;  %vm3069_vm5 = vweird.f32 %v8280_v25 }
 0x436   : > { %v3031_v8 = vsel %vm3028_vm4, %v3030_v56, %v3026_v2  ;;  %v3217_v16 = vmul.f32 %v3046_v13, %v7974_v15  ;;  %v3049_v0 = vmul.f32 %v8291_v28, %v8221_v53  ;;  %v1899_v15 = vperm.slane %v8261_v38, 2  ;;  %v8321_v20 = vpop.eup %5805  ;;  %v5872_v47 = vld [vmem:[#allocation15 + $0x30] sm:$0xff]  ;;  %vm8370_vm10 = vmor %vm3068_vm8, %vm3069_vm5 }
 0x437   : > { %4182 = vmatpush.bf16.msrb.mxu2 %v8277_v14  ;;  %4170 = vmatpush.bf16.msra.mxu1 %v8287_v36  ;;  %v3216_v59 = vmul.f32 %v3031_v8, %v7942_v5  ;;  %v8328_v5 = vadd.f32 %v2585_v60, %v1900_v26  ;;  %v4073_v13 = vpack.c.b16 %v4063_v49, %v4063_v49  ;;  %vm3054_vm6 = vweird.f32 %v8291_v28 }
 0x438   : > { %4207 = vmatpush.bf16.msra.mxu0 %v7837_v62  ;;  %v3064_v62 = vmul.f32 %v8280_v25, %v8202_v11  ;;  %v3050_v56 = vsub.f32 1.0, %v3049_v0  ;;  %v3094_v29 = vmul.f32 %v8321_v20, %v8266_v6  ;;  %v4074_v26 = vpack.c.b16 %v4064_v43, %v4064_v43  ;;  %v5873_v43 = vld [vmem:[#allocation15 + $0xb8] sm:$0xff]  ;;  %vm8363_vm9 = vmor %vm3053_vm7, %vm3054_vm6 }
 0x439   : > { %4195 = vmatpush.bf16.msrb.mxu3 %v7839_v61  ;;  %v8311_v61 = vadd.f32 %v2545_v44, %v1898_v3  ;;  %v3237_v2 = vpack.c.bf16 %v3217_v16, %v3216_v59  ;;  %v8323_v3 = vld [vmem:[#allocation15 + $0x180] sm:$0xff]  ;;  %v5869_v44 = vld [vmem:[#allocation15 + $0x38] sm:$0xff]  ;;  %vm3099_vm13 = vweird.f32 %v8321_v20  ;;  %vm3083_vm1 = vweird.f32 %v8285_v12 }
 0x43a   : > { %v8330_v8 = vpop.eup %5807  ;;  %v8337_v16 = vld [vmem:[#allocation15 + $0x1c0] sm:$0xff]  ;;  %v3051_v49 = vmul.f32 %v8291_v28, %v3050_v56  ;;  %v5871_v59 = vld [vmem:[#allocation15 + $0x78] sm:$0xff]  ;;  %vm8400_vm0 = vmor %vm3098_vm15, %vm3099_vm13 }
 0x43b   : > { %4183 = vmatpush.bf16.msrb.mxu2 %v8298_v55  ;;  %4171 = vmatpush.bf16.msra.mxu1 %v8307_v31  ;;  %v4065_v0 = vunpack.c.l.b16 %v3237_v2  ;;  %v4066_v60 = vunpack.c.h.b16 %v3237_v2  ;;  %v5874_v2 = vld [vmem:[#allocation15 + $0x70] sm:$0xff]  ;;  %vm3084_vm14 = vweird.f32 %v8330_v8 }
 0x43c   : > { %4208 = vmatpush.bf16.msra.mxu0 %v7870_v34  ;;  %v3065_v34 = vsub.f32 1.0, %v3064_v62  ;;  %v8333_v62 = vadd.f32 %v2565_v21, %v1899_v15  ;;  %v5043_v15 = vmul.f32 -1.442695, %v8328_v5  ;;  %v3095_v21 = vsub.f32 1.0, %v3094_v29  ;;  %v5875_v29 = vld [vmem:[#allocation15 + $0x28] sm:$0xff]  ;;  %vm8417_vm4 = vmor %vm3083_vm1, %vm3084_vm14 }
 0x43d   : > { %4196 = vmatpush.bf16.msrb.mxu3 %v7872_v32  ;;  %v5041_v32 = vmul.f32 -1.442695, %v8311_v61  ;;  %v4075_v56 = vpack.c.b16 %v4065_v0, %v4065_v0  ;;  %v3057_v0 = vand.u32 2147483647, %v8221_v53 }
 0x43f   : > { %4184 = vmatpush.bf16.msrb.mxu2 %v8318_v1  ;;  %4172 = vmatpush.bf16.msra.mxu1 %v8323_v3  ;;  %5811 = vpow2.f32 %v5041_v32  ;;  %v3052_v32 = vadd.f32 %v8291_v28, %v3051_v49  ;;  %vm3058_vm11 = vcmp.eq.f32.partialorder %v3057_v0, 8.507059e+37 }
 0x440   : > { %4209 = vmatpush.bf16.msra.mxu0 %v7893_v10  ;;  %v3066_v10 = vmul.f32 %v8280_v25, %v3065_v34  ;;  %v5042_v34 = vmul.f32 -1.442695, %v8333_v62  ;;  %5813 = vpow2.f32 %v5043_v15 }
 0x441   : > { %4197 = vmatpush.bf16.msrb.mxu3 %v7895_v37  ;;  %v3079_v37 = vmul.f32 %v8330_v8, %v8285_v12 }
 0x442   : > { %4173 = vmatmul.bf16.vlgmr.msra.gmra.mxu1 %v4073_v13  ;;  %v5810_v13 = vpop.eup %5809  ;;  %5815 = vpow2.f32 %v5042_v34  ;;  %v5877_v34 = vld [vmem:[#allocation15 + $0x20] sm:$0xff] }
 0x443   : > { %4252 = vmatpush.bf16.msrb.mxu1 %v5869_v44  ;;  %4185 = vmatpush.bf16.msrb.mxu2 %v8337_v16  ;;  %v4076_v44 = vpack.c.b16 %v4066_v60, %v4066_v60  ;;  %v5876_v60 = vld [vmem:[#allocation15 + $0x68] sm:$0xff] }
 0x444   : > { %4210 = vmatpush.bf16.msra.mxu0 %v7914_v42  ;;  %v3067_v42 = vadd.f32 %v8280_v25, %v3066_v10  ;;  %v3074_v10 = vand.u32 2147483648, %v8202_v11 }
 0x445   : > { %4198 = vmatpush.bf16.msrb.mxu3 %v7922_v18  ;;  %v3080_v18 = vsub.f32 1.0, %v3079_v37  ;;  %v5812_v49 = vpop.eup %5811  ;;  %v1901_v37 = vperm.slane %v8261_v38, 4 }
 0x446   : > { %4186 = vmatmul.bf16.vlgmr.msrb.gmra.mxu2 %v4074_v26  ;;  %v3059_v26 = vand.u32 2147483648, %v8221_v53  ;;  %v8377_v53 = vadd.f32 1.0, %v5810_v13  ;;  %v3071_v15 = vsel %vm8370_vm10, %v8280_v25, %v3067_v42  ;;  %v3104_v42 = vand.u32 2147483648, %v8266_v6 }
 0x447   : > { %4265 = vmatpush.bf16.msra.mxu2 %v5871_v59  ;;  %4253 = vmatpush.bf16.msrb.mxu1 %v5872_v47  ;;  %v3096_v59 = vmul.f32 %v8321_v20, %v3095_v21  ;;  %v3075_v21 = vor.u32 1.1754944e-38, %v3074_v10 }
 0x448   : > { %4211 = vmatpush.bf16.msra.mxu0 %v7938_v30  ;;  %4199 = vmatmul.bf16.vlgmr.msrb.gmra.mxu3 %v4075_v56  ;;  %v3072_v30 = vand.u32 2147483647, %v8202_v11  ;;  %v3056_v11 = vsel %vm8363_vm9, %v8291_v28, %v3052_v32  ;;  %v3060_v47 = vor.u32 1.1754944e-38, %v3059_v26  ;;  %v5814_v28 = vpop.eup %5813  ;;  %5817 = vrcp.f32 %v8377_v53  ;;  %v5886_v26 = vld [vmem:[#allocation15 + $0x138] sm:$0xff] }
 0x449   : > { %4278 = vmatpush.bf16.msra.mxu3 %v5873_v43  ;;  %v8384_v43 = vadd.f32 1.0, %v5812_v49  ;;  %v3097_v56 = vadd.f32 %v8321_v20, %v3096_v59  ;;  %v2625_v59 = vpop.f32.mrf.mxu0  ;;  %vm3113_vm9 = vweird.f32 %v8377_v53 }
 0x44a   : > { %vm3073_vm12 = vcmp.eq.f32.partialorder %v3072_v30, 8.507059e+37  ;;  %v3061_v32 = vsel %vm3058_vm11, %v3060_v47, %v3056_v11  ;;  %v5888_v30 = vld [vmem:[#allocation15 + $0x178] sm:$0xff] }
 0x44b   : > { %4266 = vmatpush.bf16.msra.mxu2 %v5874_v2  ;;  %4254 = vmatpush.bf16.msrb.mxu1 %v5875_v29  ;;  %v3076_v25 = vsel %vm3073_vm12, %v3075_v21, %v3071_v15  ;;  %v5878_v2 = vld [vmem:[#allocation15 + $0x60] sm:$0xff]  ;;  %5819 = vrcp.f32 %v8384_v43  ;;  %v8404_v29 = vadd.f32 1.0, %v5814_v28  ;;  %v3218_v10 = vmul.f32 %v3061_v32, %v8120_v48 }
 0x44c   : > { %4291 = vmatpush.bf16.msrb.mxu0 %v7979_v52  ;;  %v3101_v0 = vsel %vm8400_vm0, %v8321_v20, %v3097_v56  ;;  %v3219_v49 = vmul.f32 %v3076_v25, %v8117_v19  ;;  %v5880_v52 = vld [vmem:[#allocation15 + $0x58] sm:$0xff]  ;;  %v2605_v19 = vpop.f32.mrf.mxu3  ;;  %v5881_v20 = vld [vmem:[#allocation15 + $0x10] sm:$0xff]  ;;  %v5883_v56 = vld [vmem:[#allocation15 + $0x8] sm:$0xff]  ;;  %vm3128_vm11 = vweird.f32 %v8384_v43 }
 0x44d   : > { %4212 = vmatmul.bf16.vlgmr.msra.gmra.mxu0 %v4076_v44  ;;  %4279 = vmatpush.bf16.msra.mxu3 %v7987_v41  ;;  %v3081_v41 = vmul.f32 %v8330_v8, %v3080_v18  ;;  %v3102_v18 = vand.u32 2147483647, %v8266_v6  ;;  %v5879_v44 = vld [vmem:[#allocation15 + $0x18] sm:$0xff]  ;;  %v3087_v6 = vand.u32 2147483647, %v8285_v12  ;;  %5821 = vrcp.f32 %v8404_v29 }
 0x44e   : > { %vm3158_vm1 = vweird.f32 %v8404_v29 }
 0x44f   : > { %4267 = vmatpush.bf16.msra.mxu2 %v5876_v60  ;;  %4255 = vmatpush.bf16.msrb.mxu1 %v5877_v34  ;;  %v3082_v13 = vadd.f32 %v8330_v8, %v3081_v41  ;;  %vm3103_vm5 = vcmp.eq.f32.partialorder %v3102_v18, 8.507059e+37  ;;  %v3238_v41 = vpack.c.bf16 %v3219_v49, %v3218_v10  ;;  %vm3088_vm6 = vcmp.eq.f32.partialorder %v3087_v6, 8.507059e+37  ;;  %v5887_v6 = vld [vmem:[#allocation15 + $0x40] sm:$0xff] }
 0x450   : > { %4292 = vmatpush.bf16.msrb.mxu0 %v8001_v33  ;;  %v5816_v33 = vpop.eup %5815  ;;  %v8437_v34 = vadd.f32 %v2605_v19, %v1901_v37 }
 0x451   : > { %4280 = vmatpush.bf16.msra.mxu3 %v8008_v4  ;;  %v3089_v4 = vand.u32 2147483648, %v8285_v12  ;;  %v8421_v48 = vadd.f32 1.0, %v5816_v33  ;;  %v3105_v12 = vor.u32 1.1754944e-38, %v3104_v42  ;;  %v8428_v11 = vpop.eup %5817  ;;  %v4222_v32 = vunpack.c.l.b16 %v3238_v41  ;;  %v5884_v33 = vld [vmem:[#allocation15 + $0x48] sm:$0xff] }
 0x452   : > { %v8434_v47 = vpop.eup %5819  ;;  %v3109_v28 = vmul.f32 %v8428_v11, %v8377_v53  ;;  %v4223_v18 = vunpack.c.h.b16 %v3238_v41  ;;  %vm3114_vm7 = vweird.f32 %v8428_v11 }
 0x453   : > { %4268 = vmatpush.bf16.msra.mxu2 %v5878_v2  ;;  %4256 = vmatpush.bf16.msrb.mxu1 %v5879_v44  ;;  %v3090_v60 = vor.u32 1.1754944e-38, %v3089_v4  ;;  %v3106_v15 = vsel %vm3103_vm5, %v3105_v12, %v3101_v0  ;;  %5823 = vrcp.f32 %v8421_v48  ;;  %v3124_v25 = vmul.f32 %v8434_v47, %v8384_v43  ;;  %v8448_v2 = vpop.eup %5821  ;;  %v5889_v12 = vld [vmem:[#allocation15 + $0x130] sm:$0xff]  ;;  %vm8481_vm10 = vmor %vm3113_vm9, %vm3114_vm7 }
 0x454   : > { %4293 = vmatpush.bf16.msrb.mxu0 %v8037_v17  ;;  %v1902_v17 = vperm.slane %v8261_v38, 5  ;;  %v3221_v21 = vmul.f32 %v3106_v15, %v8160_v35  ;;  %v5044_v35 = vmul.f32 -1.442695, %v8437_v34  ;;  %v3110_v44 = vsub.f32 1.0, %v3109_v28 }
 0x455   : > { %4281 = vmatpush.bf16.msra.mxu3 %v8045_v57  ;;  %v3086_v57 = vsel %vm8417_vm4, %v8330_v8, %v3082_v13  ;;  %v4232_v4 = vpack.c.b16 %v4222_v32, %v4222_v32  ;;  %v3125_v10 = vsub.f32 1.0, %v3124_v25  ;;  %v4233_v0 = vpack.c.b16 %v4223_v18, %v4223_v18  ;;  %v5890_v32 = vld [vmem:[#allocation15 + $0x128] sm:$0xff] }
 0x456   : > { %v8431_v38 = vadd.f32 %v2625_v59, %v1902_v17  ;;  %v3091_v8 = vsel %vm3088_vm6, %v3090_v60, %v3086_v57  ;;  %v3111_v49 = vmul.f32 %v8428_v11, %v3110_v44  ;;  %v8830_v57 = vld [vmem:[#allocation65_spill] sm:$0xff]  ;;  %vm3129_vm8 = vweird.f32 %v8434_v47  ;;  %v8836_v18 = vld [vmem:[#allocation60_spill] sm:$0xff] }
 0x457   : > { %4269 = vmatpush.bf16.msra.mxu2 %v5880_v52  ;;  %4257 = vmatpush.bf16.msrb.mxu1 %v5881_v20  ;;  %v8829_v52 = vld [vmem:[#allocation58_spill] sm:$0xff]  ;;  %vm8496_vm12 = vmor %vm3128_vm11, %vm3129_vm8  ;;  %vm3159_vm14 = vweird.f32 %v8448_v2  ;;  %vm3143_vm4 = vweird.f32 %v8421_v48 }
 0x458   : > { %4294 = vmatpush.bf16.msrb.mxu0 %v8059_v58  ;;  %v5882_v58 = vld [vmem:[#allocation15 + $0x50] sm:$0xff]  ;;  %v5045_v42 = vmul.f32 -1.442695, %v8431_v38  ;;  %v3112_v41 = vadd.f32 %v8428_v11, %v3111_v49  ;;  %v3164_v49 = vand.u32 2147483648, %v8404_v29  ;;  %vm8529_vm5 = vmor %vm3158_vm1, %vm3159_vm14  ;;  %vm4483_vm1 = vcmask 1045504  }
 0x459   : > { %4282 = vmatpush.bf16.msra.mxu3 %v8062_v63  ;;  %v3220_v63 = vmul.f32 %v3091_v8, %v8167_v40  ;;  %v8452_v40 = vpop.eup %5823  ;;  %v8832_v8 = vld [vmem:[#allocation59_spill] sm:$0xff] }
 0x45a   : > { %5825 = vpow2.f32 %v5045_v42  ;;  %v3139_v17 = vmul.f32 %v8452_v40, %v8421_v48  ;;  %vm3144_vm0 = vweird.f32 %v8452_v40 }
 0x45b   : > { %4270 = vmatpush.bf16.msra.mxu2 %v5882_v58  ;;  %4258 = vmatpush.bf16.msrb.mxu1 %v5883_v56  ;;  %v3239_v13 = vpack.c.bf16 %v3221_v21, %v3220_v63  ;;  %5827 = vpow2.f32 %v5044_v35  ;;  %v3132_v21 = vand.u32 2147483647, %v8384_v43  ;;  %v3119_v56 = vand.u32 2147483648, %v8377_v53  ;;  %v8833_v63 = vld [vmem:[#allocation66_spill] sm:$0xff]  ;;  %vm8544_vm6 = vmor %vm3143_vm4, %vm3144_vm0 }
 0x45c   : > { %4295 = vmatpush.bf16.msrb.mxu0 %v8098_v24  ;;  %v5885_v24 = vld [vmem:[#allocation15] sm:$0xff]  ;;  %v3140_v60 = vsub.f32 1.0, %v3139_v17  ;;  %v3117_v35 = vand.u32 2147483647, %v8377_v53  ;;  %v3116_v53 = vsel %vm8481_vm10, %v8428_v11, %v3112_v41  ;;  %v3165_v41 = vor.u32 1.1754944e-38, %v3164_v49  ;;  %v5898_v49 = vld [vmem:[#allocation15 + $0x278] sm:$0xff] }
 0x45d   : > { %4283 = vmatpush.bf16.msra.mxu3 %v8101_v39  ;;  %v3154_v39 = vmul.f32 %v8448_v2, %v8404_v29  ;;  %v4225_v59 = vunpack.c.h.b16 %v3239_v13  ;;  %vm8500_vm13 = vcmp.eq.f32.partialorder %v3132_v21, 8.507059e+37  ;;  %vm4479_vm4 = vcmask 48128  }
 0x45e   : > { %v3141_v44 = vmul.f32 %v8452_v40, %v3140_v60  ;;  %vm3118_vm15 = vcmp.eq.f32.partialorder %v3117_v35, 8.507059e+37 }
 0x45f   : > { %4271 = vmatpush.bf16.msra.mxu2 %v5884_v33  ;;  %4259 = vmatpush.bf16.msrb.mxu1 %v5885_v24  ;;  %v3155_v37 = vsub.f32 1.0, %v3154_v39  ;;  %v8464_v19 = vpop.f32.mrf.mxu1  ;;  %v4235_v28 = vpack.c.b16 %v4225_v59, %v4225_v59  ;;  %v3134_v33 = vand.u32 2147483648, %v8384_v43  ;;  %v3120_v39 = vor.u32 1.1754944e-38, %v3119_v56 }
 0x460   : > { %4296 = vmatpush.bf16.msrb.mxu0 %v8122_v54  ;;  %v4224_v54 = vunpack.c.l.b16 %v3239_v13  ;;  %v5826_v20 = vpop.eup %5825  ;;  %v3142_v59 = vadd.f32 %v8452_v40, %v3141_v44 }
 0x461   : > { %4284 = vmatpush.bf16.msra.mxu3 %v8125_v45  ;;  %v3126_v45 = vmul.f32 %v8434_v47, %v3125_v10  ;;  %v5828_v58 = vpop.eup %5827  ;;  %v3156_v42 = vmul.f32 %v8448_v2, %v3155_v37  ;;  %v8504_v43 = vadd.f32 1.0, %v5826_v20  ;;  %v3149_v37 = vand.u32 2147483648, %v8421_v48 }
 0x462   : > { %4260 = vmatmul.bf16.vlgmr.msrb.gmra.mxu1 %v4232_v4  ;;  %v4234_v15 = vpack.c.b16 %v4224_v54, %v4224_v54  ;;  %v8491_v24 = vadd.f32 1.0, %v5828_v58  ;;  %v8837_v4 = vld [vmem:[#allocation55_spill] sm:$0xff]  ;;  %v5892_v58 = vld [vmem:[#allocation15 + $0x110] sm:$0xff] }
 0x463   : > { %4304 = vmatpush.bf16.msra.mxu1 %v5886_v26  ;;  %4272 = vmatpush.bf16.msra.mxu2 %v5887_v6  ;;  %v3127_v25 = vadd.f32 %v8434_v47, %v3126_v45  ;;  %v8842_v6 = vld [vmem:[#allocation56_spill] sm:$0xff]  ;;  %v3157_v17 = vadd.f32 %v8448_v2, %v3156_v42 }
 0x464   : > { %4297 = vmatpush.bf16.msrb.mxu0 %v8143_v22  ;;  %v8831_v22 = vld [vmem:[#allocation54_spill] sm:$0xff]  ;;  %5829 = vrcp.f32 %v8491_v24  ;;  %v5893_v42 = vld [vmem:[#allocation15 + $0x108] sm:$0xff]  ;;  %vm3173_vm11 = vweird.f32 %v8491_v24 }
 0x465   : > { %4285 = vmatpush.bf16.msra.mxu3 %v8829_v52  ;;  %v3131_v11 = vsel %vm8496_vm12, %v8434_v47, %v3127_v25  ;;  %v8513_v54 = vpop.f32.mrf.mxu0  ;;  %v3162_v47 = vand.u32 2147483647, %v8404_v29  ;;  %v5891_v29 = vld [vmem:[#allocation15 + $0x118] sm:$0xff]  ;;  %5831 = vrcp.f32 %v8504_v43  ;;  %v3161_v20 = vsel %vm8529_vm5, %v8448_v2, %v3157_v17 }
 0x466   : > { %4273 = vmatmul.bf16.vlgmr.msra.gmra.mxu2 %v4233_v0  ;;  %v3135_v0 = vor.u32 1.1754944e-38, %v3134_v33  ;;  %vm4643_vm5 = vcmask 66560  }
 0x467   : > { %4317 = vmatpush.bf16.msrb.mxu2 %v5888_v30  ;;  %4305 = vmatpush.bf16.msra.mxu1 %v5889_v12  ;;  %v3121_v30 = vsel %vm3118_vm15, %v3120_v39, %v3116_v53  ;;  %v8843_v12 = vld [vmem:[#allocation61_spill] sm:$0xff]  ;;  %vm3163_vm7 = vcmp.eq.f32.partialorder %v3162_v47, 8.507059e+37 }
 0x468   : > { %4298 = vmatpush.bf16.msrb.mxu0 %v8832_v8  ;;  %4286 = vmatmul.bf16.vlgmr.msra.gmra.mxu3 %v4234_v15  ;;  %v3136_v45 = vsel %vm8500_vm13, %v3135_v0, %v3131_v11  ;;  %v3222_v60 = vmul.f32 %v3121_v30, %v8296_v23  ;;  %v3150_v23 = vor.u32 1.1754944e-38, %v3149_v37  ;;  %v3166_v8 = vsel %vm3163_vm7, %v3165_v41, %v3161_v20  ;;  %v5897_v11 = vld [vmem:[#allocation15 + $0x140] sm:$0xff]  ;;  %v4388_v20 = vld [vmem:[#allocation18 + $0x30] sm:$0xff] }
 0x469   : > { %4330 = vmatpush.bf16.msrb.mxu3 %v8830_v57  ;;  %v8533_v52 = vpop.f32.mrf.mxu2  ;;  %v3147_v57 = vand.u32 2147483647, %v8421_v48  ;;  %v3146_v48 = vsel %vm8544_vm6, %v8452_v40, %v3142_v59  ;;  %v3177_v15 = vand.u32 2147483647, %v8491_v24  ;;  %vm3188_vm13 = vweird.f32 %v8504_v43 }
 0x46a   : > { %v8557_v21 = vpop.eup %5829 }
 0x46b   : > { %4318 = vmatpush.bf16.msrb.mxu2 %v8831_v22  ;;  %4306 = vmatpush.bf16.msra.mxu1 %v5890_v32  ;;  %v8848_v22 = vld [vmem:[#allocation57_spill] sm:$0xff]  ;;  %v8554_v2 = vpop.f32.mrf.mxu3  ;;  %vm3148_vm8 = vcmp.eq.f32.partialorder %v3147_v57, 8.507059e+37  ;;  %v8562_v56 = vpop.eup %5831  ;;  %v3225_v32 = vmul.f32 %v3166_v8, %v8328_v5  ;;  %v3169_v25 = vmul.f32 %v8557_v21, %v8491_v24  ;;  %vm3174_vm9 = vweird.f32 %v8557_v21 }
 0x46c   : > { %4343 = vmatpush.bf16.msra.mxu0 %v8833_v63  ;;  %v8849_v63 = vld [vmem:[#allocation64_spill] sm:$0xff]  ;;  %vm3189_vm10 = vweird.f32 %v8562_v56  ;;  %vm8601_vm12 = vmor %vm3173_vm11, %vm3174_vm9  ;;  %vm3178_vm15 = vcmp.eq.f32.partialorder %v3177_v15, 8.507059e+37  ;;  %v4392_v15 = vld [vmem:[#allocation18 + $0x50] sm:$0xff] }
 0x46d   : > { %4299 = vmatmul.bf16.vlgmr.msrb.gmra.mxu0 %v4235_v28  ;;  %4331 = vmatpush.bf16.msrb.mxu3 %v8836_v18  ;;  %v3151_v28 = vsel %vm3148_vm8, %v3150_v23, %v3146_v48  ;;  %v5894_v5 = vld [vmem:[#allocation15 + $0x148] sm:$0xff]  ;;  %v3170_v53 = vsub.f32 1.0, %v3169_v25  ;;  %v3192_v48 = vand.u32 2147483647, %v8504_v43  ;;  %vm8613_vm14 = vmor %vm3188_vm13, %vm3189_vm10  ;;  %v5904_v25 = vld [vmem:[#allocation15 + $0x260] sm:$0xff] }
 0x46e   : > { %v3224_v35 = vmul.f32 %v3151_v28, %v8333_v62  ;;  %v5901_v57 = vld [vmem:[#allocation15 + $0x228] sm:$0xff] }
 0x46f   : > { %4319 = vmatpush.bf16.msrb.mxu2 %v8837_v4  ;;  %4307 = vmatpush.bf16.msra.mxu1 %v8842_v6  ;;  %v5895_v4 = vld [vmem:[#allocation15 + $0x100] sm:$0xff]  ;;  %v3171_v0 = vmul.f32 %v8557_v21, %v3170_v53  ;;  %vm3193_vm0 = vcmp.eq.f32.partialorder %v3192_v48, 8.507059e+37 }
 0x470   : > { %4344 = vmatpush.bf16.msra.mxu0 %v8188_v50  ;;  %v3933_v50 = vpop.f32.mrf.mxu1  ;;  %v3241_v13 = vpack.c.bf16 %v3225_v32, %v3224_v35  ;;  %v8577_v6 = vld [vmem:[#allocation17] ss:$0 sm:$0xff]  ;;  %v4384_v35 = vld [vmem:[#allocation18 + $0x10] sm:$0xff]  ;;  %v4382_v53 = vld [vmem:[#allocation18] sm:$0xff] }
 0x471   : > { %4332 = vmatpush.bf16.msrb.mxu3 %v8194_v27  ;;  %v5899_v50 = vld [vmem:[#allocation15 + $0x230] sm:$0xff]  ;;  %v3932_v47 = vadd.f32 %v8577_v6, %v8464_v19  ;;  %v3172_v37 = vadd.f32 %v8557_v21, %v3171_v0 }
 0x472   : > { %v4229_v30 = vunpack.c.h.b16 %v3241_v13 }
 0x473   : > { %4320 = vmatpush.bf16.msrb.mxu2 %v8843_v12  ;;  %4308 = vmatpush.bf16.msra.mxu1 %v5891_v29  ;;  %v3959_v18 = vpop.f32.mrf.mxu3  ;;  %v3179_v29 = vand.u32 2147483648, %v8491_v24  ;;  %v3176_v24 = vsel %vm8601_vm12, %v8557_v21, %v3172_v37 }
 0x474   : > { %4345 = vmatpush.bf16.msra.mxu0 %v8223_v46  ;;  %v3223_v46 = vmul.f32 %v3136_v45, %v8311_v61  ;;  %v3972_v61 = vpop.f32.mrf.mxu0  ;;  %v4389_v45 = vld [vmem:[#allocation18 + $0x38] sm:$0xff]  ;;  %v4239_v27 = vpack.c.b16 %v4229_v30, %v4229_v30 }
 0x475   : > { %4333 = vmatpush.bf16.msrb.mxu3 %v8230_v51 }
 0x476   : > { %v3240_v51 = vpack.c.bf16 %v3223_v46, %v3222_v60  ;;  %v4387_v46 = vld [vmem:[#allocation18 + $0x28] sm:$0xff] }
 0x477   : > { %4321 = vmatpush.bf16.msrb.mxu2 %v8848_v22  ;;  %4309 = vmatpush.bf16.msra.mxu1 %v5892_v58  ;;  %v5902_v22 = vld [vmem:[#allocation15 + $0x268] sm:$0xff]  ;;  %v5903_v58 = vld [vmem:[#allocation15 + $0x220] sm:$0xff] }
 0x478   : > { %4346 = vmatpush.bf16.msra.mxu0 %v8240_v9  ;;  %v8560_v40 = vpop.f32.mrf.mxu1  ;;  %v3946_v9 = vpop.f32.mrf.mxu2  ;;  %v4226_v33 = vunpack.c.l.b16 %v3240_v51  ;;  %v4227_v44 = vunpack.c.h.b16 %v3240_v51  ;;  %v4386_v51 = vld [vmem:[#allocation18 + $0x20] sm:$0xff] }
 0x479   : > { %4334 = vmatpush.bf16.msrb.mxu3 %v8247_v7  ;;  %v3184_v7 = vmul.f32 %v8562_v56, %v8504_v43 }
 0x47a   : > { %v4236_v26 = vpack.c.b16 %v4226_v33, %v4226_v33  ;;  %v4237_v17 = vpack.c.b16 %v4227_v44, %v4227_v44  ;;  %v5907_v44 = vld [vmem:[#allocation15 + $0x210] sm:$0xff] }
 0x47b   : > { %4322 = vmatpush.bf16.msrb.mxu2 %v8849_v63  ;;  %4310 = vmatpush.bf16.msra.mxu1 %v5893_v42  ;;  %v3185_v10 = vsub.f32 1.0, %v3184_v7  ;;  %v8587_v12 = vpop.f32.mrf.mxu3  ;;  %v4385_v63 = vld [vmem:[#allocation18 + $0x18] sm:$0xff] }
 0x47c   : > { %4347 = vmatpush.bf16.msra.mxu0 %v8277_v14  ;;  %v5896_v14 = vld [vmem:[#allocation15 + $0x238] sm:$0xff]  ;;  %v8574_v62 = vpop.f32.mrf.mxu0 }
 0x47d   : > { %4335 = vmatpush.bf16.msrb.mxu3 %v8287_v36  ;;  %v4228_v36 = vunpack.c.l.b16 %v3241_v13  ;;  %v5905_v42 = vld [vmem:[#allocation15 + $0x218] sm:$0xff]  ;;  %v4383_v13 = vld [vmem:[#allocation18 + $0x8] sm:$0xff] }
 0x47f   : > { %4323 = vmatpush.bf16.msrb.mxu2 %v5894_v5  ;;  %4311 = vmatpush.bf16.msra.mxu1 %v5895_v4  ;;  %v4238_v59 = vpack.c.b16 %v4228_v36, %v4228_v36  ;;  %v5906_v5 = vld [vmem:[#allocation15 + $0x258] sm:$0xff] }
 0x480   : > { %4348 = vmatpush.bf16.msra.mxu0 %v8298_v55  ;;  %v3985_v39 = vpop.f32.mrf.mxu1  ;;  %v8580_v55 = vpop.f32.mrf.mxu2 }
 0x481   : > { %4336 = vmatpush.bf16.msrb.mxu3 %v8307_v31  ;;  %v3186_v31 = vmul.f32 %v8562_v56, %v3185_v10  ;;  %v5909_v10 = vld [vmem:[#allocation15 + $0x208] sm:$0xff] }
 0x482   : > { %4312 = vmatmul.bf16.vlgmr.msra.gmra.mxu1 %v4236_v26 }
 0x483   : > { %4356 = vmatpush.bf16.msrb.mxu1 %v5896_v14  ;;  %4324 = vmatpush.bf16.msrb.mxu2 %v5897_v11  ;;  %v3187_v60 = vadd.f32 %v8562_v56, %v3186_v31  ;;  %v4011_v32 = vpop.f32.mrf.mxu3  ;;  %v5908_v14 = vld [vmem:[#allocation15 + $0x250] sm:$0xff]  ;;  %v5910_v11 = vld [vmem:[#allocation15 + $0x248] sm:$0xff] }
 0x484   : > { %4349 = vmatpush.bf16.msra.mxu0 %v8318_v1  ;;  %v5900_v1 = vld [vmem:[#allocation15 + $0x270] sm:$0xff]  ;;  %v4024_v19 = vpop.f32.mrf.mxu0 }
 0x485   : > { %4337 = vmatpush.bf16.msrb.mxu3 %v8323_v3  ;;  %v3945_v3 = vadd.f32 %v8533_v52, %v3932_v47  ;;  %v4394_v19 = vld [vmem:[#allocation18 + $0x60] sm:$0xff] }
 0x486   : > { %4325 = vmatmul.bf16.vlgmr.msrb.gmra.mxu2 %v4237_v17 }
 0x487   : > { %4369 = vmatpush.bf16.msra.mxu2 %v5898_v49  ;;  %4357 = vmatpush.bf16.msrb.mxu1 %v5899_v50  ;;  %v3958_v41 = vadd.f32 %v8554_v2, %v3945_v3  ;;  %v3180_v2 = vor.u32 1.1754944e-38, %v3179_v29  ;;  %v5911_v49 = vld [vmem:[#allocation15 + $0x200] sm:$0xff]  ;;  %v4395_v29 = vld [vmem:[#allocation18 + $0x68] sm:$0xff] }
 0x488   : > { %4350 = vmatpush.bf16.msra.mxu0 %v8337_v16  ;;  %4338 = vmatmul.bf16.vlgmr.msrb.gmra.mxu3 %v4238_v59  ;;  %v3194_v16 = vand.u32 2147483648, %v8504_v43  ;;  %v3998_v23 = vpop.f32.mrf.mxu2  ;;  %v3191_v43 = vsel %vm8613_vm14, %v8562_v56, %v3187_v60  ;;  %v5912_v59 = vld [vmem:[#allocation15 + $0x240] sm:$0xff] }
 0x489   : > { %v3181_v61 = vsel %vm3178_vm15, %v3180_v2, %v3176_v24  ;;  %v3971_v28 = vadd.f32 %v8513_v54, %v3958_v41 }
 0x48a   : > { %v3195_v21 = vor.u32 1.1754944e-38, %v3194_v16  ;;  %v3226_v33 = vmul.f32 %v3181_v61, %v8437_v34  ;;  %v4391_v16 = vld [vmem:[#allocation18 + $0x48] sm:$0xff] }
 0x48b   : > { %4370 = vmatpush.bf16.msra.mxu2 %v5900_v1  ;;  %4358 = vmatpush.bf16.msrb.mxu1 %v5901_v57  ;;  %v3984_v56 = vadd.f32 %v8560_v40, %v3971_v28  ;;  %v4035_v26 = vpop.f32.mrf.mxu1  ;;  %v4096_v40 = vpop.f32.mrf.mxu3 }
 0x48c   : > { %4432 = vmatpush.msrb.mxu0 %v4389_v45  ;;  %v3196_v9 = vsel %vm3193_vm0, %v3195_v21, %v3191_v43  ;;  %v8623_v7 = vpop.f32.mrf.mxu0  ;;  %v4397_v45 = vld [vmem:[#allocation18 + $0x78] sm:$0xff]  ;;  %v4097_v24 = vadd.f32 %v8577_v6, %v4096_v40 }
 0x48d   : > { %4351 = vmatmul.bf16.vlgmr.msra.gmra.mxu0 %v4239_v27  ;;  %v3227_v54 = vmul.f32 %v3196_v9, %v8431_v38  ;;  %v3997_v18 = vadd.f32 %v8580_v55, %v3984_v56  ;;  %4409 = vmatpush.msra.mxu3 %v4397_v45  ;;  %v4396_v27 = vld [vmem:[#allocation18 + $0x70] sm:$0xff] }
 0x48e   : > { %4433 = vmatpush.msrb.mxu0 %v4388_v20  ;;  %v4393_v20 = vld [vmem:[#allocation18 + $0x58] sm:$0xff] }
 0x48f   : > { %4371 = vmatpush.bf16.msra.mxu2 %v5902_v22  ;;  %4359 = vmatpush.bf16.msrb.mxu1 %v5903_v58  ;;  %v3242_v4 = vpack.c.bf16 %v3227_v54, %v3226_v33  ;;  %v4010_v34 = vadd.f32 %v8587_v12, %v3997_v18  ;;  %v4110_v22 = vadd.f32 %v8623_v7, %v4097_v24  ;;  %v4518_v24 = vld [vmem:[#allocation23 + $0x58] sm:$0xff] }
 0x490   : > { %4434 = vmatpush.msrb.mxu0 %v4387_v46  ;;  %4410 = vmatpush.msra.mxu3 %v4396_v27  ;;  %v4390_v46 = vld [vmem:[#allocation18 + $0x40] sm:$0xff] }
 0x491   : > { %v4230_v38 = vunpack.c.l.b16 %v3242_v4  ;;  %v4023_v39 = vadd.f32 %v8574_v62, %v4010_v34  ;;  %v4231_v17 = vunpack.c.h.b16 %v3242_v4  ;;  %v4048_v30 = vpop.f32.mrf.mxu2  ;;  %v4450_v4 = vld [vmem:[#allocation18 + $0xb0] sm:$0xff] }
 0x492   : > { %4435 = vmatpush.msrb.mxu0 %v4386_v51  ;;  %4411 = vmatpush.msra.mxu3 %v4395_v29 }
 0x493   : > { %4372 = vmatpush.bf16.msra.mxu2 %v5904_v25  ;;  %4360 = vmatpush.bf16.msrb.mxu1 %v5905_v42  ;;  %v4036_v0 = vadd.f32 %v4035_v26, %v4023_v39  ;;  %v4240_v55 = vpack.c.b16 %v4230_v38, %v4230_v38  ;;  %v4037_v31 = vpop.f32.mrf.mxu1  ;;  %v4098_v47 = vpop.f32.mrf.mxu3  ;;  %v4241_v12 = vpack.c.b16 %v4231_v17, %v4231_v17  ;;  %v4449_v26 = vld [vmem:[#allocation18 + $0xa8] sm:$0xff]  ;;  %v4446_v38 = vld [vmem:[#allocation18 + $0x90] sm:$0xff] }
 0x494   : > { %4436 = vmatpush.msrb.mxu0 %v4385_v63  ;;  %v4111_v36 = vpop.f32.mrf.mxu0  ;;  %4412 = vmatpush.msra.mxu3 %v4394_v19  ;;  %v4445_v39 = vld [vmem:[#allocation18 + $0x88] sm:$0xff] }
 0x495   : > { %v4049_v50 = vadd.f32 %v4048_v30, %v4036_v0  ;;  %v4444_v36 = vld [vmem:[#allocation18 + $0x80] sm:$0xff] }
 0x496   : > { %4437 = vmatpush.msrb.mxu0 %v4384_v35  ;;  %4413 = vmatpush.msra.mxu3 %v4393_v20 }
 0x497   : > { %4373 = vmatpush.bf16.msra.mxu2 %v5906_v5  ;;  %4361 = vmatpush.bf16.msrb.mxu1 %v5907_v44 }
 0x498   : > { %4438 = vmatpush.msrb.mxu0 %v4383_v13  ;;  %4414 = vmatpush.msra.mxu3 %v4392_v15 }
 0x499   : > { %v4050_v62 = vpop.f32.mrf.mxu2 }
 0x49a   : > { %4439 = vmatpush.msrb.mxu0 %v4382_v53  ;;  %4415 = vmatpush.msra.mxu3 %v4391_v16  ;;  %v4451_v53 = vld [vmem:[#allocation18 + $0xb8] sm:$0xff] }
 0x49b   : > { %4374 = vmatpush.bf16.msra.mxu2 %v5908_v14  ;;  %4362 = vmatpush.bf16.msrb.mxu1 %v5909_v10  ;;  %v4448_v14 = vld [vmem:[#allocation18 + $0xa0] sm:$0xff]  ;;  %v4447_v10 = vld [vmem:[#allocation18 + $0x98] sm:$0xff] }
 0x49c   : > { %4416 = vmatpush.msra.mxu3 %v4390_v46 }
 0x49d   : > { %5367 = vmatmul.msk.f32.vlgmr.msrb.gmra.mxu0 %vm1214_vm2, %v4049_v50 }
 0x49e   : > { %4463 = vmatpush.msrb.mxu3 %v4451_v53  ;;  %v4615_v53 = vld [vmem:[#allocation32 + $0x18] sm:$0xff] }
 0x49f   : > { %4375 = vmatpush.bf16.msra.mxu2 %v5910_v11  ;;  %4363 = vmatpush.bf16.msrb.mxu1 %v5911_v49  ;;  %v4122_v37 = vpop.f32.mrf.mxu1 }
 0x4a0   : > { %v4123_v23 = vadd.f32 %v4122_v37, %v4110_v22  ;;  %4464 = vmatpush.msrb.mxu3 %v4450_v4  ;;  %v4517_v22 = vld [vmem:[#allocation23 + $0x50] sm:$0xff] }
 0x4a1   : > { %v4614_v4 = vld [vmem:[#allocation32 + $0x10] sm:$0xff] }
 0x4a2   : > { %4364 = vmatmul.bf16.vlgmr.msrb.gmra.mxu1 %v4240_v55  ;;  %4465 = vmatpush.msrb.mxu3 %v4449_v26  ;;  %v5710_v26 = vld [vmem:[#allocation27] ss:$0 sm:$0xff] }
 0x4a3   : > { %4376 = vmatpush.bf16.msra.mxu2 %v5912_v59 }
 0x4a4   : > { %4466 = vmatpush.msrb.mxu3 %v4448_v14 }
 0x4a6   : > { %4377 = vmatmul.bf16.vlgmr.msra.gmra.mxu2 %v4241_v12  ;;  %4467 = vmatpush.msrb.mxu3 %v4447_v10 }
 0x4a7   : > { %v4124_v1 = vpop.f32.mrf.mxu1  ;;  %4635 = vmatpush.msrb.mxu2 %v4615_v53 }
 0x4a8   : > { %4468 = vmatpush.msrb.mxu3 %v4446_v38  ;;  %v4612_v38 = vld [vmem:[#allocation32] sm:$0xff] }
 0x4a9   : > { %v4135_v57 = vpop.f32.mrf.mxu2  ;;  %4636 = vmatpush.msrb.mxu2 %v4614_v4 }
 0x4aa   : > { %v4161_v3 = vpop.f32.mrf.mxu0  ;;  %v4136_v2 = vadd.f32 %v4135_v57, %v4123_v23  ;;  %4469 = vmatpush.msrb.mxu3 %v4445_v39  ;;  %v4516_v23 = vld [vmem:[#allocation23 + $0x48] sm:$0xff]  ;;  %v5711_v39 = vld [vmem:[#allocation30] ss:$0 sm:$0xff] }
 0x4ab   : > { %v4148_v60 = vpop.f32.mrf.mxu3 }
 0x4ac   : > { %v4149_v58 = vadd.f32 %v4148_v60, %v4136_v2  ;;  %4470 = vmatpush.msrb.mxu3 %v4444_v36  ;;  %v4514_v2 = vld [vmem:[#allocation23 + $0x38] sm:$0xff] }
 0x4ae   : > { %v4162_v51 = vadd.f32 %v4161_v3, %v4149_v58  ;;  %v4513_v58 = vld [vmem:[#allocation23 + $0x30] sm:$0xff] }
 0x4b1   : > { %v4137_v41 = vpop.f32.mrf.mxu2 }
 0x4b2   : > { %v4163_v52 = vpop.f32.mrf.mxu0 }
 0x4b3   : > { %v4150_v48 = vpop.f32.mrf.mxu3  ;;  %v4476_v52 = vld [vmem:[#allocation20] sm:$0x3f] }
 0x4b4   : > { %v4478_v48 = vld [vmem:[#allocation21] sm:$0x3] }
 0x4bf   : > { %v4174_v8 = vpop.f32.mrf.mxu1 }
 0x4c0   : > { %v4175_v28 = vadd.f32 %v4174_v8, %v4162_v51  ;;  %v4515_v8 = vld [vmem:[#allocation23 + $0x40] sm:$0xff]  ;;  %v4512_v51 = vld [vmem:[#allocation23 + $0x28] sm:$0xff] }
 0x4c7   : > { %v4176_v43 = vpop.f32.mrf.mxu1 }
 0x4c8   : > { %v4511_v43 = vld [vmem:[#allocation23 + $0x20] sm:$0xff] }
 0x4c9   : > { %v4187_v61 = vpop.f32.mrf.mxu2 }
 0x4ca   : > { %v4213_v21 = vpop.f32.mrf.mxu0  ;;  %v4188_v32 = vadd.f32 %v4187_v61, %v4175_v28  ;;  %v4509_v61 = vld [vmem:[#allocation23 + $0x10] sm:$0xff]  ;;  %v4508_v28 = vld [vmem:[#allocation23 + $0x8] sm:$0xff] }
 0x4cb   : > { %v4200_v63 = vpop.f32.mrf.mxu3 }
 0x4cc   : > { %v4201_v25 = vadd.f32 %v4200_v63, %v4188_v32  ;;  %v4507_v32 = vld [vmem:[#allocation23] sm:$0xff] }
 0x4cd   : > { %v4551_v63 = vld [vmem:[#allocation26 + $0x18] sm:$0xff] }
 0x4ce   : > { %v4214_v9 = vadd.f32 %v4213_v21, %v4201_v25  ;;  %v4510_v21 = vld [vmem:[#allocation23 + $0x18] sm:$0xff] }
 0x4cf   : > { %v4550_v25 = vld [vmem:[#allocation26 + $0x10] sm:$0xff] }
 0x4d0   : > { %5366 = vmatmul.msk.f32.vlgmr.msra.gmra.mxu3 %vm1214_vm2, %v4214_v9 }
 0x4d1   : > { %v4189_v35 = vpop.f32.mrf.mxu2  ;;  %4571 = vmatpush.msra.mxu3 %v4551_v63 }
 0x4d2   : > { %v4215_v42 = vpop.f32.mrf.mxu0  ;;  %v4548_v35 = vld [vmem:[#allocation26] sm:$0xff] }
 0x4d3   : > { %v4202_v33 = vpop.f32.mrf.mxu3  ;;  %4572 = vmatpush.msra.mxu3 %v4550_v25  ;;  %v4549_v42 = vld [vmem:[#allocation26 + $0x8] sm:$0xff] }
 0x4d4   : > { %v4583_v33 = vld [vmem:[#allocation29 + $0x18] sm:$0xff] }
 0x4d5   : > { %4573 = vmatpush.msra.mxu3 %v4549_v42  ;;  %4603 = vmatpush.msra.mxu1 %v4583_v33 }
 0x4d7   : > { %4574 = vmatpush.msra.mxu3 %v4548_v35 }
 0x4df   : > { %v4261_v56 = vpop.f32.mrf.mxu1 }
 0x4e0   : > { %v4262_v30 = vadd.f32 %v8577_v6, %v4261_v56  ;;  %v4582_v56 = vld [vmem:[#allocation29 + $0x10] sm:$0xff] }
 0x4e1   : > { %4604 = vmatpush.msra.mxu1 %v4582_v56 }
 0x4e7   : > { %v4263_v7 = vpop.f32.mrf.mxu1 }
 0x4e8   : > { %v4581_v7 = vld [vmem:[#allocation29 + $0x8] sm:$0xff] }
 0x4e9   : > { %v4274_v54 = vpop.f32.mrf.mxu2  ;;  %4605 = vmatpush.msra.mxu1 %v4581_v7 }
 0x4ea   : > { %v4300_v13 = vpop.f32.mrf.mxu0  ;;  %v4275_v31 = vadd.f32 %v4274_v54, %v4262_v30 }
 0x4eb   : > { %v4287_v5 = vpop.f32.mrf.mxu3 }
 0x4ec   : > { %v4288_v47 = vadd.f32 %v4287_v5, %v4275_v31 }
 0x4ee   : > { %v4301_v12 = vadd.f32 %v4300_v13, %v4288_v47  ;;  %v5709_v13 = vld [vmem:[#allocation24] ss:$0 sm:$0xff] }
 0x4f1   : > { %v4276_v44 = vpop.f32.mrf.mxu2 }
 0x4f2   : > { %v4302_v18 = vpop.f32.mrf.mxu0  ;;  %v4580_v44 = vld [vmem:[#allocation29] sm:$0xff] }
 0x4f3   : > { %v4289_v34 = vpop.f32.mrf.mxu3  ;;  %4606 = vmatpush.msra.mxu1 %v4580_v44 }
 0x4f4   : > { %v4613_v34 = vld [vmem:[#allocation32 + $0x8] sm:$0xff] }
 0x4f5   : > { %4637 = vmatpush.msrb.mxu2 %v4613_v34 }
 0x4f7   : > { %4638 = vmatpush.msrb.mxu2 %v4612_v38 }
 0x4ff   : > { %v4313_v40 = vpop.f32.mrf.mxu1 }
 0x500   : > { %v4314_v62 = vadd.f32 %v4313_v40, %v4301_v12 }
 0x507   : > { %v4315_v11 = vpop.f32.mrf.mxu1 }
 0x509   : > { %v4326_v0 = vpop.f32.mrf.mxu2 }
 0x50a   : > { %v4352_v17 = vpop.f32.mrf.mxu0  ;;  %v4327_v45 = vadd.f32 %v4326_v0, %v4314_v62  ;;  %v5712_v0 = vld [vmem:[#allocation33] ss:$0 sm:$0xff] }
 0x50b   : > { %v4339_v49 = vpop.f32.mrf.mxu3 }
 0x50c   : > { %v4340_v1 = vadd.f32 %v4339_v49, %v4327_v45 }
 0x50e   : > { %v4353_v27 = vadd.f32 %v4352_v17, %v4340_v1 }
 0x511   : > { %v4328_v50 = vpop.f32.mrf.mxu2 }
 0x512   : > { %v4354_v55 = vpop.f32.mrf.mxu0 }
 0x513   : > { %v4341_v59 = vpop.f32.mrf.mxu3 }
 0x51a   : > { %v4441_v15 = vpop.f32.mrf.mxu0 }
 0x51f   : > { %v4365_v37 = vpop.f32.mrf.mxu1 }
 0x520   : > { %v4366_v29 = vadd.f32 %v4365_v37, %v4353_v27 }
 0x527   : > { %v4367_v3 = vpop.f32.mrf.mxu1 }
 0x529   : > { %v4378_v57 = vpop.f32.mrf.mxu2 }
 0x52a   : > { %v4379_v19 = vadd.f32 %v4378_v57, %v4366_v29 }
 0x52c   : > { %5368 = vmatmul.msk.f32.vlgmr.msrb.gmra.mxu3 %vm1214_vm2, %v4379_v19  ;;  %vm4523_vm2 = vcmask 785408  }
 0x531   : > { %v4380_v20 = vpop.f32.mrf.mxu2 }
 0x553   : > { %v4418_v60 = vpop.f32.mrf.mxu3 }
 0x554   : > { %v4442_v6 = vadd.f32 %v4441_v15, %v4418_v60 }
 0x5af   : > { %v4472_v16 = vpop.f32.mrf.mxu3 }
 0x5b0   : > { %v4475_v41 = vadd.f32 %v4472_v16, %v4442_v6 }
 0x5b2   : > { %v4477_v46 = vmul.f32 %v4476_v52, %v4475_v41 }
 0x5b4   : > { %5369 = vmatpush.msk.msra.mxu0 %vm4483_vm1, %v4477_v46 }
 0x5b5   : > { %5370 = vmatmul.msk.f32.vlgmr.msra.gmra.mxu0 %vm4479_vm4, %v4478_v48 }
 0x5b6   : > { %4531 = vmatpush.msrb.mxu0 %v4518_v24 }
 0x5b8   : > { %4532 = vmatpush.msrb.mxu0 %v4517_v22 }
 0x5ba   : > { %4533 = vmatpush.msrb.mxu0 %v4516_v23 }
 0x5bc   : > { %4534 = vmatpush.msrb.mxu0 %v4515_v8 }
 0x5be   : > { %4535 = vmatpush.msrb.mxu0 %v4514_v2 }
 0x5c0   : > { %4536 = vmatpush.msrb.mxu0 %v4513_v58 }
 0x5c2   : > { %4537 = vmatpush.msrb.mxu0 %v4512_v51 }
 0x5c4   : > { %4538 = vmatpush.msrb.mxu0 %v4511_v43 }
 0x5c6   : > { %4539 = vmatpush.msrb.mxu0 %v4510_v21 }
 0x5c8   : > { %4540 = vmatpush.msrb.mxu0 %v4509_v61 }
 0x5ca   : > { %4541 = vmatpush.msrb.mxu0 %v4508_v28 }
 0x5cc   : > { %4542 = vmatpush.msrb.mxu0 %v4507_v32 }
 0x632   : > { %v4504_v9 = vpop.f32.mrf.mxu0 }
 0x633   : > { %5371 = vmatmul.msk.f32.vlgmr.msrb.gmra.mxu0 %vm4523_vm2, %v4504_v9 }
 0x6b0   : > { %v4544_v54 = vpop.f32.mrf.mxu0 }
 0x6b1   : > { %v4545_v5 = vadd.f32 %v5709_v13, %v4544_v54 }
 0x6b3   : > { %v4547_v18 = vmax.f32 %v4545_v5, 0.0 }
 0x6b5   : > { %5372 = vmatmul.msk.f32.vlgmr.msra.gmra.mxu3 %vm1625_vm3, %v4547_v18 }
 0x738   : > { %v4576_v14 = vpop.f32.mrf.mxu3 }
 0x739   : > { %v4577_v40 = vadd.f32 %v5710_v26, %v4576_v14 }
 0x73b   : > { %v4579_v10 = vmax.f32 %v4577_v40, 0.0 }
 0x73d   : > { %5373 = vmatmul.msk.f32.vlgmr.msra.gmra.mxu1 %vm1625_vm3, %v4579_v10 }
 0x7ba   : > { %v4608_v36 = vpop.f32.mrf.mxu1 }
 0x7bb   : > { %v4609_v11 = vadd.f32 %v5711_v39, %v4608_v36 }
 0x7bd   : > { %v4611_v17 = vmax.f32 %v4609_v11, 0.0 }
 0x7bf   : > { %5374 = vmatmul.msk.f32.vlgmr.msrb.gmra.mxu2 %vm1625_vm3, %v4611_v17 }
 0x842   : > { %v4640_v49 = vpop.f32.mrf.mxu2 }
 0x843   : > { %v4641_v55 = vadd.f32 %v5712_v0, %v4640_v49 }
 0x845   : > { %4644 = vst.msk [vmem:[#allocation35] sm:$0x3] %vm4643_vm5, %v4641_v55 }
 0x846 PF: > { %s8854_s20 = sld [smem:[#allocation52_spill]]  ;;  %s6654_s26 = smov [#allocation35]  }
 0x847   : > { %s4651_s25 = sshll.u32 %s6654_s26, 4  ;;  %s8855_s8 = sld [smem:[#allocation80_spill]]  ;;  %s4652_s25 = int_to_ptr.vmem [resolvable:$true] %s4651_s25 }
 0x84c   : > { %p5644_p3 = scmp.eq.s32.totalorder %s8854_s20, 2 }
 0x84d   : > { %s4653_s9 = sshll.u32 %s8855_s8, 4  ;;  %s4654_s9 = int_to_ptr.hbm [resolvable:$true] %s4653_s9 }
 0x84e   : > { %5542 = dma.vmem_to_hbm [thread:$0]  (%p5644_p3), %s4652_s25, 32, %s4654_s9, [#allocation5]  }
 0x84f   : > { %6606 = dma.done.wait (%p5644_p3), [#allocation5], 32  }
 0x850   : > { %6608 = vsyncadd (%p5644_p3), [#allocation5], 4294967264 }
 0x851 PF: > { %s8856_s1 = sld [smem:[#allocation50_spill]]  ;;  %p43_p4 = scmp.ge.s32.totalorder %s6911_s5, 5  }
 0x852   : > { %s8857_s22 = sld [smem:[#allocation51_spill]]  ;;  %s8858_s23 = smov %s6923_s4 }
 0x853   : > { %s8859_s24 = smov %s6911_s5  ;;  %45 = sbr.rel (!%p43_p4) target bundleno = 30 (0x1e), region = 230 }
 0x858   :  { %4667 = vsyncpa [#allocation4], 1 }
 0x859   :  { %4669 = vsyncpa [#allocation4 + $0x1], 1 }
 0x85a   :  { %4670 = vsyncpa [#allocation7], 1 }
 0x85b   :  { %4672 = vsyncpa [#allocation7 + $0x1], 1 }
 0x85c   :  { %4673 = vsyncpa [#allocation10], 1 }
 0x85d   :  { %4674 = vsyncpa [#allocation13], 1 }
 0x85e   :  { %4675 = vsyncpa [#allocation16], 1 }
 0x85f   :  { %4676 = vsyncpa [#allocation19], 1 }
 0x860   :  { %4677 = vsyncpa [#allocation22], 1 }
 0x861   :  { %4678 = vsyncpa [#allocation25], 1 }
 0x862   :  { %4679 = vsyncpa [#allocation28], 1 }
 0x863   :  { %4680 = vsyncpa [#allocation31], 1 }
 0x864   :  { %4681 = vsyncpa [#allocation34], 1 }
 0x865   :  { %4682 = vsyncpa [#allocation5], 1 }
 0x866   :  { %4684 = vsyncpa [#allocation5 + $0x1], 1 }

</bundles_post_ra>
